<compile_context>
chip_gen: v5e
topology: v5e:2x2
jax: 0.10.0
libtpu: 0.0.40
codegen_flags: <defaults>
</compile_context>

<pallas_src>
import functools

import jax
import jax.numpy as jnp
from jax import lax
from jax.experimental import pallas as pl
from jax.experimental.pallas import tpu as pltpu

LANE = 128          # TPU lane width; all channel dims are padded to this.


def _round_up(x, m):
    return (x + m - 1) // m * m


def _shifted_tap(x3, dh, dw):
    """t[h, w, :] = x3[h+dh, w+dw, :], zero where out of range (SAME padding).

    Built from static slices + zero blocks only (conservative, guaranteed Mosaic
    lowering).  The H shift is a major-dim slice (tile-granular, cheap); the W
    shift is a sublane shift handled by the relayout engine / XLU.
    """
    H, W, C = x3.shape
    dt = x3.dtype
    v = x3
    if dh > 0:
        v = jnp.concatenate([v[dh:], jnp.zeros((dh, W, C), dt)], axis=0)
    elif dh < 0:
        v = jnp.concatenate([jnp.zeros((-dh, W, C), dt), v[:H + dh]], axis=0)
    if dw > 0:
        v = jnp.concatenate([v[:, dw:, :], jnp.zeros((H, dw, C), dt)], axis=1)
    elif dw < 0:
        v = jnp.concatenate([jnp.zeros((H, -dw, C), dt), v[:, :W + dw, :]],
                            axis=1)
    return v


# ----------------------------------------------------------------------------
# Conv2d(3x3, stride=1, pad=1) + bias + ReLU (+ optional fused MaxPool2d(2,2))
# One image per grid step; channels already padded to LANE; activations bf16.
# ----------------------------------------------------------------------------
def _conv3x3_relu_kernel(x_ref, w_ref, b_ref, o_ref, *, do_pool):
    # x_ref: (1, H, W, C)    bf16 NHWC input tile (C = 128-padded channels)
    # w_ref: (9, C, Cout)    bf16 tap-major weights (tap = kh*3 + kw)
    # b_ref: (1, Cout)       f32  (padded entries are exactly 0)
    # o_ref: (1, H, W, Cout) or (1, H//2, W//2, Cout) when do_pool
    _, H, W, C = x_ref.shape
    Cout = w_ref.shape[-1]
    HW = H * W

    x3 = x_ref[0]                                         # (H, W, C) bf16

    # 3x3 SAME conv = 9 accumulated MXU dots over shifted views of the input.
    # No im2col slab, no padded scratch: zero borders live in the shifted view,
    # the f32 accumulator stays functional (vregs / compiler-managed).
    acc = None
    for kh in range(3):
        for kw in range(3):
            tap = _shifted_tap(x3, kh - 1, kw - 1).reshape(HW, C)
            d = jnp.dot(tap, w_ref[kh * 3 + kw],
                        preferred_element_type=jnp.float32)
            acc = d if acc is None else acc + d

    acc = jnp.maximum(acc + b_ref[...], 0.0)              # bias + ReLU (f32)
    t = acc.reshape(H, W, Cout)

    if do_pool:
        Ho, Wo = H // 2, W // 2
        t = t[:2 * Ho, :2 * Wo, :]                        # PyTorch floor crop
        t = t.astype(o_ref.dtype)                         # max commutes w/ cast
        # H direction: free leading-dim split, no sublane relayout.
        t = t.reshape(Ho, 2, 2 * Wo, Cout)
        t = jnp.maximum(t[:, 0], t[:, 1])                 # (Ho, 2*Wo, Cout)
        # W direction: one small de-interleave on the already-halved bf16 slab.
        t = t.reshape(Ho, Wo, 2, Cout)
        t = jnp.maximum(t[:, :, 0, :], t[:, :, 1, :])     # (Ho, Wo, Cout)
        o_ref[...] = t[None]
    else:
        o_ref[...] = t[None].astype(o_ref.dtype)


def conv3x3_relu(x_nhwc, w_oihw, b, *, pool, out_dtype=jnp.bfloat16):
    """SAME 3x3 conv + bias + ReLU (+ fused 2x2 max-pool) on 128-padded NHWC."""
    N, H, W, C = x_nhwc.shape
    cout_real, cin_real = w_oihw.shape[0], w_oihw.shape[1]
    Cout = _round_up(cout_real, LANE)
    assert C % LANE == 0 and C >= cin_real
    Ho, Wo = (H // 2, W // 2) if pool else (H, W)

    # OIHW -> (kh, kw, Cin, Cout) -> (9, C, Cout), channels zero-padded to the
    # 128-lane width, cast to bf16 for the MXU.  Tiny; const-folded under jit.
    # TODO(synk): for the Cin=3 first layer, packing the 27 real K values into a
    # single 128-wide K band would remove the remaining wasted MXU columns; with
    # the slab gone that waste is idle MXU time only and is not the binding slot
    # at these sizes, so it is left as a follow-up.
    w_t = jnp.transpose(w_oihw, (2, 3, 1, 0))
    w_t = jnp.pad(w_t, ((0, 0), (0, 0), (0, C - cin_real),
                        (0, Cout - cout_real)))
    w9 = w_t.reshape(9, C, Cout).astype(jnp.bfloat16)
    # Padded bias entries must stay exactly 0 so padded Cout channels are 0 after
    # ReLU (the next layer's padded input channels rely on this invariant).
    b_pad = jnp.pad(b, (0, Cout - cout_real)).astype(jnp.float32).reshape(1, Cout)

    return pl.pallas_call(
        functools.partial(_conv3x3_relu_kernel, do_pool=pool),
        out_shape=jax.ShapeDtypeStruct((N, Ho, Wo, Cout), out_dtype),
        grid=(N,),
        in_specs=[
            pl.BlockSpec((1, H, W, C), lambda n: (n, 0, 0, 0)),
            pl.BlockSpec((9, C, Cout), lambda n: (0, 0, 0)),
            pl.BlockSpec((1, Cout), lambda n: (0, 0)),
        ],
        out_specs=pl.BlockSpec((1, Ho, Wo, Cout), lambda n: (n, 0, 0, 0)),
        compiler_params=pltpu.CompilerParams(
            dimension_semantics=("parallel",)),
    )(x_nhwc, w9, b_pad)


# ----------------------------------------------------------------------------
# Standalone MaxPool2d(2, 2) -- only used when an 'M' cannot be fused into the
# preceding conv.  Lane-dense, gridded over N, floor-crops odd spatial dims.
# ----------------------------------------------------------------------------
def _maxpool2x2_kernel(x_ref, o_ref):
    _, H, W, C = x_ref.shape
    _, Ho, Wo, _ = o_ref.shape
    t = x_ref[0, :2 * Ho, :2 * Wo, :]                     # floor crop
    t = t.reshape(Ho, 2, 2 * Wo, C)
    t = jnp.maximum(t[:, 0], t[:, 1])                     # free H pairing
    t = t.reshape(Ho, Wo, 2, C)
    o_ref[...] = jnp.maximum(t[:, :, 0, :], t[:, :, 1, :])[None]


def maxpool2x2(x_nhwc):
    N, H, W, C = x_nhwc.shape
    Ho, Wo = H // 2, W // 2
    return pl.pallas_call(
        _maxpool2x2_kernel,
        out_shape=jax.ShapeDtypeStruct((N, Ho, Wo, C), x_nhwc.dtype),
        grid=(N,),
        in_specs=[pl.BlockSpec((1, H, W, C), lambda n: (n, 0, 0, 0))],
        out_specs=pl.BlockSpec((1, Ho, Wo, C), lambda n: (n, 0, 0, 0)),
        compiler_params=pltpu.CompilerParams(
            dimension_semantics=("parallel",)),
    )(x_nhwc)


# ----------------------------------------------------------------------------
# VGG "features" stack
# ----------------------------------------------------------------------------
VGG_CFG = [8, "M", 16, "M"]     # small VGG-style make_layers config


def init_params(key, cfg, in_channels=3):
    params = []
    c_in = in_channels
    for v in cfg:
        if v == "M":
            continue
        key, kw_, kb_ = jax.random.split(key, 3)
        fan_in = c_in * 3 * 3
        w = jax.random.normal(kw_, (v, c_in, 3, 3), jnp.float32) * jnp.sqrt(
            2.0 / fan_in)                                    # OIHW like PyTorch
        b = jax.random.normal(kb_, (v,), jnp.float32) * 0.01
        params.append((w, b))
        c_in = v
    return params


def vgg_features(x_nchw, params, cfg=VGG_CFG):
    """Pallas implementation of VGG.forward (i.e. self.features(x))."""
    x = jnp.transpose(x_nchw, (0, 2, 3, 1))          # NCHW -> NHWC
    c_real = x.shape[-1]
    x = jnp.pad(x, ((0, 0), (0, 0), (0, 0),
                    (0, _round_up(c_real, LANE) - c_real)))   # lane-pad once
    x = x.astype(jnp.bfloat16)                       # bf16 activations
    i, pi = 0, 0
    while i < len(cfg):
        v = cfg[i]
        if v == "M":                                 # non-fusable pool (rare)
            x = maxpool2x2(x)
            i += 1
        else:
            w, b = params[pi]
            pi += 1
            fuse = (i + 1 < len(cfg)) and cfg[i + 1] == "M"
            x = conv3x3_relu(x, w, b, pool=fuse)
            c_real = v
            i += 2 if fuse else 1
    x = x[..., :c_real].astype(jnp.float32)          # drop channel padding
    return jnp.transpose(x, (0, 3, 1, 2))            # back to PyTorch NCHW


def vgg_features_ref(x_nchw, params, cfg=VGG_CFG):
    """Pure-JAX (XLA, f32) reference for correctness checking."""
    x = x_nchw
    pi = 0
    for v in cfg:
        if v == "M":
            x = lax.reduce_window(x, -jnp.inf, lax.max,
                                  (1, 1, 2, 2), (1, 1, 2, 2), "VALID")
        else:
            w, b = params[pi]
            pi += 1
            x = lax.conv_general_dilated(
                x, w, (1, 1), "SAME",
                dimension_numbers=("NCHW", "OIHW", "NCHW"))
            x = jnp.maximum(x + b[None, :, None, None], 0.0)
    return x


if __name__ == "__main__":
    key = jax.random.PRNGKey(0)
    kx, kp = jax.random.split(key)
    x = jax.random.normal(kx, (2, 3, 16, 16), jnp.float32)   # NCHW input
    params = init_params(kp, VGG_CFG, in_channels=3)

    out = jax.jit(lambda a: vgg_features(a, params))(x)
    out = jax.block_until_ready(out)

    ref = vgg_features_ref(x, params)
    assert out.shape == ref.shape, (out.shape, ref.shape)
    err = float(jnp.max(jnp.abs(out - ref)))
    # bf16 MXU operands + bf16 inter-layer activations (f32 accumulation) vs the
    # pure-f32 XLA reference: expected max |err| ~1e-2 at these magnitudes.
    assert jnp.allclose(out, ref, atol=5e-2, rtol=5e-2), err
    print("KERNEL_OK")
</pallas_src>

<mosaic_0001>
module attributes {stable_mosaic.version = 11 : i64} {
  func.func @_conv3x3_relu_kernel(%arg0: i32, %arg1: memref<1x16x16x128xbf16, #tpu.memory_space<vmem>>, %arg2: memref<9x128x128xbf16, #tpu.memory_space<vmem>>, %arg3: memref<1x128xf32, #tpu.memory_space<vmem>>, %arg4: memref<1x8x8x128xbf16, #tpu.memory_space<vmem>>) attributes {dimension_semantics = [#tpu.dimension_semantics<parallel>], iteration_bounds = array<i64: 2>, scalar_prefetch = 0 : i64, scratch_operands = 0 : i64, tpu.core_type = #tpu.core_type<tc>, window_params = [{transform_indices = @transform_0, window_bounds = array<i64: 1, 16, 16, 128>}, {pipeline_mode = #tpu.pipeline_mode<synchronous>, transform_indices = @transform_1, window_bounds = array<i64: 9, 128, 128>}, {pipeline_mode = #tpu.pipeline_mode<synchronous>, transform_indices = @transform_2, window_bounds = array<i64: 1, 128>}, {transform_indices = @transform_3, window_bounds = array<i64: 1, 8, 8, 128>}]} {
    %c0 = arith.constant 0 : index
    %c0_0 = arith.constant 0 : index
    %c0_1 = arith.constant 0 : index
    %c0_2 = arith.constant 0 : index
    %0 = vector.load %arg1[%c0, %c0_0, %c0_1, %c0_2] : memref<1x16x16x128xbf16, #tpu.memory_space<vmem>>, vector<1x16x16x128xbf16>
    %1 = vector.shape_cast %0 : vector<1x16x16x128xbf16> to vector<16x16x128xbf16>
    %cst = arith.constant 0.000000e+00 : bf16
    %2 = vector.broadcast %cst : bf16 to vector<1x16x128xbf16>
    %3 = vector.extract_strided_slice %1 {offsets = [0, 0, 0], sizes = [15, 16, 128], strides = [1, 1, 1]} : vector<16x16x128xbf16> to vector<15x16x128xbf16>
    %4 = tpu.concatenate %2, %3 in 0 : vector<1x16x128xbf16>, vector<15x16x128xbf16> -> vector<16x16x128xbf16>
    %cst_3 = arith.constant 0.000000e+00 : bf16
    %5 = vector.broadcast %cst_3 : bf16 to vector<16x1x128xbf16>
    %6 = vector.extract_strided_slice %4 {offsets = [0, 0, 0], sizes = [16, 15, 128], strides = [1, 1, 1]} : vector<16x16x128xbf16> to vector<16x15x128xbf16>
    %7 = tpu.concatenate %5, %6 in 1 : vector<16x1x128xbf16>, vector<16x15x128xbf16> -> vector<16x16x128xbf16>
    %8 = vector.shape_cast %7 : vector<16x16x128xbf16> to vector<256x128xbf16>
    %c0_4 = arith.constant 0 : index
    %c0_5 = arith.constant 0 : index
    %c0_6 = arith.constant 0 : index
    %9 = vector.load %arg2[%c0_4, %c0_5, %c0_6] : memref<9x128x128xbf16, #tpu.memory_space<vmem>>, vector<1x128x128xbf16>
    %10 = vector.shape_cast %9 : vector<1x128x128xbf16> to vector<128x128xbf16>
    %cst_7 = arith.constant dense<0.000000e+00> : vector<256x128xf32>
    %11 = tpu.matmul %8, %10, %cst_7 {dimension_numbers = #tpu.dot_dimension_numbers<[1], [0], [0], [1], [0, 0, 1, 1], [], []>} : vector<256x128xbf16>, vector<128x128xbf16>, vector<256x128xf32> -> vector<256x128xf32>
    %cst_8 = arith.constant 0.000000e+00 : bf16
    %12 = vector.broadcast %cst_8 : bf16 to vector<1x16x128xbf16>
    %13 = vector.extract_strided_slice %1 {offsets = [0, 0, 0], sizes = [15, 16, 128], strides = [1, 1, 1]} : vector<16x16x128xbf16> to vector<15x16x128xbf16>
    %14 = tpu.concatenate %12, %13 in 0 : vector<1x16x128xbf16>, vector<15x16x128xbf16> -> vector<16x16x128xbf16>
    %15 = vector.shape_cast %14 : vector<16x16x128xbf16> to vector<256x128xbf16>
    %c1 = arith.constant 1 : index
    %c0_9 = arith.constant 0 : index
    %c0_10 = arith.constant 0 : index
    %16 = vector.load %arg2[%c1, %c0_9, %c0_10] : memref<9x128x128xbf16, #tpu.memory_space<vmem>>, vector<1x128x128xbf16>
    %17 = vector.shape_cast %16 : vector<1x128x128xbf16> to vector<128x128xbf16>
    %cst_11 = arith.constant dense<0.000000e+00> : vector<256x128xf32>
    %18 = tpu.matmul %15, %17, %cst_11 {dimension_numbers = #tpu.dot_dimension_numbers<[1], [0], [0], [1], [0, 0, 1, 1], [], []>} : vector<256x128xbf16>, vector<128x128xbf16>, vector<256x128xf32> -> vector<256x128xf32>
    %19 = arith.addf %11, %18 : vector<256x128xf32>
    %cst_12 = arith.constant 0.000000e+00 : bf16
    %20 = vector.broadcast %cst_12 : bf16 to vector<1x16x128xbf16>
    %21 = vector.extract_strided_slice %1 {offsets = [0, 0, 0], sizes = [15, 16, 128], strides = [1, 1, 1]} : vector<16x16x128xbf16> to vector<15x16x128xbf16>
    %22 = tpu.concatenate %20, %21 in 0 : vector<1x16x128xbf16>, vector<15x16x128xbf16> -> vector<16x16x128xbf16>
    %23 = vector.extract_strided_slice %22 {offsets = [0, 1, 0], sizes = [16, 15, 128], strides = [1, 1, 1]} : vector<16x16x128xbf16> to vector<16x15x128xbf16>
    %cst_13 = arith.constant 0.000000e+00 : bf16
    %24 = vector.broadcast %cst_13 : bf16 to vector<16x1x128xbf16>
    %25 = tpu.concatenate %23, %24 in 1 : vector<16x15x128xbf16>, vector<16x1x128xbf16> -> vector<16x16x128xbf16>
    %26 = vector.shape_cast %25 : vector<16x16x128xbf16> to vector<256x128xbf16>
    %c2 = arith.constant 2 : index
    %c0_14 = arith.constant 0 : index
    %c0_15 = arith.constant 0 : index
    %27 = vector.load %arg2[%c2, %c0_14, %c0_15] : memref<9x128x128xbf16, #tpu.memory_space<vmem>>, vector<1x128x128xbf16>
    %28 = vector.shape_cast %27 : vector<1x128x128xbf16> to vector<128x128xbf16>
    %cst_16 = arith.constant dense<0.000000e+00> : vector<256x128xf32>
    %29 = tpu.matmul %26, %28, %cst_16 {dimension_numbers = #tpu.dot_dimension_numbers<[1], [0], [0], [1], [0, 0, 1, 1], [], []>} : vector<256x128xbf16>, vector<128x128xbf16>, vector<256x128xf32> -> vector<256x128xf32>
    %30 = arith.addf %19, %29 : vector<256x128xf32>
    %cst_17 = arith.constant 0.000000e+00 : bf16
    %31 = vector.broadcast %cst_17 : bf16 to vector<16x1x128xbf16>
    %32 = vector.extract_strided_slice %1 {offsets = [0, 0, 0], sizes = [16, 15, 128], strides = [1, 1, 1]} : vector<16x16x128xbf16> to vector<16x15x128xbf16>
    %33 = tpu.concatenate %31, %32 in 1 : vector<16x1x128xbf16>, vector<16x15x128xbf16> -> vector<16x16x128xbf16>
    %34 = vector.shape_cast %33 : vector<16x16x128xbf16> to vector<256x128xbf16>
    %c3 = arith.constant 3 : index
    %c0_18 = arith.constant 0 : index
    %c0_19 = arith.constant 0 : index
    %35 = vector.load %arg2[%c3, %c0_18, %c0_19] : memref<9x128x128xbf16, #tpu.memory_space<vmem>>, vector<1x128x128xbf16>
    %36 = vector.shape_cast %35 : vector<1x128x128xbf16> to vector<128x128xbf16>
    %cst_20 = arith.constant dense<0.000000e+00> : vector<256x128xf32>
    %37 = tpu.matmul %34, %36, %cst_20 {dimension_numbers = #tpu.dot_dimension_numbers<[1], [0], [0], [1], [0, 0, 1, 1], [], []>} : vector<256x128xbf16>, vector<128x128xbf16>, vector<256x128xf32> -> vector<256x128xf32>
    %38 = arith.addf %30, %37 : vector<256x128xf32>
    %39 = vector.shape_cast %1 : vector<16x16x128xbf16> to vector<256x128xbf16>
    %c4 = arith.constant 4 : index
    %c0_21 = arith.constant 0 : index
    %c0_22 = arith.constant 0 : index
    %40 = vector.load %arg2[%c4, %c0_21, %c0_22] : memref<9x128x128xbf16, #tpu.memory_space<vmem>>, vector<1x128x128xbf16>
    %41 = vector.shape_cast %40 : vector<1x128x128xbf16> to vector<128x128xbf16>
    %cst_23 = arith.constant dense<0.000000e+00> : vector<256x128xf32>
    %42 = tpu.matmul %39, %41, %cst_23 {dimension_numbers = #tpu.dot_dimension_numbers<[1], [0], [0], [1], [0, 0, 1, 1], [], []>} : vector<256x128xbf16>, vector<128x128xbf16>, vector<256x128xf32> -> vector<256x128xf32>
    %43 = arith.addf %38, %42 : vector<256x128xf32>
    %44 = vector.extract_strided_slice %1 {offsets = [0, 1, 0], sizes = [16, 15, 128], strides = [1, 1, 1]} : vector<16x16x128xbf16> to vector<16x15x128xbf16>
    %cst_24 = arith.constant 0.000000e+00 : bf16
    %45 = vector.broadcast %cst_24 : bf16 to vector<16x1x128xbf16>
    %46 = tpu.concatenate %44, %45 in 1 : vector<16x15x128xbf16>, vector<16x1x128xbf16> -> vector<16x16x128xbf16>
    %47 = vector.shape_cast %46 : vector<16x16x128xbf16> to vector<256x128xbf16>
    %c5 = arith.constant 5 : index
    %c0_25 = arith.constant 0 : index
    %c0_26 = arith.constant 0 : index
    %48 = vector.load %arg2[%c5, %c0_25, %c0_26] : memref<9x128x128xbf16, #tpu.memory_space<vmem>>, vector<1x128x128xbf16>
    %49 = vector.shape_cast %48 : vector<1x128x128xbf16> to vector<128x128xbf16>
    %cst_27 = arith.constant dense<0.000000e+00> : vector<256x128xf32>
    %50 = tpu.matmul %47, %49, %cst_27 {dimension_numbers = #tpu.dot_dimension_numbers<[1], [0], [0], [1], [0, 0, 1, 1], [], []>} : vector<256x128xbf16>, vector<128x128xbf16>, vector<256x128xf32> -> vector<256x128xf32>
    %51 = arith.addf %43, %50 : vector<256x128xf32>
    %52 = vector.extract_strided_slice %1 {offsets = [1, 0, 0], sizes = [15, 16, 128], strides = [1, 1, 1]} : vector<16x16x128xbf16> to vector<15x16x128xbf16>
    %cst_28 = arith.constant 0.000000e+00 : bf16
    %53 = vector.broadcast %cst_28 : bf16 to vector<1x16x128xbf16>
    %54 = tpu.concatenate %52, %53 in 0 : vector<15x16x128xbf16>, vector<1x16x128xbf16> -> vector<16x16x128xbf16>
    %cst_29 = arith.constant 0.000000e+00 : bf16
    %55 = vector.broadcast %cst_29 : bf16 to vector<16x1x128xbf16>
    %56 = vector.extract_strided_slice %54 {offsets = [0, 0, 0], sizes = [16, 15, 128], strides = [1, 1, 1]} : vector<16x16x128xbf16> to vector<16x15x128xbf16>
    %57 = tpu.concatenate %55, %56 in 1 : vector<16x1x128xbf16>, vector<16x15x128xbf16> -> vector<16x16x128xbf16>
    %58 = vector.shape_cast %57 : vector<16x16x128xbf16> to vector<256x128xbf16>
    %c6 = arith.constant 6 : index
    %c0_30 = arith.constant 0 : index
    %c0_31 = arith.constant 0 : index
    %59 = vector.load %arg2[%c6, %c0_30, %c0_31] : memref<9x128x128xbf16, #tpu.memory_space<vmem>>, vector<1x128x128xbf16>
    %60 = vector.shape_cast %59 : vector<1x128x128xbf16> to vector<128x128xbf16>
    %cst_32 = arith.constant dense<0.000000e+00> : vector<256x128xf32>
    %61 = tpu.matmul %58, %60, %cst_32 {dimension_numbers = #tpu.dot_dimension_numbers<[1], [0], [0], [1], [0, 0, 1, 1], [], []>} : vector<256x128xbf16>, vector<128x128xbf16>, vector<256x128xf32> -> vector<256x128xf32>
    %62 = arith.addf %51, %61 : vector<256x128xf32>
    %63 = vector.extract_strided_slice %1 {offsets = [1, 0, 0], sizes = [15, 16, 128], strides = [1, 1, 1]} : vector<16x16x128xbf16> to vector<15x16x128xbf16>
    %cst_33 = arith.constant 0.000000e+00 : bf16
    %64 = vector.broadcast %cst_33 : bf16 to vector<1x16x128xbf16>
    %65 = tpu.concatenate %63, %64 in 0 : vector<15x16x128xbf16>, vector<1x16x128xbf16> -> vector<16x16x128xbf16>
    %66 = vector.shape_cast %65 : vector<16x16x128xbf16> to vector<256x128xbf16>
    %c7 = arith.constant 7 : index
    %c0_34 = arith.constant 0 : index
    %c0_35 = arith.constant 0 : index
    %67 = vector.load %arg2[%c7, %c0_34, %c0_35] : memref<9x128x128xbf16, #tpu.memory_space<vmem>>, vector<1x128x128xbf16>
    %68 = vector.shape_cast %67 : vector<1x128x128xbf16> to vector<128x128xbf16>
    %cst_36 = arith.constant dense<0.000000e+00> : vector<256x128xf32>
    %69 = tpu.matmul %66, %68, %cst_36 {dimension_numbers = #tpu.dot_dimension_numbers<[1], [0], [0], [1], [0, 0, 1, 1], [], []>} : vector<256x128xbf16>, vector<128x128xbf16>, vector<256x128xf32> -> vector<256x128xf32>
    %70 = arith.addf %62, %69 : vector<256x128xf32>
    %71 = vector.extract_strided_slice %1 {offsets = [1, 0, 0], sizes = [15, 16, 128], strides = [1, 1, 1]} : vector<16x16x128xbf16> to vector<15x16x128xbf16>
    %cst_37 = arith.constant 0.000000e+00 : bf16
    %72 = vector.broadcast %cst_37 : bf16 to vector<1x16x128xbf16>
    %73 = tpu.concatenate %71, %72 in 0 : vector<15x16x128xbf16>, vector<1x16x128xbf16> -> vector<16x16x128xbf16>
    %74 = vector.extract_strided_slice %73 {offsets = [0, 1, 0], sizes = [16, 15, 128], strides = [1, 1, 1]} : vector<16x16x128xbf16> to vector<16x15x128xbf16>
    %cst_38 = arith.constant 0.000000e+00 : bf16
    %75 = vector.broadcast %cst_38 : bf16 to vector<16x1x128xbf16>
    %76 = tpu.concatenate %74, %75 in 1 : vector<16x15x128xbf16>, vector<16x1x128xbf16> -> vector<16x16x128xbf16>
    %77 = vector.shape_cast %76 : vector<16x16x128xbf16> to vector<256x128xbf16>
    %c8 = arith.constant 8 : index
    %c0_39 = arith.constant 0 : index
    %c0_40 = arith.constant 0 : index
    %78 = vector.load %arg2[%c8, %c0_39, %c0_40] : memref<9x128x128xbf16, #tpu.memory_space<vmem>>, vector<1x128x128xbf16>
    %79 = vector.shape_cast %78 : vector<1x128x128xbf16> to vector<128x128xbf16>
    %cst_41 = arith.constant dense<0.000000e+00> : vector<256x128xf32>
    %80 = tpu.matmul %77, %79, %cst_41 {dimension_numbers = #tpu.dot_dimension_numbers<[1], [0], [0], [1], [0, 0, 1, 1], [], []>} : vector<256x128xbf16>, vector<128x128xbf16>, vector<256x128xf32> -> vector<256x128xf32>
    %81 = arith.addf %70, %80 : vector<256x128xf32>
    %c0_42 = arith.constant 0 : index
    %c0_43 = arith.constant 0 : index
    %82 = vector.load %arg3[%c0_42, %c0_43] : memref<1x128xf32, #tpu.memory_space<vmem>>, vector<1x128xf32>
    %83 = vector.broadcast %82 : vector<1x128xf32> to vector<256x128xf32>
    %84 = arith.addf %81, %83 : vector<256x128xf32>
    %cst_44 = arith.constant 0.000000e+00 : f32
    %85 = vector.broadcast %cst_44 : f32 to vector<256x128xf32>
    %86 = arith.maximumf %84, %85 : vector<256x128xf32>
    %87 = vector.shape_cast %86 : vector<256x128xf32> to vector<16x16x128xf32>
    %88 = arith.truncf %87 : vector<16x16x128xf32> to vector<16x16x128xbf16>
    %89 = vector.shape_cast %88 : vector<16x16x128xbf16> to vector<8x2x16x128xbf16>
    %90 = vector.extract_strided_slice %89 {offsets = [0, 0, 0, 0], sizes = [8, 1, 16, 128], strides = [1, 1, 1, 1]} : vector<8x2x16x128xbf16> to vector<8x1x16x128xbf16>
    %91 = vector.shape_cast %90 : vector<8x1x16x128xbf16> to vector<8x16x128xbf16>
    %92 = vector.extract_strided_slice %89 {offsets = [0, 1, 0, 0], sizes = [8, 1, 16, 128], strides = [1, 1, 1, 1]} : vector<8x2x16x128xbf16> to vector<8x1x16x128xbf16>
    %93 = vector.shape_cast %92 : vector<8x1x16x128xbf16> to vector<8x16x128xbf16>
    %94 = arith.maximumf %91, %93 : vector<8x16x128xbf16>
    %95 = vector.shape_cast %94 : vector<8x16x128xbf16> to vector<8x8x2x128xbf16>
    %96 = vector.extract_strided_slice %95 {offsets = [0, 0, 0, 0], sizes = [8, 8, 1, 128], strides = [1, 1, 1, 1]} : vector<8x8x2x128xbf16> to vector<8x8x1x128xbf16>
    %97 = vector.shape_cast %96 : vector<8x8x1x128xbf16> to vector<8x8x128xbf16>
    %98 = vector.extract_strided_slice %95 {offsets = [0, 0, 1, 0], sizes = [8, 8, 1, 128], strides = [1, 1, 1, 1]} : vector<8x8x2x128xbf16> to vector<8x8x1x128xbf16>
    %99 = vector.shape_cast %98 : vector<8x8x1x128xbf16> to vector<8x8x128xbf16>
    %100 = arith.maximumf %97, %99 : vector<8x8x128xbf16>
    %101 = vector.shape_cast %100 : vector<8x8x128xbf16> to vector<1x8x8x128xbf16>
    %c0_45 = arith.constant 0 : index
    %c0_46 = arith.constant 0 : index
    %c0_47 = arith.constant 0 : index
    %c0_48 = arith.constant 0 : index
    %102 = vector.load %arg4[%c0_45, %c0_46, %c0_47, %c0_48] : memref<1x8x8x128xbf16, #tpu.memory_space<vmem>>, vector<1x8x8x128xbf16>
    tpu.vector_store %arg4[%c0_45, %c0_46, %c0_47, %c0_48], %101 {strides = array<i32>} : memref<1x8x8x128xbf16, #tpu.memory_space<vmem>>, vector<1x8x8x128xbf16>,
    return
  }
  func.func @transform_0(%arg0: i32) -> (i32, i32, i32, i32) {
    %c0_i32 = arith.constant 0 : i32
    %c0_i32_0 = arith.constant 0 : i32
    %c0_i32_1 = arith.constant 0 : i32
    %c0_i32_2 = arith.constant 0 : i32
    return %arg0, %c0_i32, %c0_i32_0, %c0_i32_1 : i32, i32, i32, i32
  }
  func.func @transform_1(%arg0: i32) -> (i32, i32, i32) {
    %c0_i32 = arith.constant 0 : i32
    %c0_i32_0 = arith.constant 0 : i32
    %c0_i32_1 = arith.constant 0 : i32
    %c0_i32_2 = arith.constant 0 : i32
    return %c0_i32, %c0_i32_0, %c0_i32_1 : i32, i32, i32
  }
  func.func @transform_2(%arg0: i32) -> (i32, i32) {
    %c0_i32 = arith.constant 0 : i32
    %c0_i32_0 = arith.constant 0 : i32
    %c0_i32_1 = arith.constant 0 : i32
    return %c0_i32, %c0_i32_0 : i32, i32
  }
  func.func @transform_3(%arg0: i32) -> (i32, i32, i32, i32) {
    %c0_i32 = arith.constant 0 : i32
    %c0_i32_0 = arith.constant 0 : i32
    %c0_i32_1 = arith.constant 0 : i32
    %c0_i32_2 = arith.constant 0 : i32
    return %arg0, %c0_i32, %c0_i32_0, %c0_i32_1 : i32, i32, i32, i32
  }
}

module attributes {stable_mosaic.version = 11 : i64} {
  func.func @_conv3x3_relu_kernel(%arg0: i32, %arg1: memref<1x8x8x128xbf16, #tpu.memory_space<vmem>>, %arg2: memref<9x128x128xbf16, #tpu.memory_space<vmem>>, %arg3: memref<1x128xf32, #tpu.memory_space<vmem>>, %arg4: memref<1x4x4x128xbf16, #tpu.memory_space<vmem>>) attributes {dimension_semantics = [#tpu.dimension_semantics<parallel>], iteration_bounds = array<i64: 2>, scalar_prefetch = 0 : i64, scratch_operands = 0 : i64, tpu.core_type = #tpu.core_type<tc>, window_params = [{transform_indices = @transform_0, window_bounds = array<i64: 1, 8, 8, 128>}, {pipeline_mode = #tpu.pipeline_mode<synchronous>, transform_indices = @transform_1, window_bounds = array<i64: 9, 128, 128>}, {pipeline_mode = #tpu.pipeline_mode<synchronous>, transform_indices = @transform_2, window_bounds = array<i64: 1, 128>}, {transform_indices = @transform_3, window_bounds = array<i64: 1, 4, 4, 128>}]} {
    %c0 = arith.constant 0 : index
    %c0_0 = arith.constant 0 : index
    %c0_1 = arith.constant 0 : index
    %c0_2 = arith.constant 0 : index
    %0 = vector.load %arg1[%c0, %c0_0, %c0_1, %c0_2] : memref<1x8x8x128xbf16, #tpu.memory_space<vmem>>, vector<1x8x8x128xbf16>
    %1 = vector.shape_cast %0 : vector<1x8x8x128xbf16> to vector<8x8x128xbf16>
    %cst = arith.constant 0.000000e+00 : bf16
    %2 = vector.broadcast %cst : bf16 to vector<1x8x128xbf16>
    %3 = vector.extract_strided_slice %1 {offsets = [0, 0, 0], sizes = [7, 8, 128], strides = [1, 1, 1]} : vector<8x8x128xbf16> to vector<7x8x128xbf16>
    %4 = tpu.concatenate %2, %3 in 0 : vector<1x8x128xbf16>, vector<7x8x128xbf16> -> vector<8x8x128xbf16>
    %cst_3 = arith.constant 0.000000e+00 : bf16
    %5 = vector.broadcast %cst_3 : bf16 to vector<8x1x128xbf16>
    %6 = vector.extract_strided_slice %4 {offsets = [0, 0, 0], sizes = [8, 7, 128], strides = [1, 1, 1]} : vector<8x8x128xbf16> to vector<8x7x128xbf16>
    %7 = tpu.concatenate %5, %6 in 1 : vector<8x1x128xbf16>, vector<8x7x128xbf16> -> vector<8x8x128xbf16>
    %8 = vector.shape_cast %7 : vector<8x8x128xbf16> to vector<64x128xbf16>
    %c0_4 = arith.constant 0 : index
    %c0_5 = arith.constant 0 : index
    %c0_6 = arith.constant 0 : index
    %9 = vector.load %arg2[%c0_4, %c0_5, %c0_6] : memref<9x128x128xbf16, #tpu.memory_space<vmem>>, vector<1x128x128xbf16>
    %10 = vector.shape_cast %9 : vector<1x128x128xbf16> to vector<128x128xbf16>
    %cst_7 = arith.constant dense<0.000000e+00> : vector<64x128xf32>
    %11 = tpu.matmul %8, %10, %cst_7 {dimension_numbers = #tpu.dot_dimension_numbers<[1], [0], [0], [1], [0, 0, 1, 1], [], []>} : vector<64x128xbf16>, vector<128x128xbf16>, vector<64x128xf32> -> vector<64x128xf32>
    %cst_8 = arith.constant 0.000000e+00 : bf16
    %12 = vector.broadcast %cst_8 : bf16 to vector<1x8x128xbf16>
    %13 = vector.extract_strided_slice %1 {offsets = [0, 0, 0], sizes = [7, 8, 128], strides = [1, 1, 1]} : vector<8x8x128xbf16> to vector<7x8x128xbf16>
    %14 = tpu.concatenate %12, %13 in 0 : vector<1x8x128xbf16>, vector<7x8x128xbf16> -> vector<8x8x128xbf16>
    %15 = vector.shape_cast %14 : vector<8x8x128xbf16> to vector<64x128xbf16>
    %c1 = arith.constant 1 : index
    %c0_9 = arith.constant 0 : index
    %c0_10 = arith.constant 0 : index
    %16 = vector.load %arg2[%c1, %c0_9, %c0_10] : memref<9x128x128xbf16, #tpu.memory_space<vmem>>, vector<1x128x128xbf16>
    %17 = vector.shape_cast %16 : vector<1x128x128xbf16> to vector<128x128xbf16>
    %cst_11 = arith.constant dense<0.000000e+00> : vector<64x128xf32>
    %18 = tpu.matmul %15, %17, %cst_11 {dimension_numbers = #tpu.dot_dimension_numbers<[1], [0], [0], [1], [0, 0, 1, 1], [], []>} : vector<64x128xbf16>, vector<128x128xbf16>, vector<64x128xf32> -> vector<64x128xf32>
    %19 = arith.addf %11, %18 : vector<64x128xf32>
    %cst_12 = arith.constant 0.000000e+00 : bf16
    %20 = vector.broadcast %cst_12 : bf16 to vector<1x8x128xbf16>
    %21 = vector.extract_strided_slice %1 {offsets = [0, 0, 0], sizes = [7, 8, 128], strides = [1, 1, 1]} : vector<8x8x128xbf16> to vector<7x8x128xbf16>
    %22 = tpu.concatenate %20, %21 in 0 : vector<1x8x128xbf16>, vector<7x8x128xbf16> -> vector<8x8x128xbf16>
    %23 = vector.extract_strided_slice %22 {offsets = [0, 1, 0], sizes = [8, 7, 128], strides = [1, 1, 1]} : vector<8x8x128xbf16> to vector<8x7x128xbf16>
    %cst_13 = arith.constant 0.000000e+00 : bf16
    %24 = vector.broadcast %cst_13 : bf16 to vector<8x1x128xbf16>
    %25 = tpu.concatenate %23, %24 in 1 : vector<8x7x128xbf16>, vector<8x1x128xbf16> -> vector<8x8x128xbf16>
    %26 = vector.shape_cast %25 : vector<8x8x128xbf16> to vector<64x128xbf16>
    %c2 = arith.constant 2 : index
    %c0_14 = arith.constant 0 : index
    %c0_15 = arith.constant 0 : index
    %27 = vector.load %arg2[%c2, %c0_14, %c0_15] : memref<9x128x128xbf16, #tpu.memory_space<vmem>>, vector<1x128x128xbf16>
    %28 = vector.shape_cast %27 : vector<1x128x128xbf16> to vector<128x128xbf16>
    %cst_16 = arith.constant dense<0.000000e+00> : vector<64x128xf32>
    %29 = tpu.matmul %26, %28, %cst_16 {dimension_numbers = #tpu.dot_dimension_numbers<[1], [0], [0], [1], [0, 0, 1, 1], [], []>} : vector<64x128xbf16>, vector<128x128xbf16>, vector<64x128xf32> -> vector<64x128xf32>
    %30 = arith.addf %19, %29 : vector<64x128xf32>
    %cst_17 = arith.constant 0.000000e+00 : bf16
    %31 = vector.broadcast %cst_17 : bf16 to vector<8x1x128xbf16>
    %32 = vector.extract_strided_slice %1 {offsets = [0, 0, 0], sizes = [8, 7, 128], strides = [1, 1, 1]} : vector<8x8x128xbf16> to vector<8x7x128xbf16>
    %33 = tpu.concatenate %31, %32 in 1 : vector<8x1x128xbf16>, vector<8x7x128xbf16> -> vector<8x8x128xbf16>
    %34 = vector.shape_cast %33 : vector<8x8x128xbf16> to vector<64x128xbf16>
    %c3 = arith.constant 3 : index
    %c0_18 = arith.constant 0 : index
    %c0_19 = arith.constant 0 : index
    %35 = vector.load %arg2[%c3, %c0_18, %c0_19] : memref<9x128x128xbf16, #tpu.memory_space<vmem>>, vector<1x128x128xbf16>
    %36 = vector.shape_cast %35 : vector<1x128x128xbf16> to vector<128x128xbf16>
    %cst_20 = arith.constant dense<0.000000e+00> : vector<64x128xf32>
    %37 = tpu.matmul %34, %36, %cst_20 {dimension_numbers = #tpu.dot_dimension_numbers<[1], [0], [0], [1], [0, 0, 1, 1], [], []>} : vector<64x128xbf16>, vector<128x128xbf16>, vector<64x128xf32> -> vector<64x128xf32>
    %38 = arith.addf %30, %37 : vector<64x128xf32>
    %39 = vector.shape_cast %1 : vector<8x8x128xbf16> to vector<64x128xbf16>
    %c4 = arith.constant 4 : index
    %c0_21 = arith.constant 0 : index
    %c0_22 = arith.constant 0 : index
    %40 = vector.load %arg2[%c4, %c0_21, %c0_22] : memref<9x128x128xbf16, #tpu.memory_space<vmem>>, vector<1x128x128xbf16>
    %41 = vector.shape_cast %40 : vector<1x128x128xbf16> to vector<128x128xbf16>
    %cst_23 = arith.constant dense<0.000000e+00> : vector<64x128xf32>
    %42 = tpu.matmul %39, %41, %cst_23 {dimension_numbers = #tpu.dot_dimension_numbers<[1], [0], [0], [1], [0, 0, 1, 1], [], []>} : vector<64x128xbf16>, vector<128x128xbf16>, vector<64x128xf32> -> vector<64x128xf32>
    %43 = arith.addf %38, %42 : vector<64x128xf32>
    %44 = vector.extract_strided_slice %1 {offsets = [0, 1, 0], sizes = [8, 7, 128], strides = [1, 1, 1]} : vector<8x8x128xbf16> to vector<8x7x128xbf16>
    %cst_24 = arith.constant 0.000000e+00 : bf16
    %45 = vector.broadcast %cst_24 : bf16 to vector<8x1x128xbf16>
    %46 = tpu.concatenate %44, %45 in 1 : vector<8x7x128xbf16>, vector<8x1x128xbf16> -> vector<8x8x128xbf16>
    %47 = vector.shape_cast %46 : vector<8x8x128xbf16> to vector<64x128xbf16>
    %c5 = arith.constant 5 : index
    %c0_25 = arith.constant 0 : index
    %c0_26 = arith.constant 0 : index
    %48 = vector.load %arg2[%c5, %c0_25, %c0_26] : memref<9x128x128xbf16, #tpu.memory_space<vmem>>, vector<1x128x128xbf16>
    %49 = vector.shape_cast %48 : vector<1x128x128xbf16> to vector<128x128xbf16>
    %cst_27 = arith.constant dense<0.000000e+00> : vector<64x128xf32>
    %50 = tpu.matmul %47, %49, %cst_27 {dimension_numbers = #tpu.dot_dimension_numbers<[1], [0], [0], [1], [0, 0, 1, 1], [], []>} : vector<64x128xbf16>, vector<128x128xbf16>, vector<64x128xf32> -> vector<64x128xf32>
    %51 = arith.addf %43, %50 : vector<64x128xf32>
    %52 = vector.extract_strided_slice %1 {offsets = [1, 0, 0], sizes = [7, 8, 128], strides = [1, 1, 1]} : vector<8x8x128xbf16> to vector<7x8x128xbf16>
    %cst_28 = arith.constant 0.000000e+00 : bf16
    %53 = vector.broadcast %cst_28 : bf16 to vector<1x8x128xbf16>
    %54 = tpu.concatenate %52, %53 in 0 : vector<7x8x128xbf16>, vector<1x8x128xbf16> -> vector<8x8x128xbf16>
    %cst_29 = arith.constant 0.000000e+00 : bf16
    %55 = vector.broadcast %cst_29 : bf16 to vector<8x1x128xbf16>
    %56 = vector.extract_strided_slice %54 {offsets = [0, 0, 0], sizes = [8, 7, 128], strides = [1, 1, 1]} : vector<8x8x128xbf16> to vector<8x7x128xbf16>
    %57 = tpu.concatenate %55, %56 in 1 : vector<8x1x128xbf16>, vector<8x7x128xbf16> -> vector<8x8x128xbf16>
    %58 = vector.shape_cast %57 : vector<8x8x128xbf16> to vector<64x128xbf16>
    %c6 = arith.constant 6 : index
    %c0_30 = arith.constant 0 : index
    %c0_31 = arith.constant 0 : index
    %59 = vector.load %arg2[%c6, %c0_30, %c0_31] : memref<9x128x128xbf16, #tpu.memory_space<vmem>>, vector<1x128x128xbf16>
    %60 = vector.shape_cast %59 : vector<1x128x128xbf16> to vector<128x128xbf16>
    %cst_32 = arith.constant dense<0.000000e+00> : vector<64x128xf32>
    %61 = tpu.matmul %58, %60, %cst_32 {dimension_numbers = #tpu.dot_dimension_numbers<[1], [0], [0], [1], [0, 0, 1, 1], [], []>} : vector<64x128xbf16>, vector<128x128xbf16>, vector<64x128xf32> -> vector<64x128xf32>
    %62 = arith.addf %51, %61 : vector<64x128xf32>
    %63 = vector.extract_strided_slice %1 {offsets = [1, 0, 0], sizes = [7, 8, 128], strides = [1, 1, 1]} : vector<8x8x128xbf16> to vector<7x8x128xbf16>
    %cst_33 = arith.constant 0.000000e+00 : bf16
    %64 = vector.broadcast %cst_33 : bf16 to vector<1x8x128xbf16>
    %65 = tpu.concatenate %63, %64 in 0 : vector<7x8x128xbf16>, vector<1x8x128xbf16> -> vector<8x8x128xbf16>
    %66 = vector.shape_cast %65 : vector<8x8x128xbf16> to vector<64x128xbf16>
    %c7 = arith.constant 7 : index
    %c0_34 = arith.constant 0 : index
    %c0_35 = arith.constant 0 : index
    %67 = vector.load %arg2[%c7, %c0_34, %c0_35] : memref<9x128x128xbf16, #tpu.memory_space<vmem>>, vector<1x128x128xbf16>
    %68 = vector.shape_cast %67 : vector<1x128x128xbf16> to vector<128x128xbf16>
    %cst_36 = arith.constant dense<0.000000e+00> : vector<64x128xf32>
    %69 = tpu.matmul %66, %68, %cst_36 {dimension_numbers = #tpu.dot_dimension_numbers<[1], [0], [0], [1], [0, 0, 1, 1], [], []>} : vector<64x128xbf16>, vector<128x128xbf16>, vector<64x128xf32> -> vector<64x128xf32>
    %70 = arith.addf %62, %69 : vector<64x128xf32>
    %71 = vector.extract_strided_slice %1 {offsets = [1, 0, 0], sizes = [7, 8, 128], strides = [1, 1, 1]} : vector<8x8x128xbf16> to vector<7x8x128xbf16>
    %cst_37 = arith.constant 0.000000e+00 : bf16
    %72 = vector.broadcast %cst_37 : bf16 to vector<1x8x128xbf16>
    %73 = tpu.concatenate %71, %72 in 0 : vector<7x8x128xbf16>, vector<1x8x128xbf16> -> vector<8x8x128xbf16>
    %74 = vector.extract_strided_slice %73 {offsets = [0, 1, 0], sizes = [8, 7, 128], strides = [1, 1, 1]} : vector<8x8x128xbf16> to vector<8x7x128xbf16>
    %cst_38 = arith.constant 0.000000e+00 : bf16
    %75 = vector.broadcast %cst_38 : bf16 to vector<8x1x128xbf16>
    %76 = tpu.concatenate %74, %75 in 1 : vector<8x7x128xbf16>, vector<8x1x128xbf16> -> vector<8x8x128xbf16>
    %77 = vector.shape_cast %76 : vector<8x8x128xbf16> to vector<64x128xbf16>
    %c8 = arith.constant 8 : index
    %c0_39 = arith.constant 0 : index
    %c0_40 = arith.constant 0 : index
    %78 = vector.load %arg2[%c8, %c0_39, %c0_40] : memref<9x128x128xbf16, #tpu.memory_space<vmem>>, vector<1x128x128xbf16>
    %79 = vector.shape_cast %78 : vector<1x128x128xbf16> to vector<128x128xbf16>
    %cst_41 = arith.constant dense<0.000000e+00> : vector<64x128xf32>
    %80 = tpu.matmul %77, %79, %cst_41 {dimension_numbers = #tpu.dot_dimension_numbers<[1], [0], [0], [1], [0, 0, 1, 1], [], []>} : vector<64x128xbf16>, vector<128x128xbf16>, vector<64x128xf32> -> vector<64x128xf32>
    %81 = arith.addf %70, %80 : vector<64x128xf32>
    %c0_42 = arith.constant 0 : index
    %c0_43 = arith.constant 0 : index
    %82 = vector.load %arg3[%c0_42, %c0_43] : memref<1x128xf32, #tpu.memory_space<vmem>>, vector<1x128xf32>
    %83 = vector.broadcast %82 : vector<1x128xf32> to vector<64x128xf32>
    %84 = arith.addf %81, %83 : vector<64x128xf32>
    %cst_44 = arith.constant 0.000000e+00 : f32
    %85 = vector.broadcast %cst_44 : f32 to vector<64x128xf32>
    %86 = arith.maximumf %84, %85 : vector<64x128xf32>
    %87 = vector.shape_cast %86 : vector<64x128xf32> to vector<8x8x128xf32>
    %88 = arith.truncf %87 : vector<8x8x128xf32> to vector<8x8x128xbf16>
    %89 = vector.shape_cast %88 : vector<8x8x128xbf16> to vector<4x2x8x128xbf16>
    %90 = vector.extract_strided_slice %89 {offsets = [0, 0, 0, 0], sizes = [4, 1, 8, 128], strides = [1, 1, 1, 1]} : vector<4x2x8x128xbf16> to vector<4x1x8x128xbf16>
    %91 = vector.shape_cast %90 : vector<4x1x8x128xbf16> to vector<4x8x128xbf16>
    %92 = vector.extract_strided_slice %89 {offsets = [0, 1, 0, 0], sizes = [4, 1, 8, 128], strides = [1, 1, 1, 1]} : vector<4x2x8x128xbf16> to vector<4x1x8x128xbf16>
    %93 = vector.shape_cast %92 : vector<4x1x8x128xbf16> to vector<4x8x128xbf16>
    %94 = arith.maximumf %91, %93 : vector<4x8x128xbf16>
    %95 = vector.shape_cast %94 : vector<4x8x128xbf16> to vector<4x4x2x128xbf16>
    %96 = vector.extract_strided_slice %95 {offsets = [0, 0, 0, 0], sizes = [4, 4, 1, 128], strides = [1, 1, 1, 1]} : vector<4x4x2x128xbf16> to vector<4x4x1x128xbf16>
    %97 = vector.shape_cast %96 : vector<4x4x1x128xbf16> to vector<4x4x128xbf16>
    %98 = vector.extract_strided_slice %95 {offsets = [0, 0, 1, 0], sizes = [4, 4, 1, 128], strides = [1, 1, 1, 1]} : vector<4x4x2x128xbf16> to vector<4x4x1x128xbf16>
    %99 = vector.shape_cast %98 : vector<4x4x1x128xbf16> to vector<4x4x128xbf16>
    %100 = arith.maximumf %97, %99 : vector<4x4x128xbf16>
    %101 = vector.shape_cast %100 : vector<4x4x128xbf16> to vector<1x4x4x128xbf16>
    %c0_45 = arith.constant 0 : index
    %c0_46 = arith.constant 0 : index
    %c0_47 = arith.constant 0 : index
    %c0_48 = arith.constant 0 : index
    %102 = vector.load %arg4[%c0_45, %c0_46, %c0_47, %c0_48] : memref<1x4x4x128xbf16, #tpu.memory_space<vmem>>, vector<1x4x4x128xbf16>
    tpu.vector_store %arg4[%c0_45, %c0_46, %c0_47, %c0_48], %101 {strides = array<i32>} : memref<1x4x4x128xbf16, #tpu.memory_space<vmem>>, vector<1x4x4x128xbf16>,
    return
  }
  func.func @transform_0(%arg0: i32) -> (i32, i32, i32, i32) {
    %c0_i32 = arith.constant 0 : i32
    %c0_i32_0 = arith.constant 0 : i32
    %c0_i32_1 = arith.constant 0 : i32
    %c0_i32_2 = arith.constant 0 : i32
    return %arg0, %c0_i32, %c0_i32_0, %c0_i32_1 : i32, i32, i32, i32
  }
  func.func @transform_1(%arg0: i32) -> (i32, i32, i32) {
    %c0_i32 = arith.constant 0 : i32
    %c0_i32_0 = arith.constant 0 : i32
    %c0_i32_1 = arith.constant 0 : i32
    %c0_i32_2 = arith.constant 0 : i32
    return %c0_i32, %c0_i32_0, %c0_i32_1 : i32, i32, i32
  }
  func.func @transform_2(%arg0: i32) -> (i32, i32) {
    %c0_i32 = arith.constant 0 : i32
    %c0_i32_0 = arith.constant 0 : i32
    %c0_i32_1 = arith.constant 0 : i32
    return %c0_i32, %c0_i32_0 : i32, i32
  }
  func.func @transform_3(%arg0: i32) -> (i32, i32, i32, i32) {
    %c0_i32 = arith.constant 0 : i32
    %c0_i32_0 = arith.constant 0 : i32
    %c0_i32_1 = arith.constant 0 : i32
    %c0_i32_2 = arith.constant 0 : i32
    return %arg0, %c0_i32, %c0_i32_0, %c0_i32_1 : i32, i32, i32, i32
  }
}

</mosaic_0001>

<bundles_post_ra>
// kernel: _lambda_.3
= control target key start
LH: loop header
LB: loop body
LE: loop exit
PB: predicated region body
PF: predicated region fallthrough
CT: control target
= control target key end

     0   :  { %s2528_s12 = smov 0   ;;  %s3245_s0 = inlined_call_operand.vmem [shape: bf16[2,8,8,128], index: 0, kind: input, shape index: {}]   ;;  %s3246_s1 = inlined_call_operand.vmem [shape: bf16[9,128,128], index: 1, kind: input, shape index: {}]   ;;  %s3247_s2 = inlined_call_operand.vmem [shape: f32[1,128], index: 2, kind: input, shape index: {}]   ;;  %s3248_s3 = inlined_call_operand.vmem [shape: bf16[2,4,4,128], index: 3, kind: output, shape index: {}]  }
   0x1 LB: > { %s1956_s13 = sadd.s32 4294967295, %s2505_s12   ;;  %p1960_p0 = scmp.ge.s32.totalorder %s2505_s12, 1  ;;  %s2505_s12 = sphi %s2528_s12, %s13_s12  }
   0x2   : > { %p137_p1 = scmp.lt.s32.totalorder %s2505_s12, 3 }
   0x4   : > { %p138_p2 = pnand %p1960_p0, %p137_p1 }
   0x5   : > { %p161_p3 = scmp.lt.s32.totalorder (!%p138_p2), %s1956_s13, 1 }
   0x6   : > { %141 = sbr.rel (%p138_p2) target bundleno = 376 (0x178), region = 32 }
   0xb   : > { %v2416_v0 = vld [vmem:[%s3246_s1 + $0x78] sm:$0xff]  ;;  %v2415_v2 = vld [vmem:[%s3246_s1 + $0x70] sm:$0xff]  ;;  %s3274_s13 = smov (!%p161_p3, %s1956_s13), 1  ;;  %v2414_v6 = vld [vmem:[%s3246_s1 + $0x68] sm:$0xff]  ;;  %vm514_vm0 = vcmask 1043456   ;;  %v2507_v27 = vmov 0  }
   0xc   : > { %v2424_v1 = vld [vmem:[%s3246_s1 + $0xb8] sm:$0xff]  ;;  %2473 = vmatpush.bf16.msra.mxu1 %v2416_v0  ;;  %360 = vmatpush.bf16.msra.mxu0 %v2416_v0  ;;  %v2423_v3 = vld [vmem:[%s3246_s1 + $0xb0] sm:$0xff]  ;;  %s2399_s24 = sshll.u32 %s3274_s13, 5  ;;  %v2422_v7 = vld [vmem:[%s3246_s1 + $0xa8] sm:$0xff]  ;;  %vm515_vm1 = vsmask.f32 3328  ;;  %v2675_v49 = vunpack.c.l.b16 %v2507_v27 }
   0xd   : > { %614 = vmatpush.bf16.msra.mxu2 %v2424_v1  ;;  %v2432_v4 = vld [vmem:[%s3246_s1 + $0xf8] sm:$0xff]  ;;  %v2431_v5 = vld [vmem:[%s3246_s1 + $0xf0] sm:$0xff]  ;;  %s2560_s29 = scalar_lea.vmem %s3245_s0, %s2399_s24  ;;  %v2430_v9 = vld [vmem:[%s3246_s1 + $0xe8] sm:$0xff]  ;;  %v490_v28 = vrot.slane %v2507_v27, 1  ;;  %vm244_vm3 = vcmask 1040384   ;;  %vm1525_vm6 = vcmask 1041409  }
   0xe   : > { %822 = vmatpush.bf16.msra.mxu3 %v2432_v4  ;;  %v2569_v8 = vld [vmem:[%s2560_s29] sm:$0xf]  ;;  %v2581_v12 = vld [vmem:[%s2560_s29 + $0x4] sm:$0xf]  ;;  %v2412_v18 = vld [vmem:[%s3246_s1 + $0x58] sm:$0xff]  ;;  %vm1529_vm7 = vcmask 1042434  }
   0xf   : > { %v2413_v10 = vld [vmem:[%s3246_s1 + $0x60] sm:$0xff]  ;;  %v2578_v11 = vunpack.c.l.b16 %v2569_v8  ;;  %v191_v14 = vshll.u32 %v2569_v8, 16  ;;  %v2588_v15 = vunpack.c.l.b16 %v2581_v12  ;;  %v2420_v21 = vld [vmem:[%s3246_s1 + $0x98] sm:$0xff]  ;;  %v188_v22 = vshrl.u32 %v2569_v8, 16  ;;  %v2411_v26 = vld [vmem:[%s3246_s1 + $0x50] sm:$0xff]  ;;  %s2400_s17 = sshll.u32 %s3274_s13, 3 }
  0x10   : > { %2474 = vmatpush.bf16.msra.mxu1 %v2415_v2  ;;  %361 = vmatpush.bf16.msra.mxu0 %v2415_v2  ;;  %v2421_v13 = vld [vmem:[%s3246_s1 + $0xa0] sm:$0xff]  ;;  %v2428_v24 = vld [vmem:[%s3246_s1 + $0xd8] sm:$0xff]  ;;  %v2419_v32 = vld [vmem:[%s3246_s1 + $0x90] sm:$0xff]  ;;  %vm245_vm4 = vsmask.f32 256  ;;  %v198_v53 = vshll.u32 %v2581_v12, 16  ;;  %s3205_s19 = scalar_lea.vmem %s3248_s3, %s2400_s17 }
  0x11   : > { %615 = vmatpush.bf16.msra.mxu2 %v2423_v3  ;;  %v2592_v16 = vpack.c.b16 %v2578_v11, %v2578_v11  ;;  %v2429_v17 = vld [vmem:[%s3246_s1 + $0xe0] sm:$0xff]  ;;  %v2602_v19 = vpack.c.b16 %v2588_v15, %v2588_v15  ;;  %v492_v23 = vrot.slane %v191_v14, 1  ;;  %vm2630_vm2 = vmand %vm514_vm0, %vm515_vm1  ;;  %v2637_v36 = vld [vmem:[%s2560_s29 + $0xc] sm:$0xf]  ;;  %v304_v0 = vpack.c.b16 %v2578_v11, %v2675_v49 }
  0x12   : > { %823 = vmatpush.bf16.msra.mxu3 %v2431_v5  ;;  %v2640_v37 = vld [vmem:[%s2560_s29 + $0x10] sm:$0xf]  ;;  %v2410_v39 = vld [vmem:[%s3246_s1 + $0x48] sm:$0xff]  ;;  %v517_v40 = vsel %vm2630_vm2, %v490_v28, 0  ;;  %vm2664_vm5 = vmand %vm244_vm3, %vm245_vm4  ;;  %v2669_v47 = vunpack.c.l.b16 %v2637_v36  ;;  %v195_v3 = vshrl.u32 %v2581_v12, 16  ;;  %vm1533_vm8 = vcmask 1043459  }
  0x13   : > { %v662_v20 = vshrl.u32 %v2592_v16, 16  ;;  %v669_v25 = vshrl.u32 %v2602_v19, 16  ;;  %v665_v30 = vshll.u32 %v2592_v16, 16  ;;  %v672_v31 = vshll.u32 %v2602_v19, 16  ;;  %v2427_v38 = vld [vmem:[%s3246_s1 + $0xd0] sm:$0xff]  ;;  %v2418_v44 = vld [vmem:[%s3246_s1 + $0x88] sm:$0xff] }
  0x14   : > { %2475 = vmatpush.bf16.msra.mxu1 %v2414_v6  ;;  %362 = vmatpush.bf16.msra.mxu0 %v2414_v6  ;;  %v493_v33 = vor.u32 %v492_v23, %v188_v22  ;;  %v2651_v41 = vld [vmem:[%s2560_s29 + $0x8] sm:$0xf]  ;;  %v2672_v48 = vunpack.c.l.b16 %v2640_v37  ;;  %v550_v51 = vunpack.c.l.b16 %v517_v40  ;;  %v2409_v55 = vld [vmem:[%s3246_s1 + $0x40] sm:$0xff]  ;;  %v2408_v60 = vld [vmem:[%s3246_s1 + $0x38] sm:$0xff]  ;;  %v2704_v62 = vpack.c.b16 %v2669_v47, %v2669_v47 }
  0x15   : > { %616 = vmatpush.bf16.msra.mxu2 %v2422_v7  ;;  %v664_v29 = vrot.slane %v662_v20, 7  ;;  %v671_v35 = vrot.slane %v669_v25, 7  ;;  %v2678_v50 = vunpack.c.l.b16 %v2651_v41  ;;  %v2426_v52 = vld [vmem:[%s3246_s1 + $0xc8] sm:$0xff]  ;;  %v205_v54 = vshll.u32 %v2651_v41, 16  ;;  %v2417_v61 = vld [vmem:[%s3246_s1 + $0x80] sm:$0xff]  ;;  %v2440_v1 = vld [vmem:[%s3246_s1 + $0x138] sm:$0xff] }
  0x16   : > { %824 = vmatpush.bf16.msra.mxu3 %v2430_v9  ;;  %v518_v45 = vsel %vm2630_vm2, %v493_v33, 0  ;;  %v2708_v63 = vpack.c.b16 %v2672_v48, %v2669_v47  ;;  %v2456_v2 = vld [vmem:[%s3246_s1 + $0x1b8] sm:$0xff]  ;;  %v202_v4 = vshrl.u32 %v2651_v41, 16  ;;  %v494_v7 = vrot.slane %v198_v53, 1  ;;  %v2406_v40 = vld [vmem:[%s3246_s1 + $0x28] sm:$0xff] }
  0x17   : > { %v667_v42 = vor.u32 %v665_v30, %v664_v29  ;;  %v674_v43 = vor.u32 %v672_v31, %v671_v35  ;;  %v551_v56 = vunpack.c.l.b16 %v518_v45  ;;  %v2694_v59 = vpack.c.b16 %v2678_v50, %v2678_v50  ;;  %v2464_v23 = vld [vmem:[%s3246_s1 + $0x1f8] sm:$0xff]  ;;  %v2768_v45 = vld [vmem:[%s2560_s29 + $0x14] sm:$0xf] }
  0x18   : > { %2476 = vmatpush.bf16.msra.mxu1 %v2413_v10  ;;  %363 = vmatpush.bf16.msra.mxu0 %v2413_v10  ;;  %v496_v9 = vrot.slane %v205_v54, 1  ;;  %v495_v29 = vor.u32 %v494_v7, %v195_v3  ;;  %v2452_v8 = vld [vmem:[%s3246_s1 + $0x198] sm:$0xff]  ;;  %vm1733_vm9 = vcmask 1041408  }
  0x19   : > { %617 = vmatpush.bf16.msra.mxu2 %v2421_v13  ;;  %v725_v57 = vsel %vm2664_vm5, 0, %v667_v42  ;;  %v726_v58 = vsel %vm2664_vm5, 0, %v674_v43  ;;  %v558_v10 = vpack.c.b16 %v551_v56, %v550_v51  ;;  %v2425_v13 = vld [vmem:[%s3246_s1 + $0xc0] sm:$0xff]  ;;  %v679_v35 = vshll.u32 %v2694_v59, 16  ;;  %v2463_v42 = vld [vmem:[%s3246_s1 + $0x1f0] sm:$0xff]  ;;  %v2438_v43 = vld [vmem:[%s3246_s1 + $0x128] sm:$0xff] }
  0x1a   : > { %825 = vmatpush.bf16.msra.mxu3 %v2429_v17  ;;  %v758_v5 = vunpack.c.l.b16 %v725_v57  ;;  %v2720_v6 = vunpack.c.l.b16 %v726_v58  ;;  %v676_v17 = vshrl.u32 %v2694_v59, 16  ;;  %v2771_v51 = vld [vmem:[%s2560_s29 + $0x18] sm:$0xf]  ;;  %v2405_v58 = vld [vmem:[%s3246_s1 + $0x20] sm:$0xff] }
  0x1c   : > { %2477 = vmatpush.bf16.msra.mxu1 %v2412_v18  ;;  %364 = vmatpush.bf16.msra.mxu0 %v2412_v18  ;;  %v3252_v18 = vshrl.u32 %v2704_v62, 16  ;;  %v766_v28 = vpack.c.b16 %v2720_v6, %v758_v5  ;;  %v678_v33 = vrot.slane %v676_v17, 7 }
  0x1d   : > { %618 = vmatpush.bf16.msra.mxu2 %v2420_v21  ;;  %v2407_v21 = vld [vmem:[%s3246_s1 + $0x30] sm:$0xff] }
  0x1e   : > { %826 = vmatpush.bf16.msra.mxu3 %v2428_v24  ;;  %v2439_v24 = vld [vmem:[%s3246_s1 + $0x130] sm:$0xff]  ;;  %v681_v56 = vor.u32 %v679_v35, %v678_v33  ;;  %v2436_v33 = vld [vmem:[%s3246_s1 + $0x118] sm:$0xff] }
  0x20   : > { %2478 = vmatpush.bf16.msra.mxu1 %v2411_v26  ;;  %365 = vmatpush.bf16.msra.mxu0 %v2411_v26  ;;  %v2455_v26 = vld [vmem:[%s3246_s1 + $0x1b0] sm:$0xff] }
  0x21   : > { %619 = vmatpush.bf16.msra.mxu2 %v2419_v32  ;;  %v497_v32 = vor.u32 %v496_v9, %v202_v4  ;;  %v212_v9 = vshll.u32 %v2637_v36, 16 }
  0x22   : > { %827 = vmatpush.bf16.msra.mxu3 %v2427_v38  ;;  %v685_v38 = vrot.slane %v3252_v18, 7 }
  0x24   : > { %2479 = vmatpush.bf16.msra.mxu1 %v2410_v39  ;;  %366 = vmatpush.bf16.msra.mxu0 %v2410_v39  ;;  %v3254_v39 = vshll.u32 %v2704_v62, 16 }
  0x25   : > { %620 = vmatpush.bf16.msra.mxu2 %v2418_v44  ;;  %v2454_v44 = vld [vmem:[%s3246_s1 + $0x1a8] sm:$0xff] }
  0x26   : > { %828 = vmatpush.bf16.msra.mxu3 %v2426_v52  ;;  %v519_v52 = vsel %vm2630_vm2, %v495_v29, 0  ;;  %v688_v57 = vor.u32 %v3254_v39, %v685_v38  ;;  %v216_v38 = vshrl.u32 %v2640_v37, 16 }
  0x27   : > { %v552_v5 = vunpack.c.l.b16 %v519_v52 }
  0x28   : > { %2480 = vmatpush.bf16.msra.mxu1 %v2409_v55  ;;  %367 = vmatpush.bf16.msra.mxu0 %v2409_v55  ;;  %v520_v55 = vsel %vm2630_vm2, %v497_v32, 0  ;;  %v2824_v32 = vpack.c.b16 %v2678_v50, %v2588_v15 }
  0x29   : > { %621 = vmatpush.bf16.msra.mxu2 %v2417_v61  ;;  %v2788_v61 = vunpack.c.l.b16 %v2768_v45  ;;  %v553_v7 = vunpack.c.l.b16 %v520_v55 }
  0x2a   : > { %829 = vmatpush.bf16.msra.mxu3 %v2425_v13  ;;  %v727_v13 = vsel %vm2664_vm5, 0, %v681_v56 }
  0x2b   : > { %378 = vmatmul.bf16.vlgmr.msra.gmra.mxu1 %v2708_v63  ;;  %368 = vmatmul.bf16.vlgmr.msra.gmra.mxu0 %v304_v0  ;;  %v2791_v0 = vunpack.c.l.b16 %v2771_v51  ;;  %v559_v52 = vpack.c.b16 %v553_v7, %v552_v5 }
  0x2c   : > { %461 = vmatpush.bf16.msrb.mxu1 %v2408_v60  ;;  %932 = vmatpush.bf16.msrb.mxu0 %v2440_v1  ;;  %v2462_v60 = vld [vmem:[%s3246_s1 + $0x1e8] sm:$0xff]  ;;  %v2437_v1 = vld [vmem:[%s3246_s1 + $0x120] sm:$0xff] }
  0x2d   : > { %1212 = vmatpush.bf16.msrb.mxu2 %v2456_v2  ;;  %830 = vmatmul.bf16.vlgmr.msra.gmra.mxu3 %v766_v28  ;;  %v2453_v2 = vld [vmem:[%s3246_s1 + $0x1a0] sm:$0xff]  ;;  %v2404_v28 = vld [vmem:[%s3246_s1 + $0x18] sm:$0xff]  ;;  %v2820_v29 = vpack.c.b16 %v2791_v0, %v2788_v61 }
  0x2e   : > { %622 = vmatmul.bf16.vlgmr.msra.gmra.mxu2 %v558_v10  ;;  %1316 = vmatpush.bf16.msrb.mxu3 %v2464_v23  ;;  %v219_v10 = vshll.u32 %v2640_v37, 16  ;;  %v2807_v23 = vpack.c.b16 %v2672_v48, %v2672_v48 }
  0x30   : > { %462 = vmatpush.bf16.msrb.mxu1 %v2407_v21  ;;  %933 = vmatpush.bf16.msrb.mxu0 %v2439_v24  ;;  %v728_v21 = vsel %vm2664_vm5, 0, %v688_v57  ;;  %v2811_v24 = vpack.c.b16 %v2788_v61, %v2788_v61  ;;  %v3250_v55 = vshrl.u32 %v2807_v23, 16  ;;  %v2403_v57 = vld [vmem:[%s3246_s1 + $0x10] sm:$0xff] }
  0x31   : > { %1213 = vmatpush.bf16.msrb.mxu2 %v2455_v26  ;;  %v190_v26 = vrot.slane %v188_v22, 7  ;;  %v209_v22 = vshrl.u32 %v2637_v36, 16  ;;  %v2441_v36 = vld [vmem:[%s3246_s1 + $0x140] sm:$0xff] }
  0x32   : > { %1317 = vmatpush.bf16.msrb.mxu3 %v2463_v42  ;;  %v2833_v42 = vunpack.c.l.b16 %v728_v21  ;;  %v3249_v56 = vshrl.u32 %v2811_v24, 16 }
  0x34   : > { %463 = vmatpush.bf16.msrb.mxu1 %v2406_v40  ;;  %934 = vmatpush.bf16.msrb.mxu0 %v2438_v43  ;;  %v2831_v40 = vunpack.c.l.b16 %v727_v13  ;;  %v498_v43 = vrot.slane %v212_v9, 1  ;;  %v3253_v13 = vshll.u32 %v2807_v23, 16  ;;  %v699_v21 = vrot.slane %v3249_v56, 7 }
  0x35   : > { %1214 = vmatpush.bf16.msrb.mxu2 %v2454_v44  ;;  %v500_v44 = vrot.slane %v219_v10, 1 }
  0x36   : > { %1318 = vmatpush.bf16.msrb.mxu3 %v2462_v60  ;;  %v193_v60 = vor.u32 %v191_v14, %v190_v26  ;;  %v499_v5 = vor.u32 %v498_v43, %v209_v22  ;;  %v2461_v14 = vld [vmem:[%s3246_s1 + $0x1e0] sm:$0xff]  ;;  %v3251_v26 = vshll.u32 %v2811_v24, 16  ;;  %v2434_v43 = vld [vmem:[%s3246_s1 + $0x108] sm:$0xff] }
  0x37   : > { %v501_v7 = vor.u32 %v500_v44, %v216_v38  ;;  %v2460_v44 = vld [vmem:[%s3246_s1 + $0x1d8] sm:$0xff] }
  0x38   : > { %464 = vmatpush.bf16.msrb.mxu1 %v2405_v58  ;;  %935 = vmatpush.bf16.msrb.mxu0 %v2437_v1  ;;  %v2435_v58 = vld [vmem:[%s3246_s1 + $0x110] sm:$0xff]  ;;  %v183_v1 = vrot.slane %v2507_v27, 7  ;;  %v692_v27 = vrot.slane %v3250_v55, 7  ;;  %v702_v56 = vor.u32 %v3251_v26, %v699_v21  ;;  %v197_v26 = vrot.slane %v195_v3, 7 }
  0x39   : > { %1215 = vmatpush.bf16.msrb.mxu2 %v2453_v2  ;;  %v767_v2 = vpack.c.b16 %v2833_v42, %v2831_v40  ;;  %v230_v3 = vshrl.u32 %v2771_v51, 16 }
  0x3a   : > { %1319 = vmatpush.bf16.msrb.mxu3 %v2461_v14  ;;  %v695_v14 = vor.u32 %v3253_v13, %v692_v27 }
  0x3b   : > { %383 = vmatmul.bf16.gmra.mxu1 %v2820_v29  ;;  %373 = vmatmul.bf16.gmra.mxu0 %v2824_v32 }
  0x3c   : > { %465 = vmatpush.bf16.msrb.mxu1 %v2404_v28  ;;  %936 = vmatpush.bf16.msrb.mxu0 %v2436_v33  ;;  %v2402_v28 = vld [vmem:[%s3246_s1 + $0x8] sm:$0xff]  ;;  %v2451_v33 = vld [vmem:[%s3246_s1 + $0x190] sm:$0xff] }
  0x3d   : > { %1216 = vmatpush.bf16.msrb.mxu2 %v2452_v8  ;;  %835 = vmatmul.bf16.gmra.mxu3 %v767_v2  ;;  %v521_v8 = vsel %vm2630_vm2, %v499_v5, 0  ;;  %v2448_v5 = vld [vmem:[%s3246_s1 + $0x178] sm:$0xff] }
  0x3e   : > { %627 = vmatmul.bf16.gmra.mxu2 %v559_v52  ;;  %v247_v52 = vsel %vm2664_vm5, 0, %v183_v1  ;;  %v2401_v1 = vld [vmem:[%s3246_s1] sm:$0xff]  ;;  %1320 = vmatpush.bf16.msrb.mxu3 %v2460_v44  ;;  %v554_v21 = vunpack.c.l.b16 %v521_v8  ;;  %v226_v8 = vshll.u32 %v2768_v45, 16 }
  0x3f   : > { %v397_v2 = vunpack.c.l.b16 %v247_v52  ;;  %v730_v52 = vsel %vm2664_vm5, 0, %v702_v56  ;;  %v2447_v56 = vld [vmem:[%s3246_s1 + $0x170] sm:$0xff] }
  0x40   : > { %466 = vmatpush.bf16.msrb.mxu1 %v2403_v57  ;;  %937 = vmatpush.bf16.msrb.mxu0 %v2435_v58  ;;  %v248_v57 = vsel %vm2664_vm5, 0, %v193_v60  ;;  %v522_v58 = vsel %vm2630_vm2, %v501_v7, 0  ;;  %v179_v60 = vld [vmem:[%s2560_s29 + $0x1c] sm:$0xf]  ;;  %v2433_v7 = vld [vmem:[%s3246_s1 + $0x100] sm:$0xff]  ;;  %v2934_v13 = vunpack.c.l.b16 %v730_v52 }
  0x41   : > { %1217 = vmatpush.bf16.msrb.mxu2 %v2451_v33  ;;  %v398_v55 = vunpack.c.l.b16 %v248_v57  ;;  %v2904_v27 = vunpack.c.l.b16 %v179_v60  ;;  %v2472_v33 = vld [vmem:[%s3246_s1 + $0x238] sm:$0xff]  ;;  %v2915_v57 = vpack.c.b16 %v2791_v0, %v2791_v0 }
  0x43   : > { %v2919_v44 = vpack.c.b16 %v2904_v27, %v2904_v27  ;;  %v405_v60 = vpack.c.b16 %v398_v55, %v397_v2 }
  0x44   : > { %467 = vmatpush.bf16.msrb.mxu1 %v2402_v28  ;;  %938 = vmatpush.bf16.msrb.mxu0 %v2434_v43  ;;  %v555_v28 = vunpack.c.l.b16 %v522_v58  ;;  %v729_v43 = vsel %vm2664_vm5, 0, %v695_v14  ;;  %v233_v58 = vshll.u32 %v2771_v51, 16  ;;  %v876_v14 = vpack.c.b16 %v2588_v15, %v2578_v11  ;;  %v2471_v11 = vld [vmem:[%s3246_s1 + $0x230] sm:$0xff] }
  0x45   : > { %v2932_v18 = vunpack.c.l.b16 %v729_v43  ;;  %v3256_v15 = vshrl.u32 %v2915_v57, 16  ;;  %v3255_v2 = vshrl.u32 %v2919_v44, 16  ;;  %v200_v43 = vor.u32 %v198_v53, %v197_v26 }
  0x46   : > { %v560_v55 = vpack.c.b16 %v555_v28, %v554_v21  ;;  %v2446_v21 = vld [vmem:[%s3246_s1 + $0x168] sm:$0xff]  ;;  %v3257_v53 = vshll.u32 %v2915_v57, 16  ;;  %v879_v51 = vpack.c.b16 %v2904_v27, %v2791_v0  ;;  %v3264_v0 = vshll.u32 %v2807_v23, 16 }
  0x47   : > { %v2450_v28 = vld [vmem:[%s3246_s1 + $0x188] sm:$0xff]  ;;  %v768_v39 = vpack.c.b16 %v2934_v13, %v2932_v18  ;;  %v706_v12 = vrot.slane %v3256_v15, 7  ;;  %v713_v41 = vrot.slane %v3255_v2, 7  ;;  %v2445_v2 = vld [vmem:[%s3246_s1 + $0x160] sm:$0xff] }
  0x48   : > { %468 = vmatpush.bf16.msrb.mxu1 %v2401_v1  ;;  %939 = vmatpush.bf16.msrb.mxu0 %v2433_v7  ;;  %v204_v1 = vrot.slane %v202_v4, 7  ;;  %v502_v4 = vrot.slane %v226_v8, 1  ;;  %v504_v7 = vrot.slane %v233_v58, 1 }
  0x49   : > { %1218 = vmatpush.bf16.msrb.mxu2 %v2450_v28  ;;  %v709_v28 = vor.u32 %v3257_v53, %v706_v12 }
  0x4a   : > { %v207_v52 = vor.u32 %v205_v54, %v204_v1  ;;  %v3258_v54 = vshll.u32 %v2919_v44, 16  ;;  %v2449_v1 = vld [vmem:[%s3246_s1 + $0x180] sm:$0xff] }
  0x4b   : > { %469 = vmatmul.bf16.vlgmr.msrb.gmra.mxu1 %v405_v60  ;;  %940 = vmatmul.bf16.vlgmr.msrb.gmra.mxu0 %v876_v14  ;;  %v2470_v60 = vld [vmem:[%s3246_s1 + $0x228] sm:$0xff]  ;;  %v505_v14 = vor.u32 %v504_v7, %v230_v3 }
  0x4c   : > { %1090 = vmatpush.bf16.msra.mxu1 %v2448_v5  ;;  %1432 = vmatpush.bf16.msra.mxu0 %v2472_v33  ;;  %v223_v5 = vshrl.u32 %v2768_v45, 16  ;;  %v250_v7 = vsel %vm2664_vm5, 0, %v207_v52  ;;  %v2444_v52 = vld [vmem:[%s3246_s1 + $0x158] sm:$0xff] }
  0x4d   : > { %840 = vmatmul.bf16.gmra.mxu3 %v768_v39  ;;  %1219 = vmatpush.bf16.msrb.mxu2 %v2449_v1 }
  0x4e   : > { %632 = vmatmul.bf16.gmra.mxu2 %v560_v55  ;;  %v503_v26 = vor.u32 %v502_v4, %v223_v5  ;;  %v2458_v55 = vld [vmem:[%s3246_s1 + $0x1c8] sm:$0xff]  ;;  %v249_v4 = vsel %vm2664_vm5, 0, %v200_v43  ;;  %v524_v43 = vsel %vm2630_vm2, %v505_v14, 0  ;;  %v969_v14 = vrot.slane %v665_v30, 1 }
  0x4f   : > { %v399_v12 = vunpack.c.l.b16 %v249_v4  ;;  %v557_v53 = vunpack.c.l.b16 %v524_v43  ;;  %v211_v30 = vrot.slane %v209_v22, 7  ;;  %v2467_v22 = vld [vmem:[%s3246_s1 + $0x210] sm:$0xff] }
  0x50   : > { %1091 = vmatpush.bf16.msra.mxu1 %v2447_v56  ;;  %v2459_v56 = vld [vmem:[%s3246_s1 + $0x1d0] sm:$0xff]  ;;  %1433 = vmatpush.bf16.msra.mxu0 %v2471_v11  ;;  %v523_v39 = vsel %vm2630_vm2, %v503_v26, 0 }
  0x51   : > { %1321 = vmatpush.bf16.msrb.mxu3 %v2459_v56  ;;  %v716_v56 = vor.u32 %v3258_v54, %v713_v41  ;;  %2481 = vmatpush.bf16.msra.mxu2 %v2472_v33  ;;  %v400_v41 = vunpack.c.l.b16 %v250_v7  ;;  %v556_v15 = vunpack.c.l.b16 %v523_v39  ;;  %v731_v54 = vsel %vm2664_vm5, 0, %v709_v28  ;;  %v2443_v33 = vld [vmem:[%s3246_s1 + $0x150] sm:$0xff] }
  0x52   : > { %v3016_v4 = vunpack.c.l.b16 %v731_v54  ;;  %v971_v28 = vrot.slane %v672_v31, 1  ;;  %v218_v39 = vrot.slane %v216_v38, 7  ;;  %v2457_v31 = vld [vmem:[%s3246_s1 + $0x1c0] sm:$0xff]  ;;  %v214_v38 = vor.u32 %v212_v9, %v211_v30 }
  0x53   : > { %v732_v26 = vsel %vm2664_vm5, 0, %v716_v56  ;;  %v406_v1 = vpack.c.b16 %v400_v41, %v399_v12  ;;  %v561_v56 = vpack.c.b16 %v557_v53, %v556_v15  ;;  %v970_v15 = vor.u32 %v969_v14, %v662_v20  ;;  %v2466_v53 = vld [vmem:[%s3246_s1 + $0x208] sm:$0xff] }
  0x54   : > { %1092 = vmatpush.bf16.msra.mxu1 %v2446_v21  ;;  %1434 = vmatpush.bf16.msra.mxu0 %v2470_v60  ;;  %v2469_v21 = vld [vmem:[%s3246_s1 + $0x220] sm:$0xff]  ;;  %v3018_v7 = vunpack.c.l.b16 %v732_v26  ;;  %v878_v12 = vpack.c.b16 %v2788_v61, %v2672_v48  ;;  %v1156_v41 = vpack.c.b16 %v2831_v40, %v2720_v6  ;;  %v225_v26 = vrot.slane %v223_v5, 7 }
  0x55   : > { %1322 = vmatpush.bf16.msrb.mxu3 %v2458_v55  ;;  %2482 = vmatpush.bf16.msra.mxu2 %v2471_v11  ;;  %v877_v55 = vpack.c.b16 %v2669_v47, %v2678_v50  ;;  %v2442_v50 = vld [vmem:[%s3246_s1 + $0x148] sm:$0xff]  ;;  %v221_v11 = vor.u32 %v219_v10, %v218_v39  ;;  %v993_v37 = vsel %vm2630_vm2, %v970_v15, 0  ;;  %v232_v14 = vrot.slane %v230_v3, 7 }
  0x56   : > { %v769_v47 = vpack.c.b16 %v3018_v7, %v3016_v4  ;;  %v1026_v19 = vunpack.c.l.b16 %v993_v37  ;;  %v228_v48 = vor.u32 %v226_v8, %v225_v26  ;;  %v3270_v15 = vshrl.u32 %v2919_v44, 16 }
  0x57   : > { %v252_v9 = vsel %vm2664_vm5, 0, %v221_v11  ;;  %v235_v6 = vor.u32 %v233_v58, %v232_v14  ;;  %v1157_v58 = vpack.c.b16 %v2932_v18, %v2833_v42  ;;  %v3265_v42 = vshll.u32 %v2919_v44, 16 }
  0x58   : > { %1093 = vmatpush.bf16.msra.mxu1 %v2445_v2  ;;  %1435 = vmatpush.bf16.msra.mxu0 %v2469_v21  ;;  %v2468_v2 = vld [vmem:[%s3246_s1 + $0x218] sm:$0xff]  ;;  %v402_v43 = vunpack.c.l.b16 %v252_v9  ;;  %v253_v40 = vsel %vm2664_vm5, 0, %v228_v48 }
  0x59   : > { %2483 = vmatpush.bf16.msra.mxu2 %v2470_v60  ;;  %v972_v60 = vor.u32 %v971_v28, %v669_v25  ;;  %1323 = vmatpush.bf16.msrb.mxu3 %v2457_v31  ;;  %v251_v25 = vsel %vm2664_vm5, 0, %v214_v38  ;;  %v254_v5 = vsel %vm2664_vm5, 0, %v235_v6  ;;  %v403_v45 = vunpack.c.l.b16 %v253_v40 }
  0x5a   : > { %v401_v54 = vunpack.c.l.b16 %v251_v25  ;;  %v404_v8 = vunpack.c.l.b16 %v254_v5  ;;  %v983_v39 = vrot.slane %v3265_v42, 1  ;;  %v3269_v38 = vshrl.u32 %v2915_v57, 16 }
  0x5b   : > { %474 = vmatmul.bf16.gmra.mxu1 %v406_v1  ;;  %945 = vmatmul.bf16.gmra.mxu0 %v877_v55  ;;  %v994_v16 = vsel %vm2630_vm2, %v972_v60, 0  ;;  %v1158_v1 = vpack.c.b16 %v3016_v4, %v2934_v13  ;;  %v3263_v55 = vshll.u32 %v2704_v62, 16  ;;  %v3268_v4 = vshrl.u32 %v2807_v23, 16 }
  0x5c   : > { %1094 = vmatpush.bf16.msra.mxu1 %v2444_v52  ;;  %1436 = vmatpush.bf16.msra.mxu0 %v2468_v2  ;;  %v1027_v20 = vunpack.c.l.b16 %v994_v16  ;;  %v973_v52 = vrot.slane %v679_v35, 1  ;;  %v2465_v35 = vld [vmem:[%s3246_s1 + $0x200] sm:$0xff]  ;;  %v408_v3 = vpack.c.b16 %v404_v8, %v403_v45  ;;  %v984_v60 = vor.u32 %v983_v39, %v3270_v15 }
  0x5d   : > { %2484 = vmatpush.bf16.msra.mxu2 %v2469_v21  ;;  %845 = vmatmul.bf16.gmra.mxu3 %v769_v47  ;;  %v407_v21 = vpack.c.b16 %v402_v43, %v401_v54  ;;  %v975_v28 = vrot.slane %v3263_v55, 1 }
  0x5e   : > { %637 = vmatmul.bf16.gmra.mxu2 %v561_v56  ;;  %v1034_v10 = vpack.c.b16 %v1027_v20, %v1026_v19  ;;  %v977_v56 = vrot.slane %v3264_v0, 1 }
  0x60   : > { %1095 = vmatpush.bf16.msra.mxu1 %v2443_v33  ;;  %1437 = vmatpush.bf16.msra.mxu0 %v2467_v22  ;;  %v978_v31 = vor.u32 %v977_v56, %v3268_v4 }
  0x61   : > { %2485 = vmatpush.bf16.msra.mxu2 %v2468_v2  ;;  %v974_v2 = vor.u32 %v973_v52, %v676_v17  ;;  %v1266_v52 = vpack.c.b16 %v2675_v49, %v2904_v27 }
  0x63   : > { %v995_v61 = vsel %vm2630_vm2, %v974_v2, 0 }
  0x64   : > { %1096 = vmatpush.bf16.msra.mxu1 %v2442_v50  ;;  %1438 = vmatpush.bf16.msra.mxu0 %v2466_v53  ;;  %v1028_v59 = vunpack.c.l.b16 %v995_v61  ;;  %v3267_v50 = vshrl.u32 %v2704_v62, 16 }
  0x65   : > { %2486 = vmatpush.bf16.msra.mxu2 %v2467_v22 }
  0x66   : > { %v1376_v17 = vpack.c.b16 %v1028_v59, %v1027_v20  ;;  %v976_v13 = vor.u32 %v975_v28, %v3267_v50 }
  0x68   : > { %1097 = vmatpush.bf16.msra.mxu1 %v2441_v36  ;;  %1439 = vmatpush.bf16.msra.mxu0 %v2465_v35  ;;  %v997_v36 = vsel %vm2630_vm2, %v978_v31, 0 }
  0x69   : > { %2487 = vmatpush.bf16.msra.mxu2 %v2466_v53  ;;  %v996_v53 = vsel %vm2630_vm2, %v976_v13, 0  ;;  %v1030_v37 = vunpack.c.l.b16 %v997_v36 }
  0x6a   : > { %v1029_v23 = vunpack.c.l.b16 %v996_v53 }
  0x6b   : > { %479 = vmatmul.bf16.gmra.mxu1 %v407_v21  ;;  %950 = vmatmul.bf16.gmra.mxu0 %v878_v12  ;;  %v3272_v21 = vshrl.u32 %v2811_v24, 16 }
  0x6c   : > { %v1035_v20 = vpack.c.b16 %v1029_v23, %v1028_v59  ;;  %v1377_v25 = vpack.c.b16 %v1030_v37, %v1029_v23 }
  0x6d   : > { %2488 = vmatpush.bf16.msra.mxu2 %v2465_v35  ;;  %1324 = vmatmul.bf16.vlgmr.msrb.gmra.mxu3 %v2824_v32  ;;  %v1127_v32 = vpack.c.b16 %v2675_v49, %v2675_v49 }
  0x6e   : > { %1220 = vmatmul.bf16.vlgmr.msrb.gmra.mxu2 %v1156_v41 }
  0x6f   : > { %v1129_v33 = vshrl.u32 %v1127_v32, 16  ;;  %v1132_v18 = vshll.u32 %v1127_v32, 16 }
  0x71   : > { %v1131_v30 = vrot.slane %v1129_v33, 7  ;;  %v1353_v43 = vrot.slane %v1132_v18, 1 }
  0x73   : > { %v1134_v22 = vor.u32 %v1132_v18, %v1131_v30  ;;  %v1354_v41 = vor.u32 %v1353_v43, %v1129_v33 }
  0x75   : > { %v1136_v62 = vsel %vm2664_vm5, 0, %v1134_v22 }
  0x76   : > { %v1155_v16 = vunpack.c.l.b16 %v1136_v62 }
  0x78   : > { %v1159_v9 = vpack.c.b16 %v1155_v16, %v3018_v7  ;;  %v1356_v7 = vsel %vm2630_vm2, %v1354_v41, 0 }
  0x79   : > { %v1375_v2 = vunpack.c.l.b16 %v1356_v7 }
  0x7b   : > { %484 = vmatmul.bf16.gmra.mxu1 %v408_v3  ;;  %955 = vmatmul.bf16.gmra.mxu0 %v879_v51 }
  0x7d   : > { %1329 = vmatmul.bf16.gmra.mxu3 %v2708_v63  ;;  %v3266_v63 = vshll.u32 %v2915_v57, 16  ;;  %v1000_v57 = vsel %vm2630_vm2, %v984_v60, 0 }
  0x7e   : > { %1225 = vmatmul.bf16.gmra.mxu2 %v1157_v58  ;;  %v1033_v19 = vunpack.c.l.b16 %v1000_v57 }
  0x7f   : > { %v981_v47 = vrot.slane %v3266_v63, 1 }
  0x80   : > { %v1379_v59 = vpack.c.b16 %v1375_v2, %v1033_v19 }
  0x81   : > { %v982_v11 = vor.u32 %v981_v47, %v3269_v38 }
  0x8b   : > { %1098 = vmatmul.bf16.vlgmr.msra.gmra.mxu1 %v1034_v10  ;;  %1440 = vmatmul.bf16.vlgmr.msra.gmra.mxu0 %v1376_v17  ;;  %v3271_v10 = vshll.u32 %v2811_v24, 16 }
  0x8d   : > { %1334 = vmatmul.bf16.gmra.mxu3 %v2820_v29  ;;  %v999_v29 = vsel %vm2630_vm2, %v982_v11, 0  ;;  %v979_v54 = vrot.slane %v3271_v10, 1 }
  0x8e   : > { %1230 = vmatmul.bf16.gmra.mxu2 %v1158_v1  ;;  %v1032_v44 = vunpack.c.l.b16 %v999_v29 }
  0x8f   : > { %v980_v12 = vor.u32 %v979_v54, %v3272_v21 }
  0x90   : > { %v1037_v46 = vpack.c.b16 %v1033_v19, %v1032_v44 }
  0x91   : > { %v998_v26 = vsel %vm2630_vm2, %v980_v12, 0 }
  0x92   : > { %v1031_v14 = vunpack.c.l.b16 %v998_v26 }
  0x94   : > { %v1036_v35 = vpack.c.b16 %v1031_v14, %v1030_v37  ;;  %v1378_v48 = vpack.c.b16 %v1032_v44, %v1031_v14 }
  0x9b   : > { %1103 = vmatmul.bf16.gmra.mxu1 %v1035_v20  ;;  %1445 = vmatmul.bf16.gmra.mxu0 %v1377_v25 }
  0x9d   : > { %1339 = vmatmul.bf16.gmra.mxu3 %v1266_v52 }
  0x9e   : > { %1235 = vmatmul.bf16.gmra.mxu2 %v1159_v9 }
  0xa8   : > { %v379_v6 = vpop.f32.mrf.mxu1  ;;  %v369_v61 = vpop.f32.mrf.mxu0 }
  0xab   : > { %1108 = vmatmul.bf16.gmra.mxu1 %v1036_v35  ;;  %1450 = vmatmul.bf16.gmra.mxu0 %v1378_v48 }
  0xae   : > { %1455 = vmatmul.bf16.vlgmr.msra.gmra.mxu2 %v1379_v59 }
  0xb0   : > { %v381_v24 = vpop.f32.mrf.mxu1  ;;  %v371_v27 = vpop.f32.mrf.mxu0 }
  0xb1   : > { %v623_v49 = vpop.f32.mrf.mxu2  ;;  %v831_v17 = vpop.f32.mrf.mxu3 }
  0xb8   : > { %v384_v5 = vpop.f32.mrf.mxu1  ;;  %v374_v45 = vpop.f32.mrf.mxu0 }
  0xb9   : > { %v625_v40 = vpop.f32.mrf.mxu2  ;;  %v3132_v8 = vpop.f32.mrf.mxu3 }
  0xbb   : > { %1113 = vmatmul.bf16.gmra.mxu1 %v1037_v46 }
  0xc0   : > { %v386_v3 = vpop.f32.mrf.mxu1  ;;  %v376_v51 = vpop.f32.mrf.mxu0 }
  0xc1   : > { %v628_v34 = vpop.f32.mrf.mxu2  ;;  %v836_v58 = vpop.f32.mrf.mxu3 }
  0xc8   : > { %v470_v33 = vpop.f32.mrf.mxu1  ;;  %v941_v1 = vpop.f32.mrf.mxu0 }
  0xc9   : > { %v630_v32 = vpop.f32.mrf.mxu2  ;;  %v471_v55 = vadd.f32 %v470_v33, %v369_v61  ;;  %v3134_v56 = vpop.f32.mrf.mxu3 }
  0xcb   : > { %v643_v28 = vadd.f32 %v623_v49, %v471_v55 }
  0xcd   : > { %v851_v0 = vadd.f32 %v831_v17, %v643_v28 }
  0xcf   : > { %v961_v30 = vadd.f32 %v941_v1, %v851_v0 }
  0xd0   : > { %v472_v42 = vpop.f32.mrf.mxu1  ;;  %v943_v39 = vpop.f32.mrf.mxu0 }
  0xd1   : > { %v633_v18 = vpop.f32.mrf.mxu2  ;;  %v473_v63 = vadd.f32 %v472_v42, %v371_v27  ;;  %v841_v13 = vpop.f32.mrf.mxu3 }
  0xd3   : > { %v644_v47 = vadd.f32 %v625_v40, %v473_v63 }
  0xd8   : > { %v475_v4 = vpop.f32.mrf.mxu1  ;;  %v946_v31 = vpop.f32.mrf.mxu0 }
  0xd9   : > { %v635_v50 = vpop.f32.mrf.mxu2  ;;  %v476_v22 = vadd.f32 %v475_v4, %v374_v45  ;;  %v3136_v23 = vpop.f32.mrf.mxu3 }
  0xdb   : > { %v645_v38 = vadd.f32 %v628_v34, %v476_v22  ;;  %v852_v34 = vadd.f32 %v3132_v8, %v644_v47 }
  0xdd   : > { %v853_v11 = vadd.f32 %v836_v58, %v645_v38  ;;  %v962_v58 = vadd.f32 %v943_v39, %v852_v34 }
  0xdf   : > { %v963_v15 = vadd.f32 %v946_v31, %v853_v11 }
  0xe0   : > { %v477_v53 = vpop.f32.mrf.mxu1  ;;  %v948_v36 = vpop.f32.mrf.mxu0 }
  0xe1   : > { %v638_v60 = vpop.f32.mrf.mxu2  ;;  %v478_v62 = vadd.f32 %v477_v53, %v376_v51  ;;  %v846_v20 = vpop.f32.mrf.mxu3 }
  0xe3   : > { %v646_v37 = vadd.f32 %v630_v32, %v478_v62 }
  0xe5   : > { %v854_v4 = vadd.f32 %v3134_v56, %v646_v37 }
  0xe7   : > { %v964_v53 = vadd.f32 %v948_v36, %v854_v4 }
  0xe8   : > { %v480_v57 = vpop.f32.mrf.mxu1  ;;  %v951_v16 = vpop.f32.mrf.mxu0 }
  0xe9   : > { %v640_v29 = vpop.f32.mrf.mxu2  ;;  %v481_v44 = vadd.f32 %v480_v57, %v379_v6  ;;  %v3144_v21 = vpop.f32.mrf.mxu3 }
  0xeb   : > { %v647_v19 = vadd.f32 %v633_v18, %v481_v44 }
  0xed   : > { %v855_v25 = vadd.f32 %v841_v13, %v647_v19 }
  0xef   : > { %v3138_v9 = vadd.f32 %v951_v16, %v855_v25 }
  0xf0   : > { %v482_v54 = vpop.f32.mrf.mxu1  ;;  %v3140_v46 = vpop.f32.mrf.mxu0 }
  0xf1   : > { %v1221_v10 = vpop.f32.mrf.mxu2  ;;  %v483_v43 = vadd.f32 %v482_v54, %v381_v24  ;;  %v1325_v48 = vpop.f32.mrf.mxu3 }
  0xf3   : > { %v3142_v52 = vadd.f32 %v635_v50, %v483_v43 }
  0xf8   : > { %v485_v41 = vpop.f32.mrf.mxu1  ;;  %v956_v26 = vpop.f32.mrf.mxu0 }
  0xf9   : > { %v1223_v12 = vpop.f32.mrf.mxu2  ;;  %v486_v7 = vadd.f32 %v485_v41, %v384_v5  ;;  %v1327_v45 = vpop.f32.mrf.mxu3 }
  0xfb   : > { %v649_v14 = vadd.f32 %v638_v60, %v486_v7 }
  0xfd   : > { %v857_v2 = vadd.f32 %v846_v20, %v649_v14 }
  0xff   : > { %v3146_v35 = vadd.f32 %v956_v26, %v857_v2 }
 0x100   : > { %v487_v6 = vpop.f32.mrf.mxu1  ;;  %v3148_v61 = vpop.f32.mrf.mxu0 }
 0x101   : > { %v488_v59 = vadd.f32 %v487_v6, %v386_v3  ;;  %v1226_v49 = vpop.f32.mrf.mxu2  ;;  %v3156_v3 = vld [vmem:[%s3247_s2] ss:$0 sm:$0xff]  ;;  %v1330_v18 = vpop.f32.mrf.mxu3 }
 0x103   : > { %v3150_v27 = vadd.f32 %v640_v29, %v488_v59 }
 0x108   : > { %v1099_v24 = vpop.f32.mrf.mxu1  ;;  %v1441_v17 = vpop.f32.mrf.mxu0 }
 0x109   : > { %v1119_v40 = vadd.f32 %v1099_v24, %v961_v30  ;;  %v1228_v5 = vpop.f32.mrf.mxu2  ;;  %v1332_v60 = vpop.f32.mrf.mxu3 }
 0x10b   : > { %v1241_v51 = vadd.f32 %v1221_v10, %v1119_v40 }
 0x10d   : > { %v1345_v32 = vadd.f32 %v1325_v48, %v1241_v51 }
 0x10f   : > { %v1461_v28 = vadd.f32 %v1441_v17, %v1345_v32 }
 0x110   : > { %v1101_v33 = vpop.f32.mrf.mxu1  ;;  %v1443_v1 = vpop.f32.mrf.mxu0 }
 0x111   : > { %v1120_v55 = vadd.f32 %v1101_v33, %v962_v58  ;;  %v1231_v30 = vpop.f32.mrf.mxu2  ;;  %v1473_v63 = vadd.f32 %v3156_v3, %v1461_v28  ;;  %v1335_v17 = vpop.f32.mrf.mxu3 }
 0x113   : > { %v1242_v0 = vadd.f32 %v1223_v12, %v1120_v55  ;;  %v1481_v31 = vmax.f32 %v1473_v63, 0.0  ;;  %v856_v55 = vadd.f32 %v3136_v23, %v3142_v52 }
 0x115   : > { %v1346_v42 = vadd.f32 %v1327_v45, %v1242_v0 }
 0x117   : > { %v1462_v8 = vadd.f32 %v1443_v1, %v1346_v42 }
 0x118   : > { %v1104_v47 = vpop.f32.mrf.mxu1  ;;  %v1446_v50 = vpop.f32.mrf.mxu0 }
 0x119   : > { %v1474_v39 = vadd.f32 %v3156_v3, %v1462_v8  ;;  %v1121_v13 = vadd.f32 %v1104_v47, %v963_v15  ;;  %v3161_v29 = vpop.f32.mrf.mxu2 }
 0x11b   : > { %v1482_v22 = vmax.f32 %v1474_v39, 0.0  ;;  %v1243_v11 = vadd.f32 %v1226_v49, %v1121_v13 }
 0x11d   : > { %v1505_v38 = vmax.f32 %v1481_v31, %v1482_v22  ;;  %v1347_v44 = vadd.f32 %v1330_v18, %v1243_v11  ;;  %v966_v22 = vadd.f32 %v3140_v46, %v856_v55 }
 0x11f   : > { %v1509_v62 = vpack.c.bf16 %v1505_v38, %v1505_v38  ;;  %v1463_v12 = vadd.f32 %v1446_v50, %v1347_v44 }
 0x120   : > { %v1106_v57 = vpop.f32.mrf.mxu1  ;;  %v1448_v20 = vpop.f32.mrf.mxu0 }
 0x121   : > { %v1517_v16 = vrot.slane %v1509_v62, 3  ;;  %v1122_v19 = vadd.f32 %v1106_v57, %v964_v53  ;;  %v1475_v45 = vadd.f32 %v3156_v3, %v1463_v12  ;;  %v3169_v1 = vpop.f32.mrf.mxu2  ;;  %v1337_v57 = vpop.f32.mrf.mxu3 }
 0x123   : > { %v1524_v15 = vsel %vm244_vm3, %v1509_v62, %v1517_v16  ;;  %v1526_v56 = vsel %vm1525_vm6, %v1509_v62, %v1517_v16  ;;  %v1530_v37 = vsel %vm1529_vm7, %v1509_v62, %v1517_v16  ;;  %v1534_v25 = vsel %vm1533_vm8, %v1509_v62, %v1517_v16 }
 0x124   : > { %v1528_v36 = vrot.slane %v1526_v56, 1  ;;  %v1532_v10 = vrot.slane %v1530_v37, 2  ;;  %v1536_v54 = vrot.slane %v1534_v25, 3  ;;  %v1589_v43 = vunpack.c.l.bf16 %v1524_v15 }
 0x125   : > { %v1244_v41 = vadd.f32 %v1228_v5, %v1122_v19  ;;  %v1483_v50 = vmax.f32 %v1475_v45, 0.0  ;;  %v858_v16 = vadd.f32 %v3144_v21, %v3150_v27 }
 0x126   : > { %v1590_v26 = vunpack.c.l.bf16 %v1528_v36  ;;  %v1591_v7 = vunpack.c.l.bf16 %v1532_v10  ;;  %v1592_v14 = vunpack.c.l.bf16 %v1536_v54  ;;  %v2381_v2 = vrot.slane %v1589_v43, 9 }
 0x127   : > { %v1348_v48 = vadd.f32 %v1332_v60, %v1244_v41  ;;  %v968_v12 = vadd.f32 %v3148_v61, %v858_v16 }
 0x128   : > { %v2382_v6 = vrot.slane %v1590_v26, 9  ;;  %v2383_v59 = vrot.slane %v1591_v7, 9  ;;  %v2384_v49 = vrot.slane %v1592_v14, 9  ;;  %v1669_v24 = vmax.f32 %v1589_v43, %v2381_v2  ;;  %v1109_v40 = vpop.f32.mrf.mxu1  ;;  %v1451_v47 = vpop.f32.mrf.mxu0 }
 0x129   : > { %v1464_v34 = vadd.f32 %v1448_v20, %v1348_v48  ;;  %v1123_v51 = vadd.f32 %v1109_v40, %v3138_v9  ;;  %v3182_v20 = vpop.f32.mrf.mxu2 }
 0x12a   : > { %v1670_v58 = vmax.f32 %v1590_v26, %v2382_v6  ;;  %v1671_v32 = vmax.f32 %v1591_v7, %v2383_v59  ;;  %v1672_v33 = vmax.f32 %v1592_v14, %v2384_v49  ;;  %v1685_v5 = vpack.c.bf16 %v1669_v24, %v1669_v24 }
 0x12b   : > { %v1476_v28 = vadd.f32 %v3156_v3, %v1464_v34  ;;  %v1245_v0 = vadd.f32 %v1231_v30, %v1123_v51 }
 0x12c   : > { %v1686_v18 = vpack.c.bf16 %v1670_v58, %v1670_v58  ;;  %v1687_v42 = vpack.c.bf16 %v1671_v32, %v1671_v32  ;;  %v1688_v63 = vpack.c.bf16 %v1672_v33, %v1672_v33  ;;  %v1717_v8 = vrot.slane %v1685_v5, 2 }
 0x12d   : > { %v1484_v9 = vmax.f32 %v1476_v28, 0.0  ;;  %v1349_v52 = vadd.f32 %v1335_v17, %v1245_v0 }
 0x12e   : > { %v1718_v39 = vrot.slane %v1686_v18, 2  ;;  %v1719_v13 = vrot.slane %v1687_v42, 2  ;;  %v1720_v4 = vrot.slane %v1688_v63, 2  ;;  %v1736_v31 = vsel %vm1733_vm9, %v1685_v5, %v1717_v8 }
 0x12f   : > { %1782 = vst [vmem:[#allocation1] ss:$2 sm:$0xff] %v1736_v31  ;;  %v1506_v23 = vmax.f32 %v1483_v50, %v1484_v9  ;;  %v1465_v44 = vadd.f32 %v1451_v47, %v1349_v52 }
 0x130   : > { %v1739_v38 = vsel %vm1733_vm9, %v1686_v18, %v1718_v39  ;;  %v1742_v30 = vsel %vm1733_vm9, %v1687_v42, %v1719_v13  ;;  %v1745_v11 = vsel %vm1733_vm9, %v1688_v63, %v1720_v4  ;;  %v1111_v60 = vpop.f32.mrf.mxu1  ;;  %v1453_v27 = vpop.f32.mrf.mxu0 }
 0x131   : > { %1786 = vst [vmem:[#allocation1 + $0x10] ss:$2 sm:$0xff] %v1739_v38  ;;  %v1510_v53 = vpack.c.bf16 %v1506_v23, %v1506_v23  ;;  %v1124_v62 = vadd.f32 %v1111_v60, %v966_v22  ;;  %v1340_v63 = vpop.f32.mrf.mxu3  ;;  %v1456_v31 = vpop.f32.mrf.mxu2 }
 0x132   : > { %1790 = vst [vmem:[#allocation1 + $0x20] ss:$2 sm:$0xff] %v1742_v30 }
 0x133   : > { %1794 = vst [vmem:[#allocation1 + $0x30] ss:$2 sm:$0xff] %v1745_v11  ;;  %v1518_v46 = vrot.slane %v1510_v53, 3  ;;  %v1246_v19 = vadd.f32 %v3161_v29, %v1124_v62  ;;  %v1477_v29 = vadd.f32 %v3156_v3, %v1465_v44 }
 0x135   : > { %v1539_v15 = vsel %vm244_vm3, %v1510_v53, %v1518_v46  ;;  %v1540_v56 = vsel %vm1525_vm6, %v1510_v53, %v1518_v46  ;;  %v1543_v37 = vsel %vm1529_vm7, %v1510_v53, %v1518_v46  ;;  %v1546_v25 = vsel %vm1533_vm8, %v1510_v53, %v1518_v46 }
 0x136   : > { %v1542_v36 = vrot.slane %v1540_v56, 1  ;;  %v1545_v10 = vrot.slane %v1543_v37, 2  ;;  %v1548_v54 = vrot.slane %v1546_v25, 3  ;;  %v1593_v43 = vunpack.c.l.bf16 %v1539_v15  ;;  %v1783_v21 = vld.sshfl [vmem:[#allocation1] sm:$0xff pattern:$0x75643120] }
 0x137   : > { %v1350_v41 = vadd.f32 %v1337_v57, %v1246_v19  ;;  %v1833_v49 = vunpack.c.l.b16 %v1783_v21  ;;  %v1485_v50 = vmax.f32 %v1477_v29, 0.0 }
 0x138   : > { %v1594_v26 = vunpack.c.l.bf16 %v1542_v36  ;;  %v1595_v7 = vunpack.c.l.bf16 %v1545_v10  ;;  %v1596_v14 = vunpack.c.l.bf16 %v1548_v54  ;;  %v2385_v2 = vrot.slane %v1593_v43, 9  ;;  %v1787_v48 = vld.sshfl [vmem:[#allocation1 + $0x10] sm:$0xff pattern:$0x75643120]  ;;  %v1114_v6 = vpop.f32.mrf.mxu1 }
 0x139   : > { %v1791_v59 = vld.sshfl [vmem:[#allocation1 + $0x20] sm:$0xff pattern:$0x75643120]  ;;  %v1834_v24 = vunpack.c.l.b16 %v1787_v48  ;;  %v1466_v17 = vadd.f32 %v1453_v27, %v1350_v41  ;;  %v1125_v40 = vadd.f32 %v1114_v6, %v3146_v35 }
 0x13a   : > { %v2386_v45 = vrot.slane %v1594_v26, 9  ;;  %v2387_v34 = vrot.slane %v1595_v7, 9  ;;  %v2388_v51 = vrot.slane %v1596_v14, 9  ;;  %v1673_v58 = vmax.f32 %v1593_v43, %v2385_v2  ;;  %v1795_v61 = vld.sshfl [vmem:[#allocation1 + $0x30] sm:$0xff pattern:$0x75643120] }
 0x13b   : > { %v1835_v32 = vunpack.c.l.b16 %v1791_v59  ;;  %v1836_v33 = vunpack.c.l.b16 %v1795_v61  ;;  %v1849_v5 = vrot.slane %v1834_v24, 7  ;;  %v1478_v55 = vadd.f32 %v3156_v3, %v1466_v17  ;;  %v1458_v24 = vpop.f32.mrf.mxu2 }
 0x13c   : > { %v1674_v28 = vmax.f32 %v1594_v26, %v2386_v45  ;;  %v1675_v0 = vmax.f32 %v1595_v7, %v2387_v34  ;;  %v1676_v18 = vmax.f32 %v1596_v14, %v2388_v51  ;;  %v1689_v42 = vpack.c.bf16 %v1673_v58, %v1673_v58  ;;  %v1342_v26 = vpop.f32.mrf.mxu3 }
 0x13d   : > { %v1850_v8 = vsel %vm1525_vm6, %v1849_v5, %v1833_v49  ;;  %v1851_v47 = vrot.slane %v1835_v32, 6  ;;  %v1486_v35 = vmax.f32 %v1478_v55, 0.0  ;;  %v1853_v23 = vrot.slane %v1836_v33, 5 }
 0x13e   : > { %v1690_v9 = vpack.c.bf16 %v1674_v28, %v1674_v28  ;;  %v1691_v39 = vpack.c.bf16 %v1675_v0, %v1675_v0  ;;  %v1692_v13 = vpack.c.bf16 %v1676_v18, %v1676_v18  ;;  %v1721_v4 = vrot.slane %v1689_v42, 2 }
 0x13f   : > { %v1852_v22 = vsel %vm1529_vm7, %v1851_v47, %v1850_v8  ;;  %v1507_v52 = vmax.f32 %v1485_v50, %v1486_v35  ;;  %v1247_v38 = vadd.f32 %v3169_v1, %v1125_v40 }
 0x140   : > { %v1722_v30 = vrot.slane %v1690_v9, 2  ;;  %v1723_v11 = vrot.slane %v1691_v39, 2  ;;  %v1724_v60 = vrot.slane %v1692_v13, 2  ;;  %v1748_v53 = vsel %vm1733_vm9, %v1689_v42, %v1721_v4  ;;  %v1116_v62 = vpop.f32.mrf.mxu1 }
 0x141   : > { %1797 = vst [vmem:[#allocation1] ss:$2 sm:$0xff] %v1748_v53  ;;  %v1854_v57 = vsel %vm1533_vm8, %v1853_v23, %v1852_v22  ;;  %v1511_v16 = vpack.c.bf16 %v1507_v52, %v1507_v52  ;;  %v1351_v46 = vadd.f32 %v1340_v63, %v1247_v38  ;;  %v1126_v44 = vadd.f32 %v1116_v62, %v968_v12 }
 0x142   : > { %v1751_v19 = vsel %vm1733_vm9, %v1690_v9, %v1722_v30  ;;  %v1754_v15 = vsel %vm1733_vm9, %v1691_v39, %v1723_v11  ;;  %v1757_v56 = vsel %vm1733_vm9, %v1692_v13, %v1724_v60  ;;  %v1873_v1 = vpack.c.b16 %v1854_v57, %v1854_v57 }
 0x143   : > { %1800 = vst [vmem:[#allocation1 + $0x10] ss:$2 sm:$0xff] %v1751_v19  ;;  %v1519_v37 = vrot.slane %v1511_v16, 3  ;;  %v1467_v25 = vadd.f32 %v1456_v31, %v1351_v46  ;;  %v1248_v36 = vadd.f32 %v3182_v20, %v1126_v44 }
 0x144   : > { %1803 = vst [vmem:[#allocation1 + $0x20] ss:$2 sm:$0xff] %v1754_v15  ;;  %v1877_v10 = vrot.slane %v1873_v1, 2 }
 0x145   : > { %1806 = vst [vmem:[#allocation1 + $0x30] ss:$2 sm:$0xff] %v1757_v56  ;;  %v1551_v54 = vsel %vm244_vm3, %v1511_v16, %v1519_v37  ;;  %v1552_v43 = vsel %vm1525_vm6, %v1511_v16, %v1519_v37  ;;  %v1555_v21 = vsel %vm1529_vm7, %v1511_v16, %v1519_v37  ;;  %v1558_v27 = vsel %vm1533_vm8, %v1511_v16, %v1519_v37 }
 0x146   : > { %v1883_v12 = vsel %vm1733_vm9, %v1873_v1, %v1877_v10  ;;  %v1554_v20 = vrot.slane %v1552_v43, 1  ;;  %v1557_v29 = vrot.slane %v1555_v21, 2  ;;  %v1560_v41 = vrot.slane %v1558_v27, 3 }
 0x147   : > { %1897 = vst [vmem:[%s3205_s19] sm:$0x3] %v1883_v12  ;;  %v1597_v7 = vunpack.c.l.bf16 %v1551_v54  ;;  %v1479_v14 = vadd.f32 %v3156_v3, %v1467_v25  ;;  %v1352_v2 = vadd.f32 %v1342_v26, %v1248_v36 }
 0x148   : > { %v1598_v48 = vunpack.c.l.bf16 %v1554_v20  ;;  %v1599_v6 = vunpack.c.l.bf16 %v1557_v29  ;;  %v1600_v59 = vunpack.c.l.bf16 %v1560_v41  ;;  %v1798_v49 = vld.sshfl [vmem:[#allocation1] sm:$0xff pattern:$0x75643120] }
 0x149   : > { %v2389_v17 = vrot.slane %v1597_v7, 9  ;;  %v1468_v40 = vadd.f32 %v1458_v24, %v1352_v2  ;;  %v1837_v61 = vunpack.c.l.b16 %v1798_v49  ;;  %v1487_v55 = vmax.f32 %v1479_v14, 0.0 }
 0x14a   : > { %v2390_v45 = vrot.slane %v1598_v48, 9  ;;  %v2391_v34 = vrot.slane %v1599_v6, 9  ;;  %v2392_v51 = vrot.slane %v1600_v59, 9  ;;  %v1801_v58 = vld.sshfl [vmem:[#allocation1 + $0x10] sm:$0xff pattern:$0x75643120] }
 0x14b   : > { %v1677_v32 = vmax.f32 %v1597_v7, %v2389_v17  ;;  %v1804_v33 = vld.sshfl [vmem:[#allocation1 + $0x20] sm:$0xff pattern:$0x75643120]  ;;  %v1838_v5 = vunpack.c.l.b16 %v1801_v58  ;;  %v1480_v28 = vadd.f32 %v3156_v3, %v1468_v40 }
 0x14c   : > { %v1678_v0 = vmax.f32 %v1598_v48, %v2390_v45  ;;  %v1679_v18 = vmax.f32 %v1599_v6, %v2391_v34  ;;  %v1680_v42 = vmax.f32 %v1600_v59, %v2392_v51  ;;  %v1807_v63 = vld.sshfl [vmem:[#allocation1 + $0x30] sm:$0xff pattern:$0x75643120]  ;;  %v1839_v8 = vunpack.c.l.b16 %v1804_v33 }
 0x14d   : > { %v1693_v47 = vpack.c.bf16 %v1677_v32, %v1677_v32  ;;  %v1840_v50 = vunpack.c.l.b16 %v1807_v63  ;;  %v1855_v35 = vrot.slane %v1838_v5, 7  ;;  %v1488_v9 = vmax.f32 %v1480_v28, 0.0 }
 0x14e   : > { %v1694_v39 = vpack.c.bf16 %v1678_v0, %v1678_v0  ;;  %v1695_v13 = vpack.c.bf16 %v1679_v18, %v1679_v18  ;;  %v1696_v4 = vpack.c.bf16 %v1680_v42, %v1680_v42  ;;  %v1857_v31 = vrot.slane %v1839_v8, 6 }
 0x14f   : > { %v1725_v22 = vrot.slane %v1693_v47, 2  ;;  %v1856_v23 = vsel %vm1525_vm6, %v1855_v35, %v1837_v61  ;;  %v1859_v52 = vrot.slane %v1840_v50, 5  ;;  %v1508_v38 = vmax.f32 %v1487_v55, %v1488_v9 }
 0x150   : > { %v1726_v30 = vrot.slane %v1694_v39, 2  ;;  %v1727_v3 = vrot.slane %v1695_v13, 2  ;;  %v1728_v11 = vrot.slane %v1696_v4, 2  ;;  %v1858_v60 = vsel %vm1529_vm7, %v1857_v31, %v1856_v23 }
 0x151   : > { %v1760_v53 = vsel %vm1733_vm9, %v1693_v47, %v1725_v22  ;;  %v1860_v62 = vsel %vm1533_vm8, %v1859_v52, %v1858_v60  ;;  %v1512_v57 = vpack.c.bf16 %v1508_v38, %v1508_v38 }
 0x152   : > { %v1763_v16 = vsel %vm1733_vm9, %v1694_v39, %v1726_v30  ;;  %v1766_v46 = vsel %vm1733_vm9, %v1695_v13, %v1727_v3  ;;  %v1769_v44 = vsel %vm1733_vm9, %v1696_v4, %v1728_v11  ;;  %1809 = vst [vmem:[#allocation1] ss:$2 sm:$0xff] %v1760_v53  ;;  %v1874_v19 = vpack.c.b16 %v1860_v62, %v1860_v62 }
 0x153   : > { %1812 = vst [vmem:[#allocation1 + $0x10] ss:$2 sm:$0xff] %v1763_v16  ;;  %v1520_v15 = vrot.slane %v1512_v57, 3 }
 0x154   : > { %1815 = vst [vmem:[#allocation1 + $0x20] ss:$2 sm:$0xff] %v1766_v46  ;;  %v1878_v56 = vrot.slane %v1874_v19, 2 }
 0x155   : > { %1818 = vst [vmem:[#allocation1 + $0x30] ss:$2 sm:$0xff] %v1769_v44  ;;  %v1563_v1 = vsel %vm244_vm3, %v1512_v57, %v1520_v15  ;;  %v1564_v37 = vsel %vm1525_vm6, %v1512_v57, %v1520_v15  ;;  %v1567_v25 = vsel %vm1529_vm7, %v1512_v57, %v1520_v15  ;;  %v1570_v36 = vsel %vm1533_vm8, %v1512_v57, %v1520_v15 }
 0x156   : > { %v1886_v10 = vsel %vm1733_vm9, %v1874_v19, %v1878_v56  ;;  %v1566_v54 = vrot.slane %v1564_v37, 1  ;;  %v1569_v43 = vrot.slane %v1567_v25, 2  ;;  %v1572_v21 = vrot.slane %v1570_v36, 3 }
 0x157   : > { %1898 = vst [vmem:[%s3205_s19 + $0x2] sm:$0x3] %v1886_v10  ;;  %v1601_v27 = vunpack.c.l.bf16 %v1563_v1 }
 0x158   : > { %v1602_v12 = vunpack.c.l.bf16 %v1566_v54  ;;  %v1603_v20 = vunpack.c.l.bf16 %v1569_v43  ;;  %v1604_v29 = vunpack.c.l.bf16 %v1572_v21 }
 0x159   : > { %v2393_v41 = vrot.slane %v1601_v27, 9  ;;  %v1810_v26 = vld.sshfl [vmem:[#allocation1] sm:$0xff pattern:$0x75643120] }
 0x15a   : > { %v2394_v7 = vrot.slane %v1602_v12, 9  ;;  %v2395_v14 = vrot.slane %v1603_v20, 9  ;;  %v2396_v2 = vrot.slane %v1604_v29, 9  ;;  %v1813_v48 = vld.sshfl [vmem:[#allocation1 + $0x10] sm:$0xff pattern:$0x75643120]  ;;  %v1841_v58 = vunpack.c.l.b16 %v1810_v26 }
 0x15b   : > { %v1681_v6 = vmax.f32 %v1601_v27, %v2393_v41  ;;  %v1816_v59 = vld.sshfl [vmem:[#allocation1 + $0x20] sm:$0xff pattern:$0x75643120]  ;;  %v1842_v49 = vunpack.c.l.b16 %v1813_v48 }
 0x15c   : > { %v1682_v24 = vmax.f32 %v1602_v12, %v2394_v7  ;;  %v1683_v17 = vmax.f32 %v1603_v20, %v2395_v14  ;;  %v1684_v40 = vmax.f32 %v1604_v29, %v2396_v2  ;;  %v1819_v45 = vld.sshfl [vmem:[#allocation1 + $0x30] sm:$0xff pattern:$0x75643120]  ;;  %v1843_v34 = vunpack.c.l.b16 %v1816_v59 }
 0x15d   : > { %v1697_v51 = vpack.c.bf16 %v1681_v6, %v1681_v6  ;;  %v1844_v61 = vunpack.c.l.b16 %v1819_v45  ;;  %v1861_v32 = vrot.slane %v1842_v49, 7 }
 0x15e   : > { %v1698_v33 = vpack.c.bf16 %v1682_v24, %v1682_v24  ;;  %v1699_v5 = vpack.c.bf16 %v1683_v17, %v1683_v17  ;;  %v1700_v55 = vpack.c.bf16 %v1684_v40, %v1684_v40  ;;  %v1863_v28 = vrot.slane %v1843_v34, 6 }
 0x15f   : > { %v1729_v0 = vrot.slane %v1697_v51, 2  ;;  %v1862_v18 = vsel %vm1525_vm6, %v1861_v32, %v1841_v58  ;;  %v1865_v42 = vrot.slane %v1844_v61, 5 }
 0x160   : > { %v1730_v63 = vrot.slane %v1698_v33, 2  ;;  %v1731_v8 = vrot.slane %v1699_v5, 2  ;;  %v1732_v47 = vrot.slane %v1700_v55, 2  ;;  %v1864_v50 = vsel %vm1529_vm7, %v1863_v28, %v1862_v18 }
 0x161   : > { %v1772_v35 = vsel %vm1733_vm9, %v1697_v51, %v1729_v0  ;;  %v1866_v9 = vsel %vm1533_vm8, %v1865_v42, %v1864_v50 }
 0x162   : > { %v1775_v39 = vsel %vm1733_vm9, %v1698_v33, %v1730_v63  ;;  %v1778_v13 = vsel %vm1733_vm9, %v1699_v5, %v1731_v8  ;;  %v1781_v4 = vsel %vm1733_vm9, %v1700_v55, %v1732_v47  ;;  %1821 = vst [vmem:[#allocation1] ss:$2 sm:$0xff] %v1772_v35  ;;  %v1875_v31 = vpack.c.b16 %v1866_v9, %v1866_v9 }
 0x163   : > { %1824 = vst [vmem:[#allocation1 + $0x10] ss:$2 sm:$0xff] %v1775_v39 }
 0x164   : > { %1827 = vst [vmem:[#allocation1 + $0x20] ss:$2 sm:$0xff] %v1778_v13  ;;  %v1879_v22 = vrot.slane %v1875_v31, 2 }
 0x165   : > { %1830 = vst [vmem:[#allocation1 + $0x30] ss:$2 sm:$0xff] %v1781_v4 }
 0x166   : > { %v1889_v23 = vsel %vm1733_vm9, %v1875_v31, %v1879_v22 }
 0x167   : > { %1899 = vst [vmem:[%s3205_s19 + $0x4] sm:$0x3] %v1889_v23 }
 0x169   : > { %v1822_v52 = vld.sshfl [vmem:[#allocation1] sm:$0xff pattern:$0x75643120] }
 0x16a   : > { %v1825_v38 = vld.sshfl [vmem:[#allocation1 + $0x10] sm:$0xff pattern:$0x75643120]  ;;  %v1845_v53 = vunpack.c.l.b16 %v1822_v52 }
 0x16b   : > { %v1828_v30 = vld.sshfl [vmem:[#allocation1 + $0x20] sm:$0xff pattern:$0x75643120]  ;;  %v1846_v3 = vunpack.c.l.b16 %v1825_v38 }
 0x16c   : > { %v1831_v11 = vld.sshfl [vmem:[#allocation1 + $0x30] sm:$0xff pattern:$0x75643120]  ;;  %v1847_v60 = vunpack.c.l.b16 %v1828_v30 }
 0x16d   : > { %v1848_v62 = vunpack.c.l.b16 %v1831_v11  ;;  %v1867_v57 = vrot.slane %v1846_v3, 7 }
 0x16e   : > { %v1869_v16 = vrot.slane %v1847_v60, 6 }
 0x16f   : > { %v1868_v46 = vsel %vm1525_vm6, %v1867_v57, %v1845_v53  ;;  %v1871_v44 = vrot.slane %v1848_v62, 5 }
 0x170   : > { %v1870_v19 = vsel %vm1529_vm7, %v1869_v16, %v1868_v46 }
 0x171   : > { %v1872_v15 = vsel %vm1533_vm8, %v1871_v44, %v1870_v19 }
 0x172   : > { %v1876_v56 = vpack.c.b16 %v1872_v15, %v1872_v15 }
 0x174   : > { %v1880_v1 = vrot.slane %v1876_v56, 2 }
 0x176   : > { %v1892_v37 = vsel %vm1733_vm9, %v1876_v56, %v1880_v1 }
 0x177   : > { %1900 = vst [vmem:[%s3205_s19 + $0x6] sm:$0x3] %v1892_v37 }
 0x178 PF: > { %s13_s12 = sadd.s32 1, %s2505_s12  }
 0x179   : > { %p10_p4 = scmp.ge.s32.totalorder %s13_s12, 4  }
 0x17b   :  { %12 = sbr.rel (!%p10_p4) target bundleno = 1 (0x1), region = 73 }

// kernel: _lambda_.2
= control target key start
LH: loop header
LB: loop body
LE: loop exit
PB: predicated region body
PF: predicated region fallthrough
CT: control target
= control target key end

     0   :  { %8 = vsyncpa [#allocation3], 0  ;;  %s4055_s12 = smov 0   ;;  %s4880_s0 = inlined_call_operand.vmem [shape: bf16[2,16,16,128], index: 0, kind: input, shape index: {}]   ;;  %s4881_s1 = inlined_call_operand.hbm [shape: bf16[9,128,128], index: 1, kind: input, shape index: {}]   ;;  %s4882_s2 = inlined_call_operand.vmem [shape: f32[1,128], index: 2, kind: input, shape index: {}]   ;;  %s4883_s3 = inlined_call_operand.vmem [shape: bf16[2,8,8,128], index: 3, kind: output, shape index: {}]  }
   0x1 LB: > { %s124_s15 = sshll.u32 %s4881_s1, 4  ;;  %s4064_s16 = sadd.s32 4294967295, %s4029_s12   ;;  %s4029_s12 = sphi %s4055_s12, %s14_s12   ;;  %s125_s15 = int_to_ptr.hbm [resolvable:$true] %s124_s15 }
   0x2   : > { %p3411_p0 = scmp.ge.s32.totalorder %s4029_s12, 1  ;;  %p113_p1 = scmp.lt.s32.totalorder %s4029_s12, 3 }
   0x3   : > { %p3960_p2 = scmp.eq.s32.totalorder %s4064_s16, 0  ;;  %s4031_s17 = smov [#allocation2]  }
   0x4   : > { %p114_p3 = pnand %p3411_p0, %p113_p1  ;;  %s126_s18 = sshll.u32 %s4031_s17, 4  ;;  %s127_s18 = int_to_ptr.vmem [resolvable:$true] %s126_s18 }
   0x5   : > { %s4032_s19 = smov 64   ;;  %s4033_s20 = smov 4  }
   0x6   : > { %p3956_p4 = pneg %p114_p3  ;;  %153 = sbr.rel (%p114_p3) target bundleno = 783 (0x30f), region = 32 }
   0x8   : > { %p3957_p5 = pnand %p3960_p2, %p3956_p4 }
   0xa   : > { %3959 = dma.hbm_to_vmem [thread:$0]  (!%p3957_p5), %s125_s15, 9216, %s127_s18, [#allocation3], %s4032_s19, %s4032_s19, %s4033_s20  }
   0xb   : > { %4024 = dma.done.wait (%p3960_p2), [#allocation3], 9216  }
   0xc   : > { %4026 = vsyncadd (%p3960_p2), [#allocation3], 4294958080  ;;  %v3871_v0 = vld [vmem:[#allocation2 + $0x78] sm:$0xff]  ;;  %v3870_v1 = vld [vmem:[#allocation2 + $0x70] sm:$0xff]  ;;  %p178_p6 = scmp.lt.s32.totalorder %s4064_s16, 1  ;;  %v4884_v17 = vmov 0  }
   0xd   : > { %3928 = vmatpush.bf16.msra.mxu1 %v3871_v0  ;;  %3929 = vmatpush.bf16.msra.mxu2 %v3871_v0  ;;  %v3869_v2 = vld [vmem:[#allocation2 + $0x68] sm:$0xff]  ;;  %v3868_v3 = vld [vmem:[#allocation2 + $0x60] sm:$0xff]  ;;  %v3867_v4 = vld [vmem:[#allocation2 + $0x58] sm:$0xff]  ;;  %vm439_vm0 = vcmask 1040384   ;;  %vm440_vm1 = vsmask.f32 256 }
   0xe   : > { %3930 = vmatpush.bf16.msra.mxu3 %v3871_v0  ;;  %539 = vmatpush.bf16.msra.mxu0 %v3871_v0  ;;  %v3866_v5 = vld [vmem:[#allocation2 + $0x50] sm:$0xff]  ;;  %s4954_s16 = smov (!%p178_p6, %s4064_s16), 1  ;;  %v3865_v6 = vld [vmem:[#allocation2 + $0x48] sm:$0xff]  ;;  %v3864_v7 = vld [vmem:[#allocation2 + $0x40] sm:$0xff]  ;;  %vm813_vm2 = vcmask 1047552   ;;  %v314_v63 = vrot.slane %v4884_v17, 7 }
   0xf   : > { %s3838_s21 = sshll.u32 %s4954_s16, 7  ;;  %v3879_v8 = vld [vmem:[#allocation2 + $0xb8] sm:$0xff]  ;;  %v3878_v15 = vld [vmem:[#allocation2 + $0xb0] sm:$0xff]  ;;  %v3877_v20 = vld [vmem:[#allocation2 + $0xa8] sm:$0xff]  ;;  %vm814_vm3 = vsmask.f32 7424 }
  0x10   : > { %s4077_s24 = scalar_lea.vmem %s4880_s0, %s3838_s21  ;;  %v3887_v9 = vld [vmem:[#allocation2 + $0xf8] sm:$0xff]  ;;  %v3886_v16 = vld [vmem:[#allocation2 + $0xf0] sm:$0xff]  ;;  %v3885_v21 = vld [vmem:[#allocation2 + $0xe8] sm:$0xff]  ;;  %vm2370_vm6 = vcmask 1041409   ;;  %vm2374_vm7 = vcmask 1042434   ;;  %vm2378_vm8 = vcmask 1043459  }
  0x11   : > { %3931 = vmatpush.bf16.msra.mxu1 %v3870_v1  ;;  %3932 = vmatpush.bf16.msra.mxu2 %v3870_v1  ;;  %v4080_v10 = vld [vmem:[%s4077_s24 + $0x18] sm:$0xff]  ;;  %v3862_v18 = vld [vmem:[#allocation2 + $0x30] sm:$0xff]  ;;  %v3861_v22 = vld [vmem:[#allocation2 + $0x28] sm:$0xff]  ;;  %vm3209_vm9 = vcmask 1044484   ;;  %vm3212_vm10 = vcmask 1045509   ;;  %vm3215_vm11 = vcmask 1046534  }
  0x12   : > { %3933 = vmatpush.bf16.msra.mxu3 %v3870_v1  ;;  %540 = vmatpush.bf16.msra.mxu0 %v3870_v1  ;;  %v4083_v11 = vld [vmem:[%s4077_s24 + $0x38] sm:$0xff]  ;;  %v3894_v19 = vld [vmem:[#allocation2 + $0x130] sm:$0xff]  ;;  %v3893_v23 = vld [vmem:[#allocation2 + $0x128] sm:$0xff]  ;;  %v765_v1 = vrot.slane %v4884_v17, 1  ;;  %vm3218_vm12 = vcmask 1047559   ;;  %s3839_s27 = sshll.u32 %s4954_s16, 5 }
  0x13   : > { %v4086_v12 = vld [vmem:[%s4077_s24 + $0x58] sm:$0xff]  ;;  %v3876_v24 = vld [vmem:[#allocation2 + $0xa0] sm:$0xff]  ;;  %v3874_v36 = vld [vmem:[#allocation2 + $0x90] sm:$0xff]  ;;  %s4629_s30 = scalar_lea.vmem %s4883_s3, %s3839_s27 }
  0x14   : > { %v3863_v13 = vld [vmem:[#allocation2 + $0x38] sm:$0xff]  ;;  %v3884_v25 = vld [vmem:[#allocation2 + $0xe0] sm:$0xff]  ;;  %v3882_v37 = vld [vmem:[#allocation2 + $0xd0] sm:$0xff] }
  0x15   : > { %3934 = vmatpush.bf16.msra.mxu1 %v3869_v2  ;;  %3935 = vmatpush.bf16.msra.mxu2 %v3869_v2  ;;  %v3895_v14 = vld [vmem:[#allocation2 + $0x138] sm:$0xff]  ;;  %v3860_v26 = vld [vmem:[#allocation2 + $0x20] sm:$0xff]  ;;  %v3858_v38 = vld [vmem:[#allocation2 + $0x10] sm:$0xff] }
  0x16   : > { %3936 = vmatpush.bf16.msra.mxu3 %v3869_v2  ;;  %541 = vmatpush.bf16.msra.mxu0 %v3869_v2  ;;  %v3892_v27 = vld [vmem:[#allocation2 + $0x120] sm:$0xff]  ;;  %v3875_v28 = vld [vmem:[#allocation2 + $0x98] sm:$0xff]  ;;  %v3890_v39 = vld [vmem:[#allocation2 + $0x110] sm:$0xff] }
  0x17   : > { %v3883_v29 = vld [vmem:[#allocation2 + $0xd8] sm:$0xff]  ;;  %v4093_v30 = vld [vmem:[%s4077_s24 + $0x20] sm:$0xff]  ;;  %v3873_v40 = vld [vmem:[#allocation2 + $0x88] sm:$0xff] }
  0x18   : > { %v4096_v31 = vld [vmem:[%s4077_s24 + $0x40] sm:$0xff]  ;;  %v3859_v34 = vld [vmem:[#allocation2 + $0x18] sm:$0xff]  ;;  %v3881_v41 = vld [vmem:[#allocation2 + $0xc8] sm:$0xff] }
  0x19   : > { %3937 = vmatpush.bf16.msra.mxu1 %v3868_v3  ;;  %3938 = vmatpush.bf16.msra.mxu2 %v3868_v3  ;;  %v4099_v32 = vld [vmem:[%s4077_s24 + $0x60] sm:$0xff]  ;;  %v3891_v35 = vld [vmem:[#allocation2 + $0x118] sm:$0xff]  ;;  %v3857_v42 = vld [vmem:[#allocation2 + $0x8] sm:$0xff] }
  0x1a   : > { %3939 = vmatpush.bf16.msra.mxu3 %v3868_v3  ;;  %542 = vmatpush.bf16.msra.mxu0 %v3868_v3  ;;  %v4102_v33 = vld [vmem:[%s4077_s24] sm:$0xff]  ;;  %v3889_v43 = vld [vmem:[#allocation2 + $0x108] sm:$0xff]  ;;  %v3911_v52 = vld [vmem:[#allocation2 + $0x1b8] sm:$0xff] }
  0x1b   : > { %v3872_v44 = vld [vmem:[#allocation2 + $0x80] sm:$0xff]  ;;  %v4109_v48 = vld [vmem:[%s4077_s24 + $0x28] sm:$0xff]  ;;  %v3919_v53 = vld [vmem:[#allocation2 + $0x1f8] sm:$0xff]  ;;  %v319_v60 = vshrl.u32 %v4102_v33, 16  ;;  %v322_v62 = vshll.u32 %v4102_v33, 16 }
  0x1c   : > { %v3880_v45 = vld [vmem:[#allocation2 + $0xc0] sm:$0xff]  ;;  %v4112_v49 = vld [vmem:[%s4077_s24 + $0x48] sm:$0xff]  ;;  %v3903_v54 = vld [vmem:[#allocation2 + $0x178] sm:$0xff] }
  0x1d   : > { %3940 = vmatpush.bf16.msra.mxu1 %v3867_v4  ;;  %3941 = vmatpush.bf16.msra.mxu2 %v3867_v4  ;;  %v3856_v46 = vld [vmem:[#allocation2] sm:$0xff]  ;;  %v4115_v50 = vld [vmem:[%s4077_s24 + $0x68] sm:$0xff]  ;;  %v3927_v55 = vld [vmem:[#allocation2 + $0x238] sm:$0xff]  ;;  %v321_v61 = vrot.slane %v319_v60, 7 }
  0x1e   : > { %3942 = vmatpush.bf16.msra.mxu3 %v3867_v4  ;;  %543 = vmatpush.bf16.msra.mxu0 %v3867_v4  ;;  %v3888_v47 = vld [vmem:[#allocation2 + $0x100] sm:$0xff]  ;;  %v4118_v51 = vld [vmem:[%s4077_s24 + $0x8] sm:$0xff]  ;;  %v4125_v56 = vld [vmem:[%s4077_s24 + $0x30] sm:$0xff] }
  0x1f   : > { %v4128_v57 = vld [vmem:[%s4077_s24 + $0x50] sm:$0xff]  ;;  %vm4144_vm4 = vmand %vm439_vm0, %vm440_vm1  ;;  %v324_v3 = vor.u32 %v322_v62, %v321_v61 }
  0x20   : > { %v4131_v58 = vld [vmem:[%s4077_s24 + $0x70] sm:$0xff]  ;;  %vm4149_vm5 = vmand %vm813_vm2, %vm814_vm3  ;;  %v442_v4 = vsel %vm4144_vm4, 0, %v314_v63 }
  0x21   : > { %3943 = vmatpush.bf16.msra.mxu1 %v3866_v5  ;;  %3944 = vmatpush.bf16.msra.mxu2 %v3866_v5  ;;  %v4134_v59 = vld [vmem:[%s4077_s24 + $0x10] sm:$0xff] }
  0x22   : > { %3945 = vmatpush.bf16.msra.mxu3 %v3866_v5  ;;  %544 = vmatpush.bf16.msra.mxu0 %v3866_v5  ;;  %v816_v5 = vsel %vm4149_vm5, %v765_v1, 0  ;;  %v3916_v1 = vld [vmem:[#allocation2 + $0x1e0] sm:$0xff] }
  0x25   : > { %3946 = vmatpush.bf16.msra.mxu1 %v3865_v6  ;;  %3947 = vmatpush.bf16.msra.mxu2 %v3865_v6 }
  0x26   : > { %3948 = vmatpush.bf16.msra.mxu3 %v3865_v6  ;;  %545 = vmatpush.bf16.msra.mxu0 %v3865_v6  ;;  %v443_v6 = vsel %vm4144_vm4, 0, %v324_v3  ;;  %v354_v3 = vshrl.u32 %v4109_v48, 16 }
  0x29   : > { %3949 = vmatpush.bf16.msra.mxu1 %v3864_v7  ;;  %3950 = vmatpush.bf16.msra.mxu2 %v3864_v7 }
  0x2a   : > { %3951 = vmatpush.bf16.msra.mxu3 %v3864_v7  ;;  %546 = vmatpush.bf16.msra.mxu0 %v3864_v7  ;;  %v3910_v7 = vld [vmem:[#allocation2 + $0x1b0] sm:$0xff] }
  0x2c   : > { %567 = vmatmul.bf16.vlgmr.msra.gmra.mxu1 %v4080_v10  ;;  %587 = vmatmul.bf16.vlgmr.msra.gmra.mxu2 %v4083_v11 }
  0x2d   : > { %897 = vmatpush.bf16.msrb.mxu2 %v3879_v8  ;;  %607 = vmatmul.bf16.vlgmr.msra.gmra.mxu3 %v4086_v12  ;;  %v3918_v8 = vld [vmem:[#allocation2 + $0x1f0] sm:$0xff] }
  0x2e   : > { %1097 = vmatpush.bf16.msrb.mxu3 %v3887_v9  ;;  %547 = vmatmul.bf16.vlgmr.msra.gmra.mxu0 %v4884_v17  ;;  %v3902_v9 = vld [vmem:[#allocation2 + $0x170] sm:$0xff] }
  0x2f   : > { %676 = vmatpush.bf16.msrb.mxu1 %v3863_v13  ;;  %1284 = vmatpush.bf16.msrb.mxu0 %v3895_v14  ;;  %v326_v13 = vshrl.u32 %v4118_v51, 16  ;;  %v3926_v14 = vld [vmem:[#allocation2 + $0x230] sm:$0xff] }
  0x31   : > { %898 = vmatpush.bf16.msrb.mxu2 %v3878_v15  ;;  %v767_v15 = vrot.slane %v322_v62, 1 }
  0x32   : > { %1098 = vmatpush.bf16.msrb.mxu3 %v3886_v16  ;;  %v328_v16 = vrot.slane %v326_v13, 7 }
  0x33   : > { %677 = vmatpush.bf16.msrb.mxu1 %v3862_v18  ;;  %1285 = vmatpush.bf16.msrb.mxu0 %v3894_v19  ;;  %v329_v18 = vshll.u32 %v4118_v51, 16  ;;  %v768_v19 = vor.u32 %v767_v15, %v319_v60 }
  0x35   : > { %899 = vmatpush.bf16.msrb.mxu2 %v3877_v20  ;;  %v331_v20 = vor.u32 %v329_v18, %v328_v16 }
  0x36   : > { %1099 = vmatpush.bf16.msrb.mxu3 %v3885_v21  ;;  %v4164_v21 = vsel %vm4149_vm5, %v768_v19, 0 }
  0x37   : > { %678 = vmatpush.bf16.msrb.mxu1 %v3861_v22  ;;  %1286 = vmatpush.bf16.msrb.mxu0 %v3893_v23  ;;  %v4168_v22 = vsel %vm4144_vm4, 0, %v331_v20  ;;  %v333_v23 = vshrl.u32 %v4134_v59, 16 }
  0x39   : > { %900 = vmatpush.bf16.msrb.mxu2 %v3876_v24  ;;  %v769_v24 = vrot.slane %v329_v18, 1 }
  0x3a   : > { %1100 = vmatpush.bf16.msrb.mxu3 %v3884_v25  ;;  %v335_v25 = vrot.slane %v333_v23, 7 }
  0x3b   : > { %679 = vmatpush.bf16.msrb.mxu1 %v3860_v26  ;;  %1287 = vmatpush.bf16.msrb.mxu0 %v3892_v27  ;;  %v336_v26 = vshll.u32 %v4134_v59, 16  ;;  %v770_v27 = vor.u32 %v769_v24, %v326_v13  ;;  %v356_v13 = vrot.slane %v354_v3, 7 }
  0x3c   : > { %572 = vmatmul.bf16.gmra.mxu1 %v4093_v30  ;;  %592 = vmatmul.bf16.gmra.mxu2 %v4096_v31 }
  0x3d   : > { %901 = vmatpush.bf16.msrb.mxu2 %v3875_v28  ;;  %612 = vmatmul.bf16.gmra.mxu3 %v4099_v32  ;;  %v338_v28 = vor.u32 %v336_v26, %v335_v25 }
  0x3e   : > { %1101 = vmatpush.bf16.msrb.mxu3 %v3883_v29  ;;  %552 = vmatmul.bf16.gmra.mxu0 %v4102_v33  ;;  %v4177_v29 = vsel %vm4149_vm5, %v770_v27, 0 }
  0x3f   : > { %680 = vmatpush.bf16.msrb.mxu1 %v3859_v34  ;;  %1288 = vmatpush.bf16.msrb.mxu0 %v3891_v35  ;;  %v3909_v34 = vld [vmem:[#allocation2 + $0x1a8] sm:$0xff] }
  0x40   : > { %v3917_v35 = vld [vmem:[#allocation2 + $0x1e8] sm:$0xff] }
  0x41   : > { %902 = vmatpush.bf16.msrb.mxu2 %v3874_v36  ;;  %v340_v36 = vshrl.u32 %v4080_v10, 16 }
  0x42   : > { %1102 = vmatpush.bf16.msrb.mxu3 %v3882_v37  ;;  %v3901_v37 = vld [vmem:[#allocation2 + $0x168] sm:$0xff] }
  0x43   : > { %681 = vmatpush.bf16.msrb.mxu1 %v3858_v38  ;;  %1289 = vmatpush.bf16.msrb.mxu0 %v3890_v39  ;;  %v771_v38 = vrot.slane %v336_v26, 1  ;;  %v342_v39 = vrot.slane %v340_v36, 7  ;;  %v361_v26 = vshrl.u32 %v4125_v56, 16 }
  0x45   : > { %903 = vmatpush.bf16.msrb.mxu2 %v3873_v40  ;;  %v343_v40 = vshll.u32 %v4080_v10, 16 }
  0x46   : > { %1103 = vmatpush.bf16.msrb.mxu3 %v3881_v41  ;;  %v3925_v41 = vld [vmem:[#allocation2 + $0x228] sm:$0xff] }
  0x47   : > { %682 = vmatpush.bf16.msrb.mxu1 %v3857_v42  ;;  %1290 = vmatpush.bf16.msrb.mxu0 %v3889_v43  ;;  %v772_v42 = vor.u32 %v771_v38, %v333_v23  ;;  %v345_v43 = vor.u32 %v343_v40, %v342_v39  ;;  %v364_v38 = vshll.u32 %v4125_v56, 16 }
  0x49   : > { %904 = vmatpush.bf16.msrb.mxu2 %v3872_v44  ;;  %v4191_v44 = vsel %vm4149_vm5, %v772_v42, 0 }
  0x4a   : > { %1104 = vmatpush.bf16.msrb.mxu3 %v3880_v45  ;;  %v4195_v45 = vsel %vm4144_vm4, 0, %v345_v43 }
  0x4b   : > { %683 = vmatpush.bf16.msrb.mxu1 %v3856_v46  ;;  %1291 = vmatpush.bf16.msrb.mxu0 %v3888_v47  ;;  %v347_v46 = vshrl.u32 %v4093_v30, 16  ;;  %v773_v47 = vrot.slane %v343_v40, 1 }
  0x4c   : > { %577 = vmatmul.bf16.gmra.mxu1 %v4109_v48  ;;  %597 = vmatmul.bf16.gmra.mxu2 %v4112_v49 }
  0x4d   : > { %617 = vmatmul.bf16.gmra.mxu3 %v4115_v50  ;;  %1672 = vmatpush.bf16.msra.mxu2 %v3911_v52  ;;  %v349_v52 = vrot.slane %v347_v46, 7 }
  0x4e   : > { %557 = vmatmul.bf16.gmra.mxu0 %v4118_v51  ;;  %1859 = vmatpush.bf16.msra.mxu3 %v3919_v53  ;;  %v350_v53 = vshll.u32 %v4093_v30, 16 }
  0x4f   : > { %1474 = vmatpush.bf16.msra.mxu1 %v3903_v54  ;;  %2049 = vmatpush.bf16.msra.mxu0 %v3927_v55  ;;  %v774_v54 = vor.u32 %v773_v47, %v340_v36 }
  0x50   : > { %v352_v55 = vor.u32 %v350_v53, %v349_v52  ;;  %v3907_v52 = vld [vmem:[#allocation2 + $0x198] sm:$0xff] }
  0x51   : > { %1673 = vmatpush.bf16.msra.mxu2 %v3910_v7  ;;  %v4207_v61 = vsel %vm4149_vm5, %v774_v54, 0  ;;  %v368_v54 = vshrl.u32 %v4083_v11, 16 }
  0x52   : > { %1860 = vmatpush.bf16.msra.mxu3 %v3918_v8  ;;  %v4213_v63 = vsel %vm4144_vm4, 0, %v352_v55  ;;  %v775_v8 = vrot.slane %v350_v53, 1  ;;  %v3915_v53 = vld [vmem:[#allocation2 + $0x1d8] sm:$0xff] }
  0x53   : > { %1475 = vmatpush.bf16.msra.mxu1 %v3902_v9  ;;  %2050 = vmatpush.bf16.msra.mxu0 %v3926_v14  ;;  %v357_v14 = vshll.u32 %v4109_v48, 16 }
  0x54   : > { %v776_v15 = vor.u32 %v775_v8, %v347_v46  ;;  %v370_v8 = vrot.slane %v368_v54, 7 }
  0x55   : > { %1674 = vmatpush.bf16.msra.mxu2 %v3909_v34  ;;  %v359_v16 = vor.u32 %v357_v14, %v356_v13  ;;  %v371_v13 = vshll.u32 %v4083_v11, 16 }
  0x56   : > { %1861 = vmatpush.bf16.msra.mxu3 %v3917_v35  ;;  %v4237_v23 = vsel %vm4149_vm5, %v776_v15, 0  ;;  %v777_v35 = vrot.slane %v357_v14, 1  ;;  %v3899_v14 = vld [vmem:[#allocation2 + $0x158] sm:$0xff] }
  0x57   : > { %1476 = vmatpush.bf16.msra.mxu1 %v3901_v37  ;;  %2051 = vmatpush.bf16.msra.mxu0 %v3925_v41  ;;  %v4243_v25 = vsel %vm4144_vm4, 0, %v359_v16  ;;  %v363_v37 = vrot.slane %v361_v26, 7  ;;  %v373_v15 = vor.u32 %v371_v13, %v370_v8  ;;  %v781_v8 = vrot.slane %v371_v13, 1 }
  0x58   : > { %4902 = vst [vmem:[#allocation7_spill] sm:$0xff] %v4243_v25  ;;  %v778_v39 = vor.u32 %v777_v35, %v354_v3  ;;  %v779_v3 = vrot.slane %v364_v38, 1 }
  0x59   : > { %v366_v40 = vor.u32 %v364_v38, %v363_v37 }
  0x5a   : > { %1862 = vmatpush.bf16.msra.mxu3 %v3916_v1  ;;  %v4267_v43 = vsel %vm4149_vm5, %v778_v39, 0 }
  0x5b   : > { %4905 = vst [vmem:[#allocation10_spill] sm:$0xff] %v4267_v43  ;;  %v4273_v47 = vsel %vm4144_vm4, 0, %v366_v40  ;;  %v4303_v40 = vsel %vm4144_vm4, 0, %v373_v15  ;;  %v782_v15 = vor.u32 %v781_v8, %v368_v54  ;;  %v3906_v54 = vld [vmem:[#allocation2 + $0x190] sm:$0xff] }
  0x5c   : > { %582 = vmatmul.bf16.gmra.mxu1 %v4125_v56  ;;  %602 = vmatmul.bf16.gmra.mxu2 %v4128_v57  ;;  %4906 = vst [vmem:[#allocation11_spill] sm:$0xff] %v4273_v47  ;;  %v3914_v8 = vld [vmem:[#allocation2 + $0x1d0] sm:$0xff] }
  0x5d   : > { %622 = vmatmul.bf16.gmra.mxu3 %v4131_v58  ;;  %4910 = vst [vmem:[#allocation15_spill] sm:$0xff] %v4303_v40 }
  0x5e   : > { %562 = vmatmul.bf16.gmra.mxu0 %v4134_v59  ;;  %1863 = vmatpush.bf16.msra.mxu3 %v3915_v53 }
  0x62   : > { %1864 = vmatpush.bf16.msra.mxu3 %v3914_v8 }
  0x6c   : > { %684 = vmatmul.bf16.vlgmr.msrb.gmra.mxu1 %v442_v4  ;;  %905 = vmatmul.bf16.vlgmr.msrb.gmra.mxu2 %v816_v5 }
  0x6d   : > { %1105 = vmatmul.bf16.vlgmr.msrb.gmra.mxu3 %v443_v6 }
  0x6e   : > { %1292 = vmatmul.bf16.vlgmr.msrb.gmra.mxu0 %v4102_v33  ;;  %v4181_v33 = vsel %vm4144_vm4, 0, %v338_v28 }
  0x7c   : > { %689 = vmatmul.bf16.gmra.mxu1 %v443_v6  ;;  %910 = vmatmul.bf16.gmra.mxu2 %v4164_v21  ;;  %v3900_v6 = vld [vmem:[#allocation2 + $0x160] sm:$0xff] }
  0x7d   : > { %1110 = vmatmul.bf16.gmra.mxu3 %v4168_v22  ;;  %1477 = vmatpush.bf16.msra.mxu1 %v3900_v6 }
  0x7e   : > { %1297 = vmatmul.bf16.gmra.mxu0 %v4118_v51 }
  0x81   : > { %1478 = vmatpush.bf16.msra.mxu1 %v3899_v14 }
  0x8c   : > { %694 = vmatmul.bf16.gmra.mxu1 %v4168_v22  ;;  %915 = vmatmul.bf16.gmra.mxu2 %v4177_v29 }
  0x8d   : > { %1115 = vmatmul.bf16.gmra.mxu3 %v4181_v33 }
  0x8e   : > { %1302 = vmatmul.bf16.gmra.mxu0 %v4134_v59 }
  0x9c   : > { %699 = vmatmul.bf16.gmra.mxu1 %v4181_v33  ;;  %920 = vmatmul.bf16.gmra.mxu2 %v4191_v44 }
  0x9d   : > { %1120 = vmatmul.bf16.gmra.mxu3 %v4195_v45 }
  0x9e   : > { %1307 = vmatmul.bf16.gmra.mxu0 %v4080_v10  ;;  %v3908_v10 = vld [vmem:[#allocation2 + $0x1a0] sm:$0xff] }
  0x9f   : > { %1675 = vmatpush.bf16.msra.mxu2 %v3908_v10 }
  0xa3   : > { %1676 = vmatpush.bf16.msra.mxu2 %v3907_v52 }
  0xa7   : > { %1677 = vmatpush.bf16.msra.mxu2 %v3906_v54 }
  0xa9   : > { %v4203_v60 = vpop.f32.mrf.mxu1 }
  0xab   : > { %v4209_v62 = vpop.f32.mrf.mxu0 }
  0xac   : > { %704 = vmatmul.bf16.gmra.mxu1 %v4195_v45  ;;  %925 = vmatmul.bf16.gmra.mxu2 %v4207_v61 }
  0xad   : > { %1125 = vmatmul.bf16.gmra.mxu3 %v4213_v63 }
  0xae   : > { %1312 = vmatmul.bf16.gmra.mxu0 %v4093_v30  ;;  %v3924_v30 = vld [vmem:[#allocation2 + $0x220] sm:$0xff] }
  0xaf   : > { %v4220_v4 = vpop.f32.mrf.mxu2  ;;  %2052 = vmatpush.bf16.msra.mxu0 %v3924_v30  ;;  %v780_v30 = vor.u32 %v779_v3, %v361_v26  ;;  %v375_v26 = vshrl.u32 %v4096_v31, 16 }
  0xb0   : > { %v4222_v5 = vpop.f32.mrf.mxu3 }
  0xb1   : > { %4900 = vst [vmem:[#allocation5_spill] sm:$0xff] %v4222_v5  ;;  %v4224_v7 = vpop.f32.mrf.mxu1  ;;  %v4297_v38 = vsel %vm4149_vm5, %v780_v30, 0  ;;  %v378_v30 = vshll.u32 %v4096_v31, 16  ;;  %v3898_v5 = vld [vmem:[#allocation2 + $0x150] sm:$0xff] }
  0xb2   : > { %4909 = vst [vmem:[#allocation14_spill] sm:$0xff] %v4297_v38  ;;  %1479 = vmatpush.bf16.msra.mxu1 %v3898_v5 }
  0xb3   : > { %v4226_v9 = vpop.f32.mrf.mxu0 }
  0xb7   : > { %v4229_v18 = vpop.f32.mrf.mxu2 }
  0xb8   : > { %v4231_v19 = vpop.f32.mrf.mxu3 }
  0xb9   : > { %4901 = vst [vmem:[#allocation6_spill] sm:$0xff] %v4231_v19  ;;  %v4233_v20 = vpop.f32.mrf.mxu1  ;;  %v385_v19 = vshll.u32 %v4112_v49, 16 }
  0xbb   : > { %v4239_v24 = vpop.f32.mrf.mxu0 }
  0xbc   : > { %709 = vmatmul.bf16.gmra.mxu1 %v4213_v63  ;;  %930 = vmatmul.bf16.gmra.mxu2 %v4237_v23 }
  0xbd   : > { %1130 = vmatmul.bf16.gmra.mxu3 %v4243_v25 }
  0xbe   : > { %1317 = vmatmul.bf16.gmra.mxu0 %v4109_v48 }
  0xbf   : > { %v4250_v27 = vpop.f32.mrf.mxu2 }
  0xc0   : > { %v4252_v28 = vpop.f32.mrf.mxu3 }
  0xc1   : > { %4903 = vst [vmem:[#allocation8_spill] sm:$0xff] %v4252_v28  ;;  %v4254_v34 = vpop.f32.mrf.mxu1 }
  0xc3   : > { %v4256_v36 = vpop.f32.mrf.mxu0 }
  0xc7   : > { %v4259_v41 = vpop.f32.mrf.mxu2 }
  0xc8   : > { %v4261_v42 = vpop.f32.mrf.mxu3 }
  0xc9   : > { %4904 = vst [vmem:[#allocation9_spill] sm:$0xff] %v4261_v42  ;;  %v4263_v48 = vpop.f32.mrf.mxu1  ;;  %v4325_v42 = vsel %vm4149_vm5, %v782_v15, 0 }
  0xca   : > { %4914 = vst [vmem:[#allocation19_spill] sm:$0xff] %v4325_v42 }
  0xcb   : > { %v4269_v46 = vpop.f32.mrf.mxu0 }
  0xcc   : > { %714 = vmatmul.bf16.gmra.mxu1 %v4243_v25  ;;  %935 = vmatmul.bf16.gmra.mxu2 %v4267_v43 }
  0xcd   : > { %1135 = vmatmul.bf16.gmra.mxu3 %v4273_v47 }
  0xce   : > { %1322 = vmatmul.bf16.gmra.mxu0 %v4125_v56  ;;  %v3923_v56 = vld [vmem:[#allocation2 + $0x218] sm:$0xff] }
  0xcf   : > { %v4280_v55 = vpop.f32.mrf.mxu2  ;;  %2053 = vmatpush.bf16.msra.mxu0 %v3923_v56  ;;  %v377_v56 = vrot.slane %v375_v26, 7 }
  0xd0   : > { %v4282_v10 = vpop.f32.mrf.mxu3 }
  0xd1   : > { %4907 = vst [vmem:[#allocation12_spill] sm:$0xff] %v4282_v10  ;;  %v4284_v1 = vpop.f32.mrf.mxu1  ;;  %v380_v17 = vor.u32 %v378_v30, %v377_v56  ;;  %v382_v56 = vshrl.u32 %v4112_v49, 16 }
  0xd3   : > { %v4286_v6 = vpop.f32.mrf.mxu0  ;;  %v4330_v13 = vsel %vm4144_vm4, 0, %v380_v17  ;;  %v783_v17 = vrot.slane %v378_v30, 1 }
  0xd5   : > { %v784_v25 = vor.u32 %v783_v17, %v375_v26 }
  0xd7   : > { %v4289_v16 = vpop.f32.mrf.mxu2  ;;  %v4343_v30 = vsel %vm4149_vm5, %v784_v25, 0  ;;  %v389_v25 = vshrl.u32 %v4128_v57, 16 }
  0xd8   : > { %v4291_v35 = vpop.f32.mrf.mxu3 }
  0xd9   : > { %4908 = vst [vmem:[#allocation13_spill] sm:$0xff] %v4291_v35  ;;  %v4293_v37 = vpop.f32.mrf.mxu1 }
  0xdb   : > { %v4299_v39 = vpop.f32.mrf.mxu0 }
  0xdc   : > { %719 = vmatmul.bf16.gmra.mxu1 %v4273_v47  ;;  %940 = vmatmul.bf16.gmra.mxu2 %v4297_v38 }
  0xdd   : > { %1140 = vmatmul.bf16.gmra.mxu3 %v4303_v40 }
  0xde   : > { %1327 = vmatmul.bf16.gmra.mxu0 %v4083_v11 }
  0xdf   : > { %v4310_v52 = vpop.f32.mrf.mxu2 }
  0xe0   : > { %v4312_v53 = vpop.f32.mrf.mxu3 }
  0xe1   : > { %4911 = vst [vmem:[#allocation16_spill] sm:$0xff] %v4312_v53  ;;  %v4314_v3 = vpop.f32.mrf.mxu1 }
  0xe3   : > { %v4316_v14 = vpop.f32.mrf.mxu0 }
  0xe7   : > { %v4319_v35 = vpop.f32.mrf.mxu2 }
  0xe8   : > { %4912 = vst [vmem:[#allocation17_spill] sm:$0xff] %v4319_v35  ;;  %v4321_v10 = vpop.f32.mrf.mxu3 }
  0xe9   : > { %4913 = vst [vmem:[#allocation18_spill] sm:$0xff] %v4321_v10  ;;  %v685_v11 = vpop.f32.mrf.mxu1 }
  0xea   : > { %v686_v53 = vadd.f32 %v685_v11, %v4209_v62 }
  0xeb   : > { %v1293_v28 = vpop.f32.mrf.mxu0 }
  0xec   : > { %724 = vmatmul.bf16.gmra.mxu1 %v4303_v40  ;;  %945 = vmatmul.bf16.gmra.mxu2 %v4325_v42  ;;  %v384_v42 = vrot.slane %v382_v56, 7 }
  0xed   : > { %1145 = vmatmul.bf16.gmra.mxu3 %v4330_v13 }
  0xee   : > { %1332 = vmatmul.bf16.gmra.mxu0 %v4096_v31  ;;  %v3922_v31 = vld [vmem:[#allocation2 + $0x210] sm:$0xff]  ;;  %v387_v54 = vor.u32 %v385_v19, %v384_v42 }
  0xef   : > { %v906_v15 = vpop.f32.mrf.mxu2  ;;  %2054 = vmatpush.bf16.msra.mxu0 %v3922_v31  ;;  %v391_v31 = vrot.slane %v389_v25, 7 }
  0xf0   : > { %v986_v62 = vadd.f32 %v906_v15, %v686_v53  ;;  %v1106_v11 = vpop.f32.mrf.mxu3  ;;  %v4348_v5 = vsel %vm4144_vm4, 0, %v387_v54  ;;  %v392_v54 = vshll.u32 %v4128_v57, 16 }
  0xf1   : > { %v687_v10 = vpop.f32.mrf.mxu1 }
  0xf2   : > { %v1186_v38 = vadd.f32 %v1106_v11, %v986_v62  ;;  %v688_v40 = vadd.f32 %v687_v10, %v4226_v9 }
  0xf3   : > { %v1295_v47 = vpop.f32.mrf.mxu0 }
  0xf4   : > { %v4339_v43 = vadd.f32 %v1293_v28, %v1186_v38 }
  0xf7   : > { %v908_v8 = vpop.f32.mrf.mxu2 }
  0xf8   : > { %v987_v53 = vadd.f32 %v908_v8, %v688_v40  ;;  %v1108_v15 = vpop.f32.mrf.mxu3  ;;  %v785_v40 = vrot.slane %v385_v19, 1 }
  0xf9   : > { %v690_v35 = vpop.f32.mrf.mxu1 }
  0xfa   : > { %v1187_v9 = vadd.f32 %v1108_v15, %v987_v53  ;;  %v691_v10 = vadd.f32 %v690_v35, %v4239_v24  ;;  %v786_v8 = vor.u32 %v785_v40, %v382_v56  ;;  %v394_v53 = vor.u32 %v392_v54, %v391_v31 }
  0xfb   : > { %v1298_v62 = vpop.f32.mrf.mxu0 }
  0xfc   : > { %729 = vmatmul.bf16.gmra.mxu1 %v4330_v13  ;;  %950 = vmatmul.bf16.gmra.mxu2 %v4343_v30  ;;  %v4352_v28 = vadd.f32 %v1295_v47, %v1187_v9 }
  0xfd   : > { %1150 = vmatmul.bf16.gmra.mxu3 %v4348_v5 }
  0xfe   : > { %4915 = vst [vmem:[#allocation20_spill] sm:$0xff] %v4352_v28  ;;  %1337 = vmatmul.bf16.gmra.mxu0 %v4112_v49 }
  0xff   : > { %v911_v42 = vpop.f32.mrf.mxu2 }
 0x100   : > { %v988_v38 = vadd.f32 %v911_v42, %v691_v10  ;;  %v1111_v24 = vpop.f32.mrf.mxu3  ;;  %v4363_v10 = vsel %vm4149_vm5, %v786_v8, 0 }
 0x101   : > { %v692_v35 = vpop.f32.mrf.mxu1 }
 0x102   : > { %v1188_v26 = vadd.f32 %v1111_v24, %v988_v38  ;;  %v693_v11 = vadd.f32 %v692_v35, %v4256_v36  ;;  %v4368_v38 = vsel %vm4144_vm4, 0, %v394_v53  ;;  %v3913_v24 = vld [vmem:[#allocation2 + $0x1c8] sm:$0xff]  ;;  %v396_v35 = vshrl.u32 %v4086_v12, 16 }
 0x103   : > { %v1300_v17 = vpop.f32.mrf.mxu0  ;;  %1865 = vmatpush.bf16.msra.mxu3 %v3913_v24 }
 0x104   : > { %v4359_v47 = vadd.f32 %v1298_v62, %v1188_v26  ;;  %v3905_v62 = vld [vmem:[#allocation2 + $0x188] sm:$0xff]  ;;  %v398_v53 = vrot.slane %v396_v35, 7 }
 0x105   : > { %1678 = vmatpush.bf16.msra.mxu2 %v3905_v62 }
 0x107   : > { %v913_v15 = vpop.f32.mrf.mxu2 }
 0x108   : > { %v989_v49 = vadd.f32 %v913_v15, %v693_v11  ;;  %v1113_v9 = vpop.f32.mrf.mxu3  ;;  %v787_v11 = vrot.slane %v392_v54, 1  ;;  %v399_v15 = vshll.u32 %v4086_v12, 16 }
 0x109   : > { %v695_v28 = vpop.f32.mrf.mxu1 }
 0x10a   : > { %v1189_v19 = vadd.f32 %v1113_v9, %v989_v49  ;;  %v696_v42 = vadd.f32 %v695_v28, %v4269_v46  ;;  %v3897_v49 = vld [vmem:[#allocation2 + $0x148] sm:$0xff]  ;;  %v401_v62 = vor.u32 %v399_v15, %v398_v53 }
 0x10b   : > { %v1303_v36 = vpop.f32.mrf.mxu0  ;;  %1480 = vmatpush.bf16.msra.mxu1 %v3897_v49 }
 0x10c   : > { %734 = vmatmul.bf16.gmra.mxu1 %v4348_v5  ;;  %955 = vmatmul.bf16.gmra.mxu2 %v4363_v10  ;;  %v4372_v56 = vadd.f32 %v1300_v17, %v1189_v19  ;;  %v788_v19 = vor.u32 %v787_v11, %v389_v25 }
 0x10d   : > { %1155 = vmatmul.bf16.gmra.mxu3 %v4368_v38 }
 0x10e   : > { %4916 = vst [vmem:[#allocation21_spill] sm:$0xff] %v4372_v56  ;;  %1342 = vmatmul.bf16.gmra.mxu0 %v4128_v57  ;;  %v3921_v57 = vld [vmem:[#allocation2 + $0x208] sm:$0xff]  ;;  %v4383_v54 = vsel %vm4149_vm5, %v788_v19, 0 }
 0x10f   : > { %v916_v46 = vpop.f32.mrf.mxu2  ;;  %2055 = vmatpush.bf16.msra.mxu0 %v3921_v57 }
 0x110   : > { %v990_v28 = vadd.f32 %v916_v46, %v696_v42  ;;  %v1116_v40 = vpop.f32.mrf.mxu3 }
 0x111   : > { %v697_v26 = vpop.f32.mrf.mxu1 }
 0x112   : > { %v1190_v31 = vadd.f32 %v1116_v40, %v990_v28  ;;  %v698_v8 = vadd.f32 %v697_v26, %v4286_v6  ;;  %v4388_v26 = vsel %vm4144_vm4, 0, %v401_v62  ;;  %v406_v62 = vshll.u32 %v4099_v32, 16 }
 0x113   : > { %v1305_v17 = vpop.f32.mrf.mxu0 }
 0x114   : > { %v4379_v9 = vadd.f32 %v1303_v36, %v1190_v31  ;;  %v403_v36 = vshrl.u32 %v4099_v32, 16 }
 0x116   : > { %v405_v19 = vrot.slane %v403_v36, 7 }
 0x117   : > { %v918_v24 = vpop.f32.mrf.mxu2 }
 0x118   : > { %v991_v42 = vadd.f32 %v918_v24, %v698_v8  ;;  %v1118_v46 = vpop.f32.mrf.mxu3  ;;  %v789_v8 = vrot.slane %v399_v15, 1 }
 0x119   : > { %v700_v56 = vpop.f32.mrf.mxu1 }
 0x11a   : > { %v1191_v6 = vadd.f32 %v1118_v46, %v991_v42  ;;  %v701_v28 = vadd.f32 %v700_v56, %v4299_v39  ;;  %v790_v24 = vor.u32 %v789_v8, %v396_v35  ;;  %v408_v42 = vor.u32 %v406_v62, %v405_v19 }
 0x11b   : > { %v1308_v40 = vpop.f32.mrf.mxu0 }
 0x11c   : > { %739 = vmatmul.bf16.gmra.mxu1 %v4368_v38  ;;  %960 = vmatmul.bf16.gmra.mxu2 %v4383_v54  ;;  %v4392_v25 = vadd.f32 %v1305_v17, %v1191_v6 }
 0x11d   : > { %1160 = vmatmul.bf16.gmra.mxu3 %v4388_v26 }
 0x11e   : > { %4917 = vst [vmem:[#allocation22_spill] sm:$0xff] %v4392_v25  ;;  %1347 = vmatmul.bf16.gmra.mxu0 %v4086_v12 }
 0x11f   : > { %v921_v11 = vpop.f32.mrf.mxu2 }
 0x120   : > { %v992_v31 = vadd.f32 %v921_v11, %v701_v28  ;;  %v1121_v39 = vpop.f32.mrf.mxu3  ;;  %v4403_v28 = vsel %vm4149_vm5, %v790_v24, 0  ;;  %v791_v24 = vrot.slane %v406_v62, 1 }
 0x121   : > { %v702_v56 = vpop.f32.mrf.mxu1 }
 0x122   : > { %v1192_v53 = vadd.f32 %v1121_v39, %v992_v31  ;;  %v703_v49 = vadd.f32 %v702_v56, %v4316_v14  ;;  %v4407_v14 = vsel %vm4144_vm4, 0, %v408_v42  ;;  %v3912_v31 = vld [vmem:[#allocation2 + $0x1c0] sm:$0xff]  ;;  %v410_v56 = vshrl.u32 %v4115_v50, 16 }
 0x123   : > { %v1310_v57 = vpop.f32.mrf.mxu0  ;;  %1866 = vmatpush.bf16.msra.mxu3 %v3912_v31 }
 0x124   : > { %v4399_v17 = vadd.f32 %v1308_v40, %v1192_v53  ;;  %v3904_v40 = vld [vmem:[#allocation2 + $0x180] sm:$0xff] }
 0x125   : > { %1679 = vmatpush.bf16.msra.mxu2 %v3904_v40 }
 0x127   : > { %v923_v46 = vpop.f32.mrf.mxu2 }
 0x128   : > { %v993_v12 = vadd.f32 %v923_v46, %v703_v49  ;;  %v1123_v6 = vpop.f32.mrf.mxu3  ;;  %v412_v46 = vrot.slane %v410_v56, 7 }
 0x129   : > { %v705_v25 = vpop.f32.mrf.mxu1 }
 0x12a   : > { %v1193_v15 = vadd.f32 %v1123_v6, %v993_v12  ;;  %v706_v39 = vadd.f32 %v705_v25, %v4203_v60  ;;  %v413_v12 = vshll.u32 %v4115_v50, 16  ;;  %v3896_v6 = vld [vmem:[#allocation2 + $0x140] sm:$0xff]  ;;  %v792_v60 = vor.u32 %v791_v24, %v403_v36 }
 0x12b   : > { %v1313_v11 = vpop.f32.mrf.mxu0  ;;  %1481 = vmatpush.bf16.msra.mxu1 %v3896_v6 }
 0x12c   : > { %744 = vmatmul.bf16.gmra.mxu1 %v4388_v26  ;;  %965 = vmatmul.bf16.gmra.mxu2 %v4403_v28  ;;  %v4411_v35 = vadd.f32 %v1310_v57, %v1193_v15  ;;  %v415_v40 = vor.u32 %v413_v12, %v412_v46  ;;  %v4423_v62 = vsel %vm4149_vm5, %v792_v60, 0 }
 0x12d   : > { %1165 = vmatmul.bf16.gmra.mxu3 %v4407_v14 }
 0x12e   : > { %4918 = vst [vmem:[#allocation23_spill] sm:$0xff] %v4411_v35  ;;  %1352 = vmatmul.bf16.gmra.mxu0 %v4099_v32  ;;  %v3920_v32 = vld [vmem:[#allocation2 + $0x200] sm:$0xff]  ;;  %v4427_v6 = vsel %vm4144_vm4, 0, %v415_v40 }
 0x12f   : > { %v926_v8 = vpop.f32.mrf.mxu2  ;;  %2056 = vmatpush.bf16.msra.mxu0 %v3920_v32  ;;  %v793_v32 = vrot.slane %v413_v12, 1 }
 0x130   : > { %v994_v53 = vadd.f32 %v926_v8, %v706_v39  ;;  %v1126_v49 = vpop.f32.mrf.mxu3 }
 0x131   : > { %v707_v19 = vpop.f32.mrf.mxu1 }
 0x132   : > { %v1194_v42 = vadd.f32 %v1126_v49, %v994_v53  ;;  %v708_v25 = vadd.f32 %v707_v19, %v4224_v7 }
 0x133   : > { %v1315_v57 = vpop.f32.mrf.mxu0 }
 0x134   : > { %v4418_v15 = vadd.f32 %v1313_v11, %v1194_v42  ;;  %v417_v11 = vshrl.u32 %v4131_v58, 16 }
 0x136   : > { %v419_v40 = vrot.slane %v417_v11, 7 }
 0x137   : > { %v928_v31 = vpop.f32.mrf.mxu2 }
 0x138   : > { %v995_v39 = vadd.f32 %v928_v31, %v708_v25  ;;  %v1128_v8 = vpop.f32.mrf.mxu3 }
 0x139   : > { %v710_v35 = vpop.f32.mrf.mxu1 }
 0x13a   : > { %v1195_v53 = vadd.f32 %v1128_v8, %v995_v39  ;;  %v711_v36 = vadd.f32 %v710_v35, %v4233_v20  ;;  %v794_v39 = vor.u32 %v793_v32, %v410_v56 }
 0x13b   : > { %v1318_v49 = vpop.f32.mrf.mxu0 }
 0x13c   : > { %749 = vmatmul.bf16.gmra.mxu1 %v4407_v14  ;;  %970 = vmatmul.bf16.gmra.mxu2 %v4423_v62  ;;  %v4431_v7 = vadd.f32 %v1315_v57, %v1195_v53  ;;  %v420_v57 = vshll.u32 %v4131_v58, 16 }
 0x13d   : > { %1170 = vmatmul.bf16.gmra.mxu3 %v4427_v6 }
 0x13e   : > { %4919 = vst [vmem:[#allocation24_spill] sm:$0xff] %v4431_v7  ;;  %1357 = vmatmul.bf16.gmra.mxu0 %v4115_v50  ;;  %v422_v8 = vor.u32 %v420_v57, %v419_v40 }
 0x13f   : > { %v931_v19 = vpop.f32.mrf.mxu2 }
 0x140   : > { %v996_v24 = vadd.f32 %v931_v19, %v711_v36  ;;  %v1131_v42 = vpop.f32.mrf.mxu3  ;;  %v4443_v36 = vsel %vm4149_vm5, %v794_v39, 0  ;;  %v795_v39 = vrot.slane %v420_v57, 1 }
 0x141   : > { %v712_v46 = vpop.f32.mrf.mxu1 }
 0x142   : > { %v1196_v60 = vadd.f32 %v1131_v42, %v996_v24  ;;  %v713_v50 = vadd.f32 %v712_v46, %v4254_v34  ;;  %v4447_v24 = vsel %vm4144_vm4, 0, %v422_v8 }
 0x143   : > { %v1320_v25 = vpop.f32.mrf.mxu0 }
 0x144   : > { %v4438_v31 = vadd.f32 %v1318_v49, %v1196_v60  ;;  %v4450_v49 = vld [vmem:[%s4077_s24 + $0x78] sm:$0xff] }
 0x145   : > { %v4894_v42 = vshrl.u32 %v4450_v49, 16 }
 0x147   : > { %v933_v20 = vpop.f32.mrf.mxu2 }
 0x148   : > { %v997_v35 = vadd.f32 %v933_v20, %v713_v50  ;;  %v1133_v53 = vpop.f32.mrf.mxu3  ;;  %v1026_v20 = vrot.slane %v4894_v42, 7 }
 0x149   : > { %v715_v7 = vpop.f32.mrf.mxu1 }
 0x14a   : > { %v1197_v12 = vadd.f32 %v1133_v53, %v997_v35  ;;  %v716_v56 = vadd.f32 %v715_v7, %v4263_v48  ;;  %v796_v53 = vor.u32 %v795_v39, %v417_v11 }
 0x14b   : > { %v1323_v19 = vpop.f32.mrf.mxu0 }
 0x14c   : > { %754 = vmatmul.bf16.gmra.mxu1 %v4427_v6  ;;  %975 = vmatmul.bf16.gmra.mxu2 %v4443_v36  ;;  %v4454_v34 = vadd.f32 %v1320_v25, %v1197_v12  ;;  %v4895_v25 = vshll.u32 %v4450_v49, 16  ;;  %v4470_v57 = vsel %vm4149_vm5, %v796_v53, 0 }
 0x14d   : > { %1175 = vmatmul.bf16.gmra.mxu3 %v4447_v24 }
 0x14e   : > { %1362 = vmatmul.bf16.gmra.mxu0 %v4131_v58  ;;  %v1029_v48 = vor.u32 %v4895_v25, %v1026_v20 }
 0x14f   : > { %v936_v46 = vpop.f32.mrf.mxu2 }
 0x150   : > { %v998_v32 = vadd.f32 %v936_v46, %v716_v56  ;;  %v1136_v60 = vpop.f32.mrf.mxu3 }
 0x151   : > { %v717_v40 = vpop.f32.mrf.mxu1 }
 0x152   : > { %v1198_v50 = vadd.f32 %v1136_v60, %v998_v32  ;;  %v718_v58 = vadd.f32 %v717_v40, %v4284_v1 }
 0x153   : > { %v1325_v8 = vpop.f32.mrf.mxu0 }
 0x154   : > { %v4463_v35 = vadd.f32 %v1323_v19, %v1198_v50  ;;  %v4474_v19 = vsel %vm4144_vm4, 0, %v1029_v48 }
 0x157   : > { %v938_v7 = vpop.f32.mrf.mxu2 }
 0x158   : > { %v999_v12 = vadd.f32 %v938_v7, %v718_v58  ;;  %v1138_v56 = vpop.f32.mrf.mxu3 }
 0x159   : > { %v720_v46 = vpop.f32.mrf.mxu1 }
 0x15a   : > { %v1199_v32 = vadd.f32 %v1138_v56, %v999_v12  ;;  %v721_v11 = vadd.f32 %v720_v46, %v4293_v37 }
 0x15b   : > { %v1328_v60 = vpop.f32.mrf.mxu0 }
 0x15c   : > { %759 = vmatmul.bf16.gmra.mxu1 %v4447_v24  ;;  %980 = vmatmul.bf16.gmra.mxu2 %v4470_v57  ;;  %v4478_v1 = vadd.f32 %v1325_v8, %v1199_v32 }
 0x15d   : > { %1180 = vmatmul.bf16.gmra.mxu3 %v4474_v19 }
 0x15e   : > { %1367 = vmatmul.bf16.gmra.mxu0 %v4450_v49 }
 0x15f   : > { %v941_v40 = vpop.f32.mrf.mxu2 }
 0x160   : > { %v1000_v39 = vadd.f32 %v941_v40, %v721_v11  ;;  %v1141_v50 = vpop.f32.mrf.mxu3 }
 0x161   : > { %v722_v20 = vpop.f32.mrf.mxu1 }
 0x162   : > { %v1200_v53 = vadd.f32 %v1141_v50, %v1000_v39  ;;  %v723_v7 = vadd.f32 %v722_v20, %v4314_v3 }
 0x163   : > { %v1330_v58 = vpop.f32.mrf.mxu0 }
 0x164   : > { %v4483_v48 = vadd.f32 %v1328_v60, %v1200_v53 }
 0x167   : > { %v943_v12 = vpop.f32.mrf.mxu2 }
 0x168   : > { %v1001_v56 = vadd.f32 %v943_v12, %v723_v7  ;;  %v1143_v8 = vpop.f32.mrf.mxu3 }
 0x169   : > { %v725_v32 = vpop.f32.mrf.mxu1 }
 0x16a   : > { %v1201_v42 = vadd.f32 %v1143_v8, %v1001_v56  ;;  %v726_v46 = vadd.f32 %v725_v32, %v4220_v4 }
 0x16b   : > { %v1333_v25 = vpop.f32.mrf.mxu0 }
 0x16c   : > { %1482 = vmatmul.bf16.vlgmr.msra.gmra.mxu1 %v4164_v21  ;;  %1680 = vmatmul.bf16.vlgmr.msra.gmra.mxu2 %v4168_v22  ;;  %v4488_v37 = vadd.f32 %v1330_v58, %v1201_v42 }
 0x16d   : > { %1867 = vmatmul.bf16.vlgmr.msra.gmra.mxu3 %v4118_v51 }
 0x16e   : > { %2057 = vmatmul.bf16.vlgmr.msra.gmra.mxu0 %v4177_v29 }
 0x16f   : > { %v946_v60 = vpop.f32.mrf.mxu2 }
 0x170   : > { %v1002_v3 = vadd.f32 %v946_v60, %v726_v46  ;;  %v1146_v11 = vpop.f32.mrf.mxu3 }
 0x171   : > { %v727_v40 = vpop.f32.mrf.mxu1 }
 0x172   : > { %v1202_v39 = vadd.f32 %v1146_v11, %v1002_v3  ;;  %v728_v21 = vadd.f32 %v727_v40, %v4229_v18 }
 0x173   : > { %v1335_v50 = vpop.f32.mrf.mxu0 }
 0x174   : > { %v4493_v20 = vadd.f32 %v1333_v25, %v1202_v39 }
 0x177   : > { %v948_v53 = vpop.f32.mrf.mxu2 }
 0x178   : > { %v1003_v22 = vadd.f32 %v948_v53, %v728_v21  ;;  %v1148_v42 = vpop.f32.mrf.mxu3 }
 0x179   : > { %v730_v58 = vpop.f32.mrf.mxu1 }
 0x17a   : > { %v1203_v7 = vadd.f32 %v1148_v42, %v1003_v22  ;;  %v731_v25 = vadd.f32 %v730_v58, %v4250_v27 }
 0x17b   : > { %v1338_v51 = vpop.f32.mrf.mxu0 }
 0x17c   : > { %1487 = vmatmul.bf16.gmra.mxu1 %v4177_v29  ;;  %1685 = vmatmul.bf16.gmra.mxu2 %v4181_v33  ;;  %v4498_v4 = vadd.f32 %v1335_v50, %v1203_v7  ;;  %v3975_v50 = vld [vmem:[%s4077_s24 + $0x18] sm:$0xff] }
 0x17d   : > { %1872 = vmatmul.bf16.gmra.mxu3 %v4134_v59 }
 0x17e   : > { %2062 = vmatmul.bf16.gmra.mxu0 %v4191_v44 }
 0x17f   : > { %v951_v12 = vpop.f32.mrf.mxu2 }
 0x180   : > { %v1004_v18 = vadd.f32 %v951_v12, %v731_v25  ;;  %v1151_v56 = vpop.f32.mrf.mxu3 }
 0x181   : > { %v732_v8 = vpop.f32.mrf.mxu1 }
 0x182   : > { %v1204_v32 = vadd.f32 %v1151_v56, %v1004_v18  ;;  %v733_v29 = vadd.f32 %v732_v8, %v4259_v41 }
 0x183   : > { %v1340_v46 = vpop.f32.mrf.mxu0 }
 0x184   : > { %v4503_v60 = vadd.f32 %v1338_v51, %v1204_v32  ;;  %v3976_v32 = vld [vmem:[%s4077_s24 + $0x20] sm:$0xff] }
 0x187   : > { %v953_v33 = vpop.f32.mrf.mxu2 }
 0x188   : > { %v1005_v3 = vadd.f32 %v953_v33, %v733_v29  ;;  %v1153_v11 = vpop.f32.mrf.mxu3 }
 0x189   : > { %v735_v40 = vpop.f32.mrf.mxu1 }
 0x18a   : > { %v1205_v59 = vadd.f32 %v1153_v11, %v1005_v3  ;;  %v736_v21 = vadd.f32 %v735_v40, %v4280_v55 }
 0x18b   : > { %v1343_v39 = vpop.f32.mrf.mxu0 }
 0x18c   : > { %1492 = vmatmul.bf16.gmra.mxu1 %v4191_v44  ;;  %1690 = vmatmul.bf16.gmra.mxu2 %v4195_v45  ;;  %v4508_v27 = vadd.f32 %v1340_v46, %v1205_v59 }
 0x18d   : > { %1877 = vmatmul.bf16.gmra.mxu3 %v3975_v50 }
 0x18e   : > { %2067 = vmatmul.bf16.gmra.mxu0 %v4207_v61 }
 0x18f   : > { %v956_v53 = vpop.f32.mrf.mxu2 }
 0x190   : > { %v1006_v41 = vadd.f32 %v956_v53, %v736_v21  ;;  %v1156_v22 = vpop.f32.mrf.mxu3 }
 0x191   : > { %v737_v42 = vpop.f32.mrf.mxu1 }
 0x192   : > { %v1206_v58 = vadd.f32 %v1156_v22, %v1006_v41  ;;  %v738_v44 = vadd.f32 %v737_v42, %v4289_v16 }
 0x193   : > { %v1345_v7 = vpop.f32.mrf.mxu0 }
 0x194   : > { %v4513_v51 = vadd.f32 %v1343_v39, %v1206_v58  ;;  %v3977_v58 = vld [vmem:[%s4077_s24 + $0x28] sm:$0xff] }
 0x197   : > { %v958_v45 = vpop.f32.mrf.mxu2 }
 0x198   : > { %v1007_v25 = vadd.f32 %v958_v45, %v738_v44  ;;  %v1158_v12 = vpop.f32.mrf.mxu3  ;;  %v4923_v44 = vld [vmem:[#allocation5_spill] sm:$0xff] }
 0x199   : > { %v740_v18 = vpop.f32.mrf.mxu1 }
 0x19a   : > { %v1207_v56 = vadd.f32 %v1158_v12, %v1007_v25  ;;  %v741_v46 = vadd.f32 %v740_v18, %v4310_v52  ;;  %v4921_v52 = vld [vmem:[#allocation7_spill] sm:$0xff] }
 0x19b   : > { %v1348_v8 = vpop.f32.mrf.mxu0 }
 0x19c   : > { %1497 = vmatmul.bf16.gmra.mxu1 %v4207_v61  ;;  %1695 = vmatmul.bf16.gmra.mxu2 %v4213_v63  ;;  %v4518_v55 = vadd.f32 %v1345_v7, %v1207_v56  ;;  %v4920_v61 = vld [vmem:[#allocation17_spill] sm:$0xff]  ;;  %v4922_v7 = vld [vmem:[#allocation10_spill] sm:$0xff] }
 0x19d   : > { %1882 = vmatmul.bf16.gmra.mxu3 %v3976_v32 }
 0x19e   : > { %2072 = vmatmul.bf16.gmra.mxu0 %v4237_v23 }
 0x19f   : > { %v961_v29 = vpop.f32.mrf.mxu2 }
 0x1a0   : > { %v1008_v16 = vadd.f32 %v961_v29, %v741_v46  ;;  %v1161_v33 = vpop.f32.mrf.mxu3 }
 0x1a1   : > { %v742_v3 = vpop.f32.mrf.mxu1 }
 0x1a2   : > { %v1208_v11 = vadd.f32 %v1161_v33, %v1008_v16  ;;  %v743_v39 = vadd.f32 %v742_v3, %v4920_v61 }
 0x1a3   : > { %v1350_v40 = vpop.f32.mrf.mxu0 }
 0x1a4   : > { %v4523_v59 = vadd.f32 %v1348_v8, %v1208_v11 }
 0x1a7   : > { %v963_v63 = vpop.f32.mrf.mxu2 }
 0x1a8   : > { %v1009_v50 = vadd.f32 %v963_v63, %v743_v39  ;;  %v1163_v21 = vpop.f32.mrf.mxu3  ;;  %v4925_v39 = vld [vmem:[#allocation11_spill] sm:$0xff] }
 0x1a9   : > { %v745_v53 = vpop.f32.mrf.mxu1 }
 0x1aa   : > { %v1209_v41 = vadd.f32 %v1163_v21, %v1009_v50  ;;  %v746_v45 = vadd.f32 %v745_v53, %v4923_v44  ;;  %v3978_v50 = vld [vmem:[%s4077_s24 + $0x30] sm:$0xff]  ;;  %v4926_v21 = vld [vmem:[#allocation14_spill] sm:$0xff]  ;;  %v4927_v53 = vld [vmem:[#allocation8_spill] sm:$0xff] }
 0x1ab   : > { %v1353_v22 = vpop.f32.mrf.mxu0 }
 0x1ac   : > { %1502 = vmatmul.bf16.gmra.mxu1 %v4237_v23  ;;  %1700 = vmatmul.bf16.gmra.mxu2 %v4921_v52  ;;  %v4528_v42 = vadd.f32 %v1350_v40, %v1209_v41  ;;  %v4924_v23 = vld [vmem:[#allocation6_spill] sm:$0xff] }
 0x1ad   : > { %1887 = vmatmul.bf16.gmra.mxu3 %v3977_v58 }
 0x1ae   : > { %2077 = vmatmul.bf16.gmra.mxu0 %v4922_v7 }
 0x1af   : > { %v966_v25 = vpop.f32.mrf.mxu2 }
 0x1b0   : > { %v1010_v12 = vadd.f32 %v966_v25, %v746_v45  ;;  %v1166_v18 = vpop.f32.mrf.mxu3 }
 0x1b1   : > { %v747_v56 = vpop.f32.mrf.mxu1 }
 0x1b2   : > { %v1210_v8 = vadd.f32 %v1166_v18, %v1010_v12  ;;  %v748_v29 = vadd.f32 %v747_v56, %v4924_v23 }
 0x1b3   : > { %v1355_v32 = vpop.f32.mrf.mxu0 }
 0x1b4   : > { %v4533_v46 = vadd.f32 %v1353_v22, %v1210_v8 }
 0x1b7   : > { %v968_v16 = vpop.f32.mrf.mxu2 }
 0x1b8   : > { %v1011_v33 = vadd.f32 %v968_v16, %v748_v29  ;;  %v1168_v3 = vpop.f32.mrf.mxu3 }
 0x1b9   : > { %v750_v11 = vpop.f32.mrf.mxu1 }
 0x1ba   : > { %v1211_v40 = vadd.f32 %v1168_v3, %v1011_v33  ;;  %v751_v41 = vadd.f32 %v750_v11, %v4927_v53  ;;  %v4929_v33 = vld [vmem:[#allocation15_spill] sm:$0xff]  ;;  %v3979_v11 = vld [vmem:[%s4077_s24 + $0x38] sm:$0xff] }
 0x1bb   : > { %v1358_v61 = vpop.f32.mrf.mxu0 }
 0x1bc   : > { %1507 = vmatmul.bf16.gmra.mxu1 %v4922_v7  ;;  %1705 = vmatmul.bf16.gmra.mxu2 %v4925_v39  ;;  %v4538_v63 = vadd.f32 %v1355_v32, %v1211_v40  ;;  %v4928_v7 = vld [vmem:[#allocation9_spill] sm:$0xff]  ;;  %v4931_v40 = vld [vmem:[#allocation19_spill] sm:$0xff] }
 0x1bd   : > { %1892 = vmatmul.bf16.gmra.mxu3 %v3978_v50 }
 0x1be   : > { %2082 = vmatmul.bf16.gmra.mxu0 %v4926_v21 }
 0x1bf   : > { %v971_v22 = vpop.f32.mrf.mxu2 }
 0x1c0   : > { %v1012_v52 = vadd.f32 %v971_v22, %v751_v41  ;;  %v1171_v58 = vpop.f32.mrf.mxu3 }
 0x1c1   : > { %v752_v44 = vpop.f32.mrf.mxu1 }
 0x1c2   : > { %v1212_v45 = vadd.f32 %v1171_v58, %v1012_v52  ;;  %v753_v18 = vadd.f32 %v752_v44, %v4928_v7 }
 0x1c3   : > { %v1360_v25 = vpop.f32.mrf.mxu0 }
 0x1c4   : > { %v4543_v12 = vadd.f32 %v1358_v61, %v1212_v45  ;;  %v4932_v61 = vld [vmem:[#allocation12_spill] sm:$0xff] }
 0x1c7   : > { %v973_v56 = vpop.f32.mrf.mxu2 }
 0x1c8   : > { %v1013_v8 = vadd.f32 %v973_v56, %v753_v18  ;;  %v1173_v32 = vpop.f32.mrf.mxu3 }
 0x1c9   : > { %v755_v23 = vpop.f32.mrf.mxu1 }
 0x1ca   : > { %v1213_v29 = vadd.f32 %v1173_v32, %v1013_v8  ;;  %v756_v39 = vadd.f32 %v755_v23, %v4932_v61 }
 0x1cb   : > { %v1363_v16 = vpop.f32.mrf.mxu0 }
 0x1cc   : > { %1512 = vmatmul.bf16.gmra.mxu1 %v4926_v21  ;;  %1710 = vmatmul.bf16.gmra.mxu2 %v4929_v33  ;;  %v4548_v3 = vadd.f32 %v1360_v25, %v1213_v29  ;;  %v4934_v21 = vld [vmem:[#allocation13_spill] sm:$0xff] }
 0x1cd   : > { %1897 = vmatmul.bf16.gmra.mxu3 %v3979_v11  ;;  %v3980_v29 = vld [vmem:[%s4077_s24 + $0x40] sm:$0xff] }
 0x1ce   : > { %4930 = vst [vmem:[#allocation17_spill] sm:$0xff] %v4548_v3  ;;  %2087 = vmatmul.bf16.gmra.mxu0 %v4931_v40 }
 0x1cf   : > { %v976_v50 = vpop.f32.mrf.mxu2 }
 0x1d0   : > { %v1014_v53 = vadd.f32 %v976_v50, %v756_v39  ;;  %v1176_v41 = vpop.f32.mrf.mxu3 }
 0x1d1   : > { %v757_v22 = vpop.f32.mrf.mxu1 }
 0x1d2   : > { %v1214_v52 = vadd.f32 %v1176_v41, %v1014_v53  ;;  %v758_v45 = vadd.f32 %v757_v22, %v4934_v21 }
 0x1d3   : > { %v1365_v58 = vpop.f32.mrf.mxu0 }
 0x1d4   : > { %v4553_v44 = vadd.f32 %v1363_v16, %v1214_v52  ;;  %v4936_v16 = vld [vmem:[#allocation16_spill] sm:$0xff] }
 0x1d6   : > { %4933 = vst [vmem:[#allocation7_spill] sm:$0xff] %v4553_v44 }
 0x1d7   : > { %v978_v7 = vpop.f32.mrf.mxu2 }
 0x1d8   : > { %v1015_v25 = vadd.f32 %v978_v7, %v758_v45  ;;  %v1178_v18 = vpop.f32.mrf.mxu3 }
 0x1d9   : > { %v760_v56 = vpop.f32.mrf.mxu1 }
 0x1da   : > { %v1215_v8 = vadd.f32 %v1178_v18, %v1015_v25  ;;  %v761_v33 = vadd.f32 %v760_v56, %v4936_v16  ;;  %v3981_v56 = vld [vmem:[%s4077_s24 + $0x48] sm:$0xff] }
 0x1db   : > { %v1368_v32 = vpop.f32.mrf.mxu0 }
 0x1dc   : > { %1517 = vmatmul.bf16.gmra.mxu1 %v4931_v40  ;;  %1715 = vmatmul.bf16.gmra.mxu2 %v4330_v13  ;;  %v4558_v23 = vadd.f32 %v1365_v58, %v1215_v8  ;;  %v4938_v40 = vld [vmem:[#allocation18_spill] sm:$0xff] }
 0x1dd   : > { %1902 = vmatmul.bf16.gmra.mxu3 %v3980_v29 }
 0x1de   : > { %4935 = vst [vmem:[#allocation10_spill] sm:$0xff] %v4558_v23  ;;  %2092 = vmatmul.bf16.gmra.mxu0 %v4343_v30 }
 0x1df   : > { %v981_v11 = vpop.f32.mrf.mxu2 }
 0x1e0   : > { %v1016_v61 = vadd.f32 %v981_v11, %v761_v33  ;;  %v1181_v39 = vpop.f32.mrf.mxu3 }
 0x1e1   : > { %v762_v50 = vpop.f32.mrf.mxu1 }
 0x1e2   : > { %v1216_v53 = vadd.f32 %v1181_v39, %v1016_v61  ;;  %v763_v52 = vadd.f32 %v762_v50, %v4938_v40 }
 0x1e3   : > { %v1370_v41 = vpop.f32.mrf.mxu0 }
 0x1e4   : > { %v4563_v22 = vadd.f32 %v1368_v32, %v1216_v53 }
 0x1e6   : > { %4937 = vst [vmem:[#allocation5_spill] sm:$0xff] %v4563_v22 }
 0x1e7   : > { %v983_v13 = vpop.f32.mrf.mxu2 }
 0x1e8   : > { %v1017_v58 = vadd.f32 %v983_v13, %v763_v52  ;;  %v1183_v21 = vpop.f32.mrf.mxu3  ;;  %v4940_v13 = vld [vmem:[#allocation20_spill] sm:$0xff] }
 0x1e9   : > { %v1483_v45 = vpop.f32.mrf.mxu1 }
 0x1ea   : > { %v1217_v7 = vadd.f32 %v1183_v21, %v1017_v58  ;;  %v1563_v33 = vadd.f32 %v1483_v45, %v4339_v43  ;;  %v4581_v43 = vld [vmem:[%s4882_s2] ss:$0 sm:$0xff] }
 0x1eb   : > { %v2058_v25 = vpop.f32.mrf.mxu0 }
 0x1ec   : > { %1522 = vmatmul.bf16.gmra.mxu1 %v4343_v30  ;;  %1720 = vmatmul.bf16.gmra.mxu2 %v4348_v5  ;;  %v4568_v18 = vadd.f32 %v1370_v41, %v1217_v7  ;;  %v3982_v5 = vld [vmem:[%s4077_s24 + $0x50] sm:$0xff] }
 0x1ed   : > { %1907 = vmatmul.bf16.gmra.mxu3 %v3981_v56 }
 0x1ee   : > { %4939 = vst [vmem:[#allocation6_spill] sm:$0xff] %v4568_v18  ;;  %2097 = vmatmul.bf16.gmra.mxu0 %v4363_v10 }
 0x1ef   : > { %v1681_v8 = vpop.f32.mrf.mxu2 }
 0x1f0   : > { %v1868_v32 = vpop.f32.mrf.mxu3  ;;  %v1761_v61 = vadd.f32 %v1681_v8, %v1563_v33 }
 0x1f1   : > { %v1485_v29 = vpop.f32.mrf.mxu1 }
 0x1f2   : > { %v1948_v53 = vadd.f32 %v1868_v32, %v1761_v61  ;;  %v1564_v58 = vadd.f32 %v1485_v29, %v4940_v13 }
 0x1f3   : > { %v2060_v16 = vpop.f32.mrf.mxu0 }
 0x1f4   : > { %v2138_v52 = vadd.f32 %v2058_v25, %v1948_v53  ;;  %v4941_v25 = vld [vmem:[#allocation21_spill] sm:$0xff] }
 0x1f6   : > { %v2174_v8 = vadd.f32 %v4581_v43, %v2138_v52 }
 0x1f7   : > { %v1683_v11 = vpop.f32.mrf.mxu2 }
 0x1f8   : > { %v1870_v39 = vpop.f32.mrf.mxu3  ;;  %v1762_v7 = vadd.f32 %v1683_v11, %v1564_v58  ;;  %v2206_v53 = vmax.f32 %v2174_v8, 0.0 }
 0x1f9   : > { %v1488_v50 = vpop.f32.mrf.mxu1 }
 0x1fa   : > { %v1565_v41 = vadd.f32 %v1488_v50, %v4359_v47  ;;  %v1949_v33 = vadd.f32 %v1870_v39, %v1762_v7  ;;  %v3983_v39 = vld [vmem:[%s4077_s24 + $0x58] sm:$0xff] }
 0x1fb   : > { %v2063_v30 = vpop.f32.mrf.mxu0 }
 0x1fc   : > { %1527 = vmatmul.bf16.gmra.mxu1 %v4363_v10  ;;  %1725 = vmatmul.bf16.gmra.mxu2 %v4368_v38 }
 0x1fd   : > { %1912 = vmatmul.bf16.gmra.mxu3 %v3982_v5 }
 0x1fe   : > { %2102 = vmatmul.bf16.gmra.mxu0 %v4383_v54 }
 0x1ff   : > { %v1686_v40 = vpop.f32.mrf.mxu2 }
 0x200   : > { %v1763_v21 = vadd.f32 %v1686_v40, %v1565_v41  ;;  %v1873_v45 = vpop.f32.mrf.mxu3  ;;  %v2139_v40 = vadd.f32 %v2060_v16, %v1949_v33 }
 0x201   : > { %v1490_v10 = vpop.f32.mrf.mxu1 }
 0x202   : > { %v1950_v38 = vadd.f32 %v1873_v45, %v1763_v21  ;;  %v1566_v61 = vadd.f32 %v1490_v10, %v4941_v25 }
 0x203   : > { %v2065_v56 = vpop.f32.mrf.mxu0 }
 0x204   : > { %v2140_v32 = vadd.f32 %v2063_v30, %v1950_v38  ;;  %v2175_v30 = vadd.f32 %v4581_v43, %v2139_v40 }
 0x206   : > { %v2176_v47 = vadd.f32 %v4581_v43, %v2140_v32  ;;  %v2207_v25 = vmax.f32 %v2175_v30, 0.0 }
 0x207   : > { %v1688_v50 = vpop.f32.mrf.mxu2 }
 0x208   : > { %v2208_v5 = vmax.f32 %v2176_v47, 0.0  ;;  %v1764_v18 = vadd.f32 %v1688_v50, %v1566_v61  ;;  %v1875_v29 = vpop.f32.mrf.mxu3 }
 0x209   : > { %v1493_v41 = vpop.f32.mrf.mxu1 }
 0x20a   : > { %v2302_v13 = vmax.f32 %v2206_v53, %v2208_v5  ;;  %v1951_v11 = vadd.f32 %v1875_v29, %v1764_v18  ;;  %v1567_v50 = vadd.f32 %v1493_v41, %v4379_v9 }
 0x20b   : > { %v4587_v58 = vpop.f32.mrf.mxu0 }
 0x20c   : > { %v2318_v21 = vpack.c.bf16 %v2302_v13, %v2302_v13  ;;  %v2141_v52 = vadd.f32 %v2065_v56, %v1951_v11  ;;  %1532 = vmatmul.bf16.gmra.mxu1 %v4383_v54  ;;  %1730 = vmatmul.bf16.gmra.mxu2 %v4388_v26 }
 0x20d   : > { %1917 = vmatmul.bf16.gmra.mxu3 %v3983_v39 }
 0x20e   : > { %2107 = vmatmul.bf16.gmra.mxu0 %v4403_v28  ;;  %v2350_v16 = vrot.slane %v2318_v21, 3  ;;  %v2177_v18 = vadd.f32 %v4581_v43, %v2141_v52 }
 0x20f   : > { %v1691_v45 = vpop.f32.mrf.mxu2 }
 0x210   : > { %v2369_v10 = vsel %vm439_vm0, %v2318_v21, %v2350_v16  ;;  %v2371_v7 = vsel %vm2370_vm6, %v2318_v21, %v2350_v16  ;;  %v2375_v54 = vsel %vm2374_vm7, %v2318_v21, %v2350_v16  ;;  %v2379_v26 = vsel %vm2378_vm8, %v2318_v21, %v2350_v16  ;;  %v1878_v38 = vpop.f32.mrf.mxu3 }
 0x211   : > { %v2373_v56 = vrot.slane %v2371_v7, 1  ;;  %v2377_v8 = vrot.slane %v2375_v54, 2  ;;  %v2381_v32 = vrot.slane %v2379_v26, 3  ;;  %v2626_v33 = vunpack.c.l.bf16 %v2369_v10  ;;  %v1495_v47 = vpop.f32.mrf.mxu1 }
 0x212   : > { %v2209_v61 = vmax.f32 %v2177_v18, 0.0  ;;  %v1765_v16 = vadd.f32 %v1691_v45, %v1567_v50 }
 0x213   : > { %v4600_v53 = vpop.f32.mrf.mxu0  ;;  %v2627_v5 = vunpack.c.l.bf16 %v2373_v56  ;;  %v2628_v29 = vunpack.c.l.bf16 %v2377_v8  ;;  %v2629_v40 = vunpack.c.l.bf16 %v2381_v32  ;;  %v3772_v13 = vrot.slane %v2626_v33, 9 }
 0x214   : > { %v2303_v11 = vmax.f32 %v2207_v25, %v2209_v61  ;;  %v1952_v44 = vadd.f32 %v1878_v38, %v1765_v16 }
 0x215   : > { %v3773_v52 = vrot.slane %v2627_v5, 9  ;;  %v3774_v39 = vrot.slane %v2628_v29, 9  ;;  %v3775_v21 = vrot.slane %v2629_v40, 9  ;;  %v2946_v54 = vmax.f32 %v2626_v33, %v3772_v13 }
 0x216   : > { %v2319_v7 = vpack.c.bf16 %v2303_v11, %v2303_v11 }
 0x217   : > { %v2947_v26 = vmax.f32 %v2627_v5, %v3773_v52  ;;  %v2948_v10 = vmax.f32 %v2628_v29, %v3774_v39  ;;  %v1693_v22 = vpop.f32.mrf.mxu2  ;;  %v2949_v23 = vmax.f32 %v2629_v40, %v3775_v21  ;;  %v3010_v61 = vpack.c.bf16 %v2946_v54, %v2946_v54  ;;  %v4942_v21 = vld [vmem:[#allocation22_spill] sm:$0xff] }
 0x218   : > { %v2351_v30 = vrot.slane %v2319_v7, 3  ;;  %v1880_v18 = vpop.f32.mrf.mxu3  ;;  %v1568_v16 = vadd.f32 %v1495_v47, %v4942_v21 }
 0x219   : > { %v3011_v9 = vpack.c.bf16 %v2947_v26, %v2947_v26  ;;  %v3012_v41 = vpack.c.bf16 %v2948_v10, %v2948_v10  ;;  %v1498_v56 = vpop.f32.mrf.mxu1  ;;  %v3013_v38 = vpack.c.bf16 %v2949_v23, %v2949_v23 }
 0x21a   : > { %v2384_v8 = vsel %vm439_vm0, %v2319_v7, %v2351_v30  ;;  %v2385_v32 = vsel %vm2370_vm6, %v2319_v7, %v2351_v30  ;;  %v2388_v25 = vsel %vm2374_vm7, %v2319_v7, %v2351_v30  ;;  %v2391_v45 = vsel %vm2378_vm8, %v2319_v7, %v2351_v30  ;;  %v3984_v7 = vld [vmem:[%s4077_s24 + $0x60] sm:$0xff] }
 0x21b   : > { %v2073_v33 = vpop.f32.mrf.mxu0  ;;  %v3139_v50 = vunpack.c.l.b16 %v3011_v9  ;;  %v2387_v5 = vrot.slane %v2385_v32, 1  ;;  %v3140_v29 = vunpack.c.l.b16 %v3012_v41  ;;  %v2390_v13 = vrot.slane %v2388_v25, 2 }
 0x21c   : > { %v2393_v40 = vrot.slane %v2391_v45, 3  ;;  %v2630_v11 = vunpack.c.l.bf16 %v2384_v8  ;;  %1537 = vmatmul.bf16.gmra.mxu1 %v4403_v28  ;;  %1735 = vmatmul.bf16.gmra.mxu2 %v4407_v14  ;;  %v2142_v30 = vadd.f32 %v4587_v58, %v1952_v44  ;;  %v3138_v9 = vunpack.c.l.b16 %v3010_v61 }
 0x21d   : > { %v3202_v52 = vrot.slane %v3139_v50, 7  ;;  %v2631_v39 = vunpack.c.l.bf16 %v2387_v5  ;;  %1922 = vmatmul.bf16.gmra.mxu3 %v3984_v7  ;;  %v2632_v54 = vunpack.c.l.bf16 %v2390_v13  ;;  %v1766_v28 = vadd.f32 %v1693_v22, %v1568_v16 }
 0x21e   : > { %2112 = vmatmul.bf16.gmra.mxu0 %v4423_v62  ;;  %v2633_v26 = vunpack.c.l.bf16 %v2393_v40  ;;  %v3776_v10 = vrot.slane %v2630_v11, 9  ;;  %v1569_v14 = vadd.f32 %v1498_v56, %v4399_v17  ;;  %v3204_v8 = vrot.slane %v3140_v29, 6 }
 0x21f   : > { %v3777_v41 = vrot.slane %v2631_v39, 9  ;;  %v1696_v23 = vpop.f32.mrf.mxu2  ;;  %v3778_v32 = vrot.slane %v2632_v54, 9  ;;  %v3141_v50 = vunpack.c.l.b16 %v3013_v38  ;;  %v3203_v5 = vsel %vm2370_vm6, %v3202_v52, %v3138_v9 }
 0x220   : > { %v3779_v25 = vrot.slane %v2633_v26, 9  ;;  %v2950_v45 = vmax.f32 %v2630_v11, %v3776_v10  ;;  %v1883_v47 = vpop.f32.mrf.mxu3  ;;  %v1767_v13 = vadd.f32 %v1696_v23, %v1569_v14  ;;  %v1953_v17 = vadd.f32 %v1880_v18, %v1766_v28 }
 0x221   : > { %v2951_v21 = vmax.f32 %v2631_v39, %v3777_v41  ;;  %v1500_v40 = vpop.f32.mrf.mxu1  ;;  %v2952_v7 = vmax.f32 %v2632_v54, %v3778_v32  ;;  %v3205_v61 = vsel %vm2374_vm7, %v3204_v8, %v3203_v5  ;;  %v3206_v16 = vrot.slane %v3141_v50, 5  ;;  %v4943_v41 = vld [vmem:[#allocation23_spill] sm:$0xff] }
 0x222   : > { %v2953_v3 = vmax.f32 %v2633_v26, %v3779_v25  ;;  %v3014_v44 = vpack.c.bf16 %v2950_v45, %v2950_v45  ;;  %v1954_v56 = vadd.f32 %v1883_v47, %v1767_v13  ;;  %v2178_v39 = vadd.f32 %v4581_v43, %v2142_v30 }
 0x223   : > { %v2075_v58 = vpop.f32.mrf.mxu0  ;;  %v3015_v22 = vpack.c.bf16 %v2951_v21, %v2951_v21  ;;  %v3016_v29 = vpack.c.bf16 %v2952_v7, %v2952_v7  ;;  %v1570_v14 = vadd.f32 %v1500_v40, %v4943_v41  ;;  %v3207_v23 = vsel %vm2378_vm8, %v3206_v16, %v3205_v61 }
 0x224   : > { %v3017_v11 = vpack.c.bf16 %v2953_v3, %v2953_v3  ;;  %v3142_v38 = vunpack.c.l.b16 %v3014_v44  ;;  %v2144_v10 = vadd.f32 %v2073_v33, %v1954_v56  ;;  %v2143_v25 = vadd.f32 %v4600_v53, %v1953_v17 }
 0x225   : > { %v3143_v52 = vunpack.c.l.b16 %v3015_v22  ;;  %v3144_v54 = vunpack.c.l.b16 %v3016_v29  ;;  %v2210_v50 = vmax.f32 %v2178_v39, 0.0  ;;  %v3985_v29 = vld [vmem:[%s4077_s24 + $0x68] sm:$0xff] }
 0x226   : > { %v3145_v26 = vunpack.c.l.b16 %v3017_v11  ;;  %v3208_v9 = vrot.slane %v3142_v38, 4  ;;  %v2180_v28 = vadd.f32 %v4581_v43, %v2144_v10  ;;  %v2179_v17 = vadd.f32 %v4581_v43, %v2143_v25 }
 0x227   : > { %v3211_v18 = vrot.slane %v3143_v52, 3  ;;  %v1698_v8 = vpop.f32.mrf.mxu2  ;;  %v3214_v32 = vrot.slane %v3144_v54, 2 }
 0x228   : > { %v3210_v3 = vsel %vm3209_vm9, %v3208_v9, %v3207_v23  ;;  %v1768_v30 = vadd.f32 %v1698_v8, %v1570_v14  ;;  %v1885_v33 = vpop.f32.mrf.mxu3  ;;  %v3217_v47 = vrot.slane %v3145_v26, 1  ;;  %v2212_v5 = vmax.f32 %v2180_v28, 0.0 }
 0x229   : > { %v3213_v45 = vsel %vm3212_vm10, %v3211_v18, %v3210_v3  ;;  %v1503_v21 = vpop.f32.mrf.mxu1  ;;  %v2211_v52 = vmax.f32 %v2179_v17, 0.0 }
 0x22a   : > { %v3216_v13 = vsel %vm3215_vm11, %v3214_v32, %v3213_v45  ;;  %v1955_v40 = vadd.f32 %v1885_v33, %v1768_v30  ;;  %v2304_v44 = vmax.f32 %v2210_v50, %v2212_v5 }
 0x22b   : > { %v4624_v7 = vpop.f32.mrf.mxu0  ;;  %v3219_v53 = vsel %vm3218_vm12, %v3217_v47, %v3216_v13 }
 0x22c   : > { %v3318_v22 = vpack.c.b16 %v3219_v53, %v3219_v53  ;;  %v2145_v56 = vadd.f32 %v2075_v58, %v1955_v40  ;;  %1542 = vmatmul.bf16.gmra.mxu1 %v4423_v62  ;;  %1740 = vmatmul.bf16.gmra.mxu2 %v4427_v6  ;;  %v2320_v61 = vpack.c.bf16 %v2304_v44, %v2304_v44 }
 0x22d   : > { %1927 = vmatmul.bf16.gmra.mxu3 %v3985_v29 }
 0x22e   : > { %2117 = vmatmul.bf16.gmra.mxu0 %v4443_v36  ;;  %3334 = vst [vmem:[%s4629_s30] sm:$0xf] %v3318_v22  ;;  %v2181_v11 = vadd.f32 %v4581_v43, %v2145_v56  ;;  %v2352_v38 = vrot.slane %v2320_v61, 3  ;;  %v1571_v22 = vadd.f32 %v1503_v21, %v4418_v15 }
 0x22f   : > { %v1701_v16 = vpop.f32.mrf.mxu2 }
 0x230   : > { %v2213_v39 = vmax.f32 %v2181_v11, 0.0  ;;  %v1888_v10 = vpop.f32.mrf.mxu3  ;;  %v2396_v54 = vsel %vm439_vm0, %v2320_v61, %v2352_v38  ;;  %v2397_v58 = vsel %vm2370_vm6, %v2320_v61, %v2352_v38  ;;  %v2400_v62 = vsel %vm2374_vm7, %v2320_v61, %v2352_v38 }
 0x231   : > { %v2403_v6 = vsel %vm2378_vm8, %v2320_v61, %v2352_v38  ;;  %v1505_v26 = vpop.f32.mrf.mxu1  ;;  %v2399_v9 = vrot.slane %v2397_v58, 1  ;;  %v2402_v41 = vrot.slane %v2400_v62, 2  ;;  %v2634_v23 = vunpack.c.l.bf16 %v2396_v54 }
 0x232   : > { %v2405_v14 = vrot.slane %v2403_v6, 3  ;;  %v2305_v28 = vmax.f32 %v2211_v52, %v2213_v39  ;;  %v1769_v58 = vadd.f32 %v1701_v16, %v1571_v22 }
 0x233   : > { %v4643_v18 = vpop.f32.mrf.mxu0  ;;  %v2635_v8 = vunpack.c.l.bf16 %v2399_v9  ;;  %v2636_v3 = vunpack.c.l.bf16 %v2402_v41  ;;  %v3780_v25 = vrot.slane %v2634_v23, 9 }
 0x234   : > { %v2637_v32 = vunpack.c.l.bf16 %v2405_v14  ;;  %v2321_v30 = vpack.c.bf16 %v2305_v28, %v2305_v28  ;;  %v4944_v28 = vshll.u32 %v4450_v49, 16 }
 0x235   : > { %v3781_v33 = vrot.slane %v2635_v8, 9  ;;  %v3782_v45 = vrot.slane %v2636_v3, 9  ;;  %v2954_v50 = vmax.f32 %v2634_v23, %v3780_v25 }
 0x236   : > { %v3783_v47 = vrot.slane %v2637_v32, 9  ;;  %v2353_v5 = vrot.slane %v2321_v30, 3 }
 0x237   : > { %v1703_v13 = vpop.f32.mrf.mxu2  ;;  %v2955_v40 = vmax.f32 %v2635_v8, %v3781_v33  ;;  %v2956_v53 = vmax.f32 %v2636_v3, %v3782_v45  ;;  %v3018_v52 = vpack.c.bf16 %v2954_v50, %v2954_v50  ;;  %v1405_v8 = vrot.slane %v4944_v28, 1  ;;  %v4945_v50 = vld [vmem:[#allocation24_spill] sm:$0xff] }
 0x238   : > { %v2957_v44 = vmax.f32 %v2637_v32, %v3783_v47  ;;  %v4646_v17 = vpop.f32.mrf.mxu3  ;;  %v2408_v56 = vsel %vm439_vm0, %v2321_v30, %v2353_v5  ;;  %v2409_v61 = vsel %vm2370_vm6, %v2321_v30, %v2353_v5  ;;  %v2412_v29 = vsel %vm2374_vm7, %v2321_v30, %v2353_v5 }
 0x239   : > { %v2415_v11 = vsel %vm2378_vm8, %v2321_v30, %v2353_v5  ;;  %v1508_v38 = vpop.f32.mrf.mxu1  ;;  %v3019_v39 = vpack.c.bf16 %v2955_v40, %v2955_v40  ;;  %v3020_v54 = vpack.c.bf16 %v2956_v53, %v2956_v53  ;;  %v2411_v6 = vrot.slane %v2409_v61, 1  ;;  %v3986_v30 = vld [vmem:[%s4077_s24 + $0x70] sm:$0xff] }
 0x23a   : > { %v2414_v9 = vrot.slane %v2412_v29, 2  ;;  %v2417_v15 = vrot.slane %v2415_v11, 3  ;;  %v2638_v21 = vunpack.c.l.bf16 %v2408_v56  ;;  %v3021_v41 = vpack.c.bf16 %v2957_v44, %v2957_v44 }
 0x23b   : > { %v2083_v62 = vpop.f32.mrf.mxu0  ;;  %v3147_v14 = vunpack.c.l.b16 %v3019_v39  ;;  %v3148_v23 = vunpack.c.l.b16 %v3020_v54  ;;  %v2639_v3 = vunpack.c.l.bf16 %v2411_v6  ;;  %v3146_v33 = vunpack.c.l.b16 %v3018_v52 }
 0x23c   : > { %1547 = vmatmul.bf16.gmra.mxu1 %v4443_v36  ;;  %1745 = vmatmul.bf16.gmra.mxu2 %v4447_v24  ;;  %v2640_v32 = vunpack.c.l.bf16 %v2414_v9  ;;  %v2641_v25 = vunpack.c.l.bf16 %v2417_v15  ;;  %v3784_v16 = vrot.slane %v2638_v21, 9  ;;  %v1956_v47 = vadd.f32 %v1888_v10, %v1769_v58 }
 0x23d   : > { %1932 = vmatmul.bf16.gmra.mxu3 %v3986_v30  ;;  %v3220_v45 = vrot.slane %v3147_v14, 7  ;;  %v1572_v5 = vadd.f32 %v1505_v26, %v4945_v50  ;;  %v3785_v40 = vrot.slane %v2639_v3, 9  ;;  %v3149_v22 = vunpack.c.l.b16 %v3021_v41 }
 0x23e   : > { %2122 = vmatmul.bf16.gmra.mxu0 %v4470_v57  ;;  %v3786_v36 = vrot.slane %v2640_v32, 9  ;;  %v3787_v53 = vrot.slane %v2641_v25, 9  ;;  %v2958_v24 = vmax.f32 %v2638_v21, %v3784_v16  ;;  %v3222_v56 = vrot.slane %v3148_v23, 6 }
 0x23f   : > { %v1706_v44 = vpop.f32.mrf.mxu2  ;;  %v1770_v61 = vadd.f32 %v1703_v13, %v1572_v5  ;;  %v1573_v29 = vadd.f32 %v1508_v38, %v4438_v31  ;;  %v3221_v39 = vsel %vm2370_vm6, %v3220_v45, %v3146_v33  ;;  %v2959_v54 = vmax.f32 %v2639_v3, %v3785_v40 }
 0x240   : > { %v1893_v11 = vpop.f32.mrf.mxu3  ;;  %v2960_v6 = vmax.f32 %v2640_v32, %v3786_v36  ;;  %v2961_v52 = vmax.f32 %v2641_v25, %v3787_v53  ;;  %v4946_v10 = vmov 0   ;;  %v3022_v26 = vpack.c.bf16 %v2958_v24, %v2958_v24 }
 0x241   : > { %v1510_v9 = vpop.f32.mrf.mxu1  ;;  %v1596_v58 = vunpack.c.l.b16 %v4946_v10  ;;  %v2146_v15 = vadd.f32 %v4624_v7, %v1956_v47  ;;  %v1771_v14 = vadd.f32 %v1706_v44, %v1573_v29  ;;  %v3023_v28 = vpack.c.bf16 %v2959_v54, %v2959_v54 }
 0x242   : > { %v3024_v41 = vpack.c.bf16 %v2960_v6, %v2960_v6  ;;  %v3025_v23 = vpack.c.bf16 %v2961_v52, %v2961_v52  ;;  %v4947_v13 = vshrl.u32 %v4450_v49, 16  ;;  %v3223_v38 = vsel %vm2374_vm7, %v3222_v56, %v3221_v39 }
 0x243   : > { %v2085_v21 = vpop.f32.mrf.mxu0  ;;  %v3224_v16 = vrot.slane %v3149_v22, 5  ;;  %v3150_v3 = vunpack.c.l.b16 %v3022_v26  ;;  %v1958_v32 = vadd.f32 %v1893_v11, %v1771_v14  ;;  %v3151_v25 = vunpack.c.l.b16 %v3023_v28  ;;  %v3987_v28 = vld [vmem:[%s4077_s24 + $0x78] sm:$0xff] }
 0x244   : > { %v1406_v31 = vor.u32 %v1405_v8, %v4947_v13  ;;  %v3152_v30 = vunpack.c.l.b16 %v3024_v41  ;;  %v3153_v33 = vunpack.c.l.b16 %v3025_v23  ;;  %v1957_v45 = vadd.f32 %v4646_v17, %v1770_v61 }
 0x245   : > { %v3226_v50 = vrot.slane %v3150_v3, 4  ;;  %v2182_v7 = vadd.f32 %v4581_v43, %v2146_v15  ;;  %v2148_v47 = vadd.f32 %v2083_v62, %v1958_v32  ;;  %v1574_v5 = vadd.f32 %v1510_v9, %v4454_v34 }
 0x246   : > { %v4669_v40 = vpack.c.b16 %v1596_v58, %v1596_v58  ;;  %v3225_v49 = vsel %vm2378_vm8, %v3224_v16, %v3223_v38  ;;  %v3228_v8 = vrot.slane %v3151_v25, 3  ;;  %v3230_v36 = vrot.slane %v3152_v30, 2 }
 0x247   : > { %v1708_v53 = vpop.f32.mrf.mxu2  ;;  %v3227_v24 = vsel %vm3209_vm9, %v3226_v50, %v3225_v49  ;;  %v2184_v44 = vadd.f32 %v4581_v43, %v2148_v47  ;;  %v3232_v61 = vrot.slane %v3153_v33, 1  ;;  %v2147_v62 = vadd.f32 %v4643_v18, %v1957_v45 }
 0x248   : > { %v1772_v22 = vadd.f32 %v1708_v53, %v1574_v5  ;;  %v1895_v56 = vpop.f32.mrf.mxu3  ;;  %v3229_v17 = vsel %vm3212_vm10, %v3228_v8, %v3227_v24  ;;  %v4678_v34 = vsel %vm4149_vm5, %v1406_v31, 0  ;;  %v2214_v39 = vmax.f32 %v2182_v7, 0.0 }
 0x249   : > { %v1513_v29 = vpop.f32.mrf.mxu1  ;;  %v3231_v11 = vsel %vm3215_vm11, %v3230_v36, %v3229_v17  ;;  %v2216_v54 = vmax.f32 %v2184_v44, 0.0  ;;  %v1599_v10 = vshrl.u32 %v4669_v40, 16  ;;  %v1602_v15 = vshll.u32 %v4669_v40, 16 }
 0x24a   : > { %v1959_v6 = vadd.f32 %v1895_v56, %v1772_v22  ;;  %v3233_v9 = vsel %vm3218_vm12, %v3232_v61, %v3231_v11  ;;  %v2183_v14 = vadd.f32 %v4581_v43, %v2147_v62 }
 0x24b   : > { %v4681_v52 = vpop.f32.mrf.mxu0  ;;  %v3319_v58 = vpack.c.b16 %v3233_v9, %v3233_v9  ;;  %v2306_v18 = vmax.f32 %v2214_v39, %v2216_v54  ;;  %v1980_v16 = vrot.slane %v1602_v15, 1 }
 0x24c   : > { %v2149_v26 = vadd.f32 %v2085_v21, %v1959_v6  ;;  %1552 = vmatmul.bf16.gmra.mxu1 %v4470_v57  ;;  %1750 = vmatmul.bf16.gmra.mxu2 %v4474_v19  ;;  %v1601_v57 = vrot.slane %v1599_v10, 7  ;;  %v2215_v19 = vmax.f32 %v2183_v14, 0.0  ;;  %v1575_v6 = vadd.f32 %v1513_v29, %v4463_v35 }
 0x24d   : > { %1937 = vmatmul.bf16.gmra.mxu3 %v3987_v28  ;;  %3335 = vst [vmem:[%s4629_s30 + $0x4] sm:$0xf] %v3319_v58  ;;  %v2322_v41 = vpack.c.bf16 %v2306_v18, %v2306_v18  ;;  %v1981_v36 = vor.u32 %v1980_v16, %v1599_v10 }
 0x24e   : > { %2127 = vmatmul.bf16.gmra.mxu0 %v4678_v34  ;;  %v2185_v23 = vadd.f32 %v4581_v43, %v2149_v26  ;;  %v1604_v8 = vor.u32 %v1602_v15, %v1601_v57 }
 0x24f   : > { %v1711_v13 = vpop.f32.mrf.mxu2  ;;  %v2354_v31 = vrot.slane %v2322_v41, 3  ;;  %v1983_v14 = vsel %vm4149_vm5, %v1981_v36, 0 }
 0x250   : > { %v2217_v38 = vmax.f32 %v2185_v23, 0.0  ;;  %v4693_v21 = vpop.f32.mrf.mxu3  ;;  %v1606_v58 = vsel %vm4144_vm4, 0, %v1604_v8  ;;  %v1773_v57 = vadd.f32 %v1711_v13, %v1575_v6 }
 0x251   : > { %v1515_v3 = vpop.f32.mrf.mxu1  ;;  %v2420_v32 = vsel %vm439_vm0, %v2322_v41, %v2354_v31  ;;  %v2421_v25 = vsel %vm2370_vm6, %v2322_v41, %v2354_v31  ;;  %v2424_v30 = vsel %vm2374_vm7, %v2322_v41, %v2354_v31  ;;  %v2427_v33 = vsel %vm2378_vm8, %v2322_v41, %v2354_v31 }
 0x252   : > { %v2423_v50 = vrot.slane %v2421_v25, 1  ;;  %v2426_v7 = vrot.slane %v2424_v30, 2  ;;  %v2429_v47 = vrot.slane %v2427_v33, 3  ;;  %v2642_v5 = vunpack.c.l.bf16 %v2420_v32 }
 0x253   : > { %v4699_v45 = vpop.f32.mrf.mxu0  ;;  %v2307_v49 = vmax.f32 %v2215_v19, %v2217_v38  ;;  %v1960_v36 = vadd.f32 %v4693_v21, %v1773_v57 }
 0x254   : > { %v2643_v53 = vunpack.c.l.bf16 %v2423_v50  ;;  %v2644_v24 = vunpack.c.l.bf16 %v2426_v7  ;;  %v2645_v44 = vunpack.c.l.bf16 %v2429_v47  ;;  %v3788_v22 = vrot.slane %v2642_v5, 9 }
 0x255   : > { %v2323_v56 = vpack.c.bf16 %v2307_v49, %v2307_v49  ;;  %v1576_v50 = vadd.f32 %v1515_v3, %v4478_v1  ;;  %v2150_v21 = vadd.f32 %v4681_v52, %v1960_v36 }
 0x256   : > { %v3789_v17 = vrot.slane %v2643_v53, 9  ;;  %v3790_v61 = vrot.slane %v2644_v24, 9  ;;  %v3791_v62 = vrot.slane %v2645_v44, 9  ;;  %v2962_v11 = vmax.f32 %v2642_v5, %v3788_v22 }
 0x257   : > { %v1713_v39 = vpop.f32.mrf.mxu2  ;;  %v2355_v54 = vrot.slane %v2323_v56, 3 }
 0x258   : > { %v1900_v9 = vpop.f32.mrf.mxu3  ;;  %v2963_v18 = vmax.f32 %v2643_v53, %v3789_v17  ;;  %v2964_v26 = vmax.f32 %v2644_v24, %v3790_v61  ;;  %v2965_v10 = vmax.f32 %v2645_v44, %v3791_v62  ;;  %v3026_v29 = vpack.c.bf16 %v2962_v11, %v2962_v11 }
 0x259   : > { %v1518_v15 = vpop.f32.mrf.mxu1  ;;  %v2432_v28 = vsel %vm439_vm0, %v2323_v56, %v2355_v54  ;;  %v2433_v41 = vsel %vm2370_vm6, %v2323_v56, %v2355_v54  ;;  %v2436_v23 = vsel %vm2374_vm7, %v2323_v56, %v2355_v54  ;;  %v2439_v31 = vsel %vm2378_vm8, %v2323_v56, %v2355_v54 }
 0x25a   : > { %v3027_v38 = vpack.c.bf16 %v2963_v18, %v2963_v18  ;;  %v3028_v0 = vpack.c.bf16 %v2964_v26, %v2964_v26  ;;  %v2435_v16 = vrot.slane %v2433_v41, 1  ;;  %v2438_v19 = vrot.slane %v2436_v23, 2 }
 0x25b   : > { %v2093_v35 = vpop.f32.mrf.mxu0  ;;  %v2441_v32 = vrot.slane %v2439_v31, 3  ;;  %v2646_v25 = vunpack.c.l.bf16 %v2432_v28  ;;  %v3029_v2 = vpack.c.bf16 %v2965_v10, %v2965_v10  ;;  %v3154_v13 = vunpack.c.l.b16 %v3026_v29 }
 0x25c   : > { %1557 = vmatmul.bf16.gmra.mxu1 %v4678_v34  ;;  %1755 = vmatmul.bf16.gmra.mxu2 %v1606_v58  ;;  %v3155_v30 = vunpack.c.l.b16 %v3027_v38  ;;  %v3156_v33 = vunpack.c.l.b16 %v3028_v0  ;;  %v2647_v7 = vunpack.c.l.bf16 %v2435_v16  ;;  %v2648_v47 = vunpack.c.l.bf16 %v2438_v19 }
 0x25d   : > { %1942 = vmatmul.bf16.gmra.mxu3 %v4669_v40  ;;  %v2649_v5 = vunpack.c.l.bf16 %v2441_v32  ;;  %v3792_v49 = vrot.slane %v2646_v25, 9  ;;  %v1774_v53 = vadd.f32 %v1713_v39, %v1576_v50  ;;  %v3157_v61 = vunpack.c.l.b16 %v3029_v2 }
 0x25e   : > { %2132 = vmatmul.bf16.gmra.mxu0 %v1983_v14  ;;  %v3234_v8 = vrot.slane %v3155_v30, 7  ;;  %v3793_v34 = vrot.slane %v2647_v7, 9  ;;  %v3794_v44 = vrot.slane %v2648_v47, 9  ;;  %v3236_v1 = vrot.slane %v3156_v33, 6 }
 0x25f   : > { %v1716_v24 = vpop.f32.mrf.mxu2  ;;  %v3795_v22 = vrot.slane %v2649_v5, 9  ;;  %v2966_v56 = vmax.f32 %v2646_v25, %v3792_v49  ;;  %v1577_v40 = vadd.f32 %v1518_v15, %v4483_v48  ;;  %v1961_v39 = vadd.f32 %v1900_v9, %v1774_v53 }
 0x260   : > { %v1903_v17 = vpop.f32.mrf.mxu3  ;;  %v3235_v62 = vsel %vm2370_vm6, %v3234_v8, %v3154_v13  ;;  %v2967_v11 = vmax.f32 %v2647_v7, %v3793_v34  ;;  %v2968_v54 = vmax.f32 %v2648_v47, %v3794_v44  ;;  %v3238_v23 = vrot.slane %v3157_v61, 5 }
 0x261   : > { %v1520_v3 = vpop.f32.mrf.mxu1  ;;  %v2969_v6 = vmax.f32 %v2649_v5, %v3795_v22  ;;  %v3030_v18 = vpack.c.bf16 %v2966_v56, %v2966_v56  ;;  %v1775_v26 = vadd.f32 %v1716_v24, %v1577_v40  ;;  %v3237_v41 = vsel %vm2374_vm7, %v3236_v1, %v3235_v62 }
 0x262   : > { %v3031_v10 = vpack.c.bf16 %v2967_v11, %v2967_v11  ;;  %v3032_v14 = vpack.c.bf16 %v2968_v54, %v2968_v54  ;;  %v1578_v0 = vadd.f32 %v1520_v3, %v4488_v37  ;;  %v2186_v16 = vadd.f32 %v4581_v43, %v2150_v21 }
 0x263   : > { %v2095_v58 = vpop.f32.mrf.mxu0  ;;  %v3033_v28 = vpack.c.bf16 %v2969_v6, %v2969_v6  ;;  %v3158_v31 = vunpack.c.l.b16 %v3030_v18  ;;  %v1962_v48 = vadd.f32 %v1903_v17, %v1775_v26  ;;  %v2151_v52 = vadd.f32 %v4699_v45, %v1961_v39 }
 0x264   : > { %v3159_v15 = vunpack.c.l.b16 %v3031_v10  ;;  %v3160_v29 = vunpack.c.l.b16 %v3032_v14  ;;  %v3239_v32 = vsel %vm2378_vm8, %v3238_v23, %v3237_v41 }
 0x265   : > { %v3161_v38 = vunpack.c.l.b16 %v3033_v28  ;;  %v3240_v57 = vrot.slane %v3158_v31, 4  ;;  %v2152_v9 = vadd.f32 %v2093_v35, %v1962_v48  ;;  %v2218_v35 = vmax.f32 %v2186_v16, 0.0 }
 0x266   : > { %v3242_v25 = vrot.slane %v3159_v15, 3  ;;  %v3244_v2 = vrot.slane %v3160_v29, 2  ;;  %v2187_v53 = vadd.f32 %v4581_v43, %v2151_v52 }
 0x267   : > { %v1718_v19 = vpop.f32.mrf.mxu2  ;;  %v3241_v50 = vsel %vm3209_vm9, %v3240_v57, %v3239_v32  ;;  %v2188_v7 = vadd.f32 %v4581_v43, %v2152_v9  ;;  %v3246_v5 = vrot.slane %v3161_v38, 1 }
 0x268   : > { %v1776_v30 = vadd.f32 %v1718_v19, %v1578_v0  ;;  %v1905_v33 = vpop.f32.mrf.mxu3  ;;  %v3243_v37 = vsel %vm3212_vm10, %v3242_v25, %v3241_v50  ;;  %v2219_v61 = vmax.f32 %v2187_v53, 0.0 }
 0x269   : > { %v1523_v47 = vpop.f32.mrf.mxu1  ;;  %v3245_v45 = vsel %vm3215_vm11, %v3244_v2, %v3243_v37  ;;  %v2220_v8 = vmax.f32 %v2188_v7, 0.0 }
 0x26a   : > { %v1963_v49 = vadd.f32 %v1905_v33, %v1776_v30  ;;  %v3247_v36 = vsel %vm3218_vm12, %v3246_v5, %v3245_v45  ;;  %v1579_v28 = vadd.f32 %v1523_v47, %v4493_v20 }
 0x26b   : > { %v4725_v13 = vpop.f32.mrf.mxu0  ;;  %v3320_v34 = vpack.c.b16 %v3247_v36, %v3247_v36  ;;  %v2308_v44 = vmax.f32 %v2218_v35, %v2220_v8 }
 0x26c   : > { %v2153_v24 = vadd.f32 %v2095_v58, %v1963_v49 }
 0x26d   : > { %3336 = vst [vmem:[%s4629_s30 + $0x8] sm:$0xf] %v3320_v34  ;;  %v2324_v56 = vpack.c.bf16 %v2308_v44, %v2308_v44 }
 0x26e   : > { %v2189_v22 = vadd.f32 %v4581_v43, %v2153_v24 }
 0x26f   : > { %v1721_v17 = vpop.f32.mrf.mxu2  ;;  %v2356_v3 = vrot.slane %v2324_v56, 3 }
 0x270   : > { %v2221_v1 = vmax.f32 %v2189_v22, 0.0  ;;  %v1908_v40 = vpop.f32.mrf.mxu3  ;;  %v1777_v29 = vadd.f32 %v1721_v17, %v1579_v28 }
 0x271   : > { %v1525_v62 = vpop.f32.mrf.mxu1  ;;  %v2444_v6 = vsel %vm439_vm0, %v2324_v56, %v2356_v3  ;;  %v2445_v18 = vsel %vm2370_vm6, %v2324_v56, %v2356_v3  ;;  %v2448_v58 = vsel %vm2374_vm7, %v2324_v56, %v2356_v3  ;;  %v2451_v21 = vsel %vm2378_vm8, %v2324_v56, %v2356_v3 }
 0x272   : > { %v2309_v11 = vmax.f32 %v2219_v61, %v2221_v1  ;;  %v2447_v43 = vrot.slane %v2445_v18, 1  ;;  %v2450_v39 = vrot.slane %v2448_v58, 2  ;;  %v2453_v26 = vrot.slane %v2451_v21, 3 }
 0x273   : > { %v4732_v54 = vpop.f32.mrf.mxu0  ;;  %v2650_v10 = vunpack.c.l.bf16 %v2444_v6  ;;  %v1964_v53 = vadd.f32 %v1908_v40, %v1777_v29  ;;  %v1580_v1 = vadd.f32 %v1525_v62, %v4498_v4 }
 0x274   : > { %v2325_v14 = vpack.c.bf16 %v2309_v11, %v2309_v11  ;;  %v2651_v41 = vunpack.c.l.bf16 %v2447_v43  ;;  %v2652_v23 = vunpack.c.l.bf16 %v2450_v39  ;;  %v2653_v31 = vunpack.c.l.bf16 %v2453_v26 }
 0x275   : > { %v3796_v48 = vrot.slane %v2650_v10, 9 }
 0x276   : > { %v2357_v15 = vrot.slane %v2325_v14, 3  ;;  %v3797_v0 = vrot.slane %v2651_v41, 9  ;;  %v3798_v57 = vrot.slane %v2652_v23, 9  ;;  %v3799_v16 = vrot.slane %v2653_v31, 9 }
 0x277   : > { %v1723_v38 = vpop.f32.mrf.mxu2  ;;  %v2970_v52 = vmax.f32 %v2650_v10, %v3796_v48 }
 0x278   : > { %v1910_v9 = vpop.f32.mrf.mxu3  ;;  %v2456_v19 = vsel %vm439_vm0, %v2325_v14, %v2357_v15  ;;  %v2457_v32 = vsel %vm2370_vm6, %v2325_v14, %v2357_v15  ;;  %v2460_v25 = vsel %vm2374_vm7, %v2325_v14, %v2357_v15  ;;  %v2463_v20 = vsel %vm2378_vm8, %v2325_v14, %v2357_v15 }
 0x279   : > { %v1528_v2 = vpop.f32.mrf.mxu1  ;;  %v2971_v30 = vmax.f32 %v2651_v41, %v3797_v0  ;;  %v2972_v33 = vmax.f32 %v2652_v23, %v3798_v57  ;;  %v2973_v50 = vmax.f32 %v2653_v31, %v3799_v16  ;;  %v3034_v7 = vpack.c.bf16 %v2970_v52, %v2970_v52 }
 0x27a   : > { %v2459_v37 = vrot.slane %v2457_v32, 1  ;;  %v2462_v5 = vrot.slane %v2460_v25, 2  ;;  %v2465_v49 = vrot.slane %v2463_v20, 3  ;;  %v2654_v45 = vunpack.c.l.bf16 %v2456_v19 }
 0x27b   : > { %v2103_v47 = vpop.f32.mrf.mxu0  ;;  %v3035_v35 = vpack.c.bf16 %v2971_v30, %v2971_v30  ;;  %v3036_v8 = vpack.c.bf16 %v2972_v33, %v2972_v33  ;;  %v3037_v36 = vpack.c.bf16 %v2973_v50, %v2973_v50  ;;  %v3162_v56 = vunpack.c.l.b16 %v3034_v7 }
 0x27c   : > { %v2655_v24 = vunpack.c.l.bf16 %v2459_v37  ;;  %v2656_v34 = vunpack.c.l.bf16 %v2462_v5  ;;  %v2657_v44 = vunpack.c.l.bf16 %v2465_v49  ;;  %v3800_v22 = vrot.slane %v2654_v45, 9 }
 0x27d   : > { %v3163_v17 = vunpack.c.l.b16 %v3035_v35  ;;  %v3164_v61 = vunpack.c.l.b16 %v3036_v8  ;;  %v3165_v21 = vunpack.c.l.b16 %v3037_v36  ;;  %v1778_v26 = vadd.f32 %v1723_v38, %v1580_v1 }
 0x27e   : > { %v3801_v3 = vrot.slane %v2655_v24, 9  ;;  %v3802_v11 = vrot.slane %v2656_v34, 9  ;;  %v3803_v6 = vrot.slane %v2657_v44, 9  ;;  %v2974_v18 = vmax.f32 %v2654_v45, %v3800_v22 }
 0x27f   : > { %v1726_v58 = vpop.f32.mrf.mxu2  ;;  %v3248_v43 = vrot.slane %v3163_v17, 7  ;;  %v3250_v39 = vrot.slane %v3164_v61, 6  ;;  %v1581_v48 = vadd.f32 %v1528_v2, %v4503_v60  ;;  %v2154_v0 = vadd.f32 %v4725_v13, %v1964_v53  ;;  %v4753_v13 = vld [vmem:[%s4882_s2] ss:$0 sm:$0xff] }
 0x280   : > { %v1913_v10 = vpop.f32.mrf.mxu3  ;;  %v2975_v40 = vmax.f32 %v2655_v24, %v3801_v3  ;;  %v2976_v14 = vmax.f32 %v2656_v34, %v3802_v11  ;;  %v2977_v28 = vmax.f32 %v2657_v44, %v3803_v6  ;;  %v3038_v41 = vpack.c.bf16 %v2974_v18, %v2974_v18 }
 0x281   : > { %v1530_v23 = vpop.f32.mrf.mxu1  ;;  %v3249_v31 = vsel %vm2370_vm6, %v3248_v43, %v3162_v56  ;;  %v1965_v38 = vadd.f32 %v1910_v9, %v1778_v26  ;;  %v1779_v52 = vadd.f32 %v1726_v58, %v1581_v48  ;;  %v3252_v19 = vrot.slane %v3165_v21, 5 }
 0x282   : > { %v3039_v62 = vpack.c.bf16 %v2975_v40, %v2975_v40  ;;  %v3040_v15 = vpack.c.bf16 %v2976_v14, %v2976_v14  ;;  %v3041_v29 = vpack.c.bf16 %v2977_v28, %v2977_v28  ;;  %v3251_v57 = vsel %vm2374_vm7, %v3250_v39, %v3249_v31 }
 0x283   : > { %v2105_v4 = vpop.f32.mrf.mxu0  ;;  %v3166_v16 = vunpack.c.l.b16 %v3038_v41  ;;  %v1966_v33 = vadd.f32 %v1913_v10, %v1779_v52  ;;  %v1582_v50 = vadd.f32 %v1530_v23, %v4508_v27  ;;  %v3253_v60 = vsel %vm2378_vm8, %v3252_v19, %v3251_v57 }
 0x284   : > { %v3167_v32 = vunpack.c.l.b16 %v3039_v62  ;;  %v3168_v25 = vunpack.c.l.b16 %v3040_v15  ;;  %v3169_v20 = vunpack.c.l.b16 %v3041_v29  ;;  %v2190_v9 = vadd.f32 %v4753_v13, %v2154_v0 }
 0x285   : > { %v3254_v30 = vrot.slane %v3166_v16, 4  ;;  %v2155_v49 = vadd.f32 %v4732_v54, %v1965_v38  ;;  %v2156_v45 = vadd.f32 %v2103_v47, %v1966_v33 }
 0x286   : > { %v3256_v2 = vrot.slane %v3167_v32, 3  ;;  %v3258_v7 = vrot.slane %v3168_v25, 2  ;;  %v3260_v36 = vrot.slane %v3169_v20, 1  ;;  %v2222_v17 = vmax.f32 %v2190_v9, 0.0 }
 0x287   : > { %v1728_v37 = vpop.f32.mrf.mxu2  ;;  %v3255_v5 = vsel %vm3209_vm9, %v3254_v30, %v3253_v60  ;;  %v2192_v34 = vadd.f32 %v4753_v13, %v2156_v45  ;;  %v2191_v54 = vadd.f32 %v4753_v13, %v2155_v49 }
 0x288   : > { %v1780_v35 = vadd.f32 %v1728_v37, %v1582_v50  ;;  %v1915_v27 = vpop.f32.mrf.mxu3  ;;  %v3257_v8 = vsel %vm3212_vm10, %v3256_v2, %v3255_v5 }
 0x289   : > { %v1533_v53 = vpop.f32.mrf.mxu1  ;;  %v3259_v24 = vsel %vm3215_vm11, %v3258_v7, %v3257_v8  ;;  %v2224_v47 = vmax.f32 %v2192_v34, 0.0  ;;  %v2223_v18 = vmax.f32 %v2191_v54, 0.0 }
 0x28a   : > { %v1967_v44 = vadd.f32 %v1915_v27, %v1780_v35  ;;  %v3261_v56 = vsel %vm3218_vm12, %v3260_v36, %v3259_v24  ;;  %v1583_v29 = vadd.f32 %v1533_v53, %v4513_v51 }
 0x28b   : > { %v4761_v22 = vpop.f32.mrf.mxu0  ;;  %v3321_v61 = vpack.c.b16 %v3261_v56, %v3261_v56  ;;  %v2310_v3 = vmax.f32 %v2222_v17, %v2224_v47 }
 0x28c   : > { %v2157_v1 = vadd.f32 %v2105_v4, %v1967_v44 }
 0x28d   : > { %3337 = vst [vmem:[%s4629_s30 + $0xc] sm:$0xf] %v3321_v61  ;;  %v2326_v58 = vpack.c.bf16 %v2310_v3, %v2310_v3 }
 0x28e   : > { %v2193_v11 = vadd.f32 %v4753_v13, %v2157_v1 }
 0x28f   : > { %v1731_v6 = vpop.f32.mrf.mxu2  ;;  %v2358_v26 = vrot.slane %v2326_v58, 3 }
 0x290   : > { %v2225_v21 = vmax.f32 %v2193_v11, 0.0  ;;  %v1918_v43 = vpop.f32.mrf.mxu3  ;;  %v1781_v32 = vadd.f32 %v1731_v6, %v1583_v29 }
 0x291   : > { %v1535_v39 = vpop.f32.mrf.mxu1  ;;  %v2468_v14 = vsel %vm439_vm0, %v2326_v58, %v2358_v26  ;;  %v2469_v28 = vsel %vm2370_vm6, %v2326_v58, %v2358_v26  ;;  %v2472_v41 = vsel %vm2374_vm7, %v2326_v58, %v2358_v26  ;;  %v2475_v23 = vsel %vm2378_vm8, %v2326_v58, %v2358_v26 }
 0x292   : > { %v2311_v10 = vmax.f32 %v2223_v18, %v2225_v21  ;;  %v2471_v31 = vrot.slane %v2469_v28, 1  ;;  %v2474_v48 = vrot.slane %v2472_v41, 2  ;;  %v2477_v4 = vrot.slane %v2475_v23, 3 }
 0x293   : > { %v4767_v40 = vpop.f32.mrf.mxu0  ;;  %v2658_v62 = vunpack.c.l.bf16 %v2468_v14  ;;  %v1584_v35 = vadd.f32 %v1535_v39, %v4518_v55  ;;  %v1968_v11 = vadd.f32 %v1918_v43, %v1781_v32 }
 0x294   : > { %v2327_v15 = vpack.c.bf16 %v2311_v10, %v2311_v10  ;;  %v2659_v0 = vunpack.c.l.bf16 %v2471_v31  ;;  %v2660_v57 = vunpack.c.l.bf16 %v2474_v48  ;;  %v2661_v16 = vunpack.c.l.bf16 %v2477_v4 }
 0x295   : > { %v3804_v38 = vrot.slane %v2658_v62, 9 }
 0x296   : > { %v2359_v19 = vrot.slane %v2327_v15, 3  ;;  %v3805_v20 = vrot.slane %v2659_v0, 9  ;;  %v3806_v30 = vrot.slane %v2660_v57, 9  ;;  %v3807_v33 = vrot.slane %v2661_v16, 9 }
 0x297   : > { %v1733_v52 = vpop.f32.mrf.mxu2  ;;  %v2978_v50 = vmax.f32 %v2658_v62, %v3804_v38 }
 0x298   : > { %v1920_v25 = vpop.f32.mrf.mxu3  ;;  %v2480_v2 = vsel %vm439_vm0, %v2327_v15, %v2359_v19  ;;  %v2481_v7 = vsel %vm2370_vm6, %v2327_v15, %v2359_v19  ;;  %v2484_v9 = vsel %vm2374_vm7, %v2327_v15, %v2359_v19  ;;  %v2487_v51 = vsel %vm2378_vm8, %v2327_v15, %v2359_v19 }
 0x299   : > { %v1538_v60 = vpop.f32.mrf.mxu1  ;;  %v2979_v5 = vmax.f32 %v2659_v0, %v3805_v20  ;;  %v2980_v49 = vmax.f32 %v2660_v57, %v3806_v30  ;;  %v2981_v45 = vmax.f32 %v2661_v16, %v3807_v33  ;;  %v2483_v27 = vrot.slane %v2481_v7, 1 }
 0x29a   : > { %v2486_v8 = vrot.slane %v2484_v9, 2  ;;  %v2489_v36 = vrot.slane %v2487_v51, 3  ;;  %v2662_v53 = vunpack.c.l.bf16 %v2480_v2  ;;  %v3042_v24 = vpack.c.bf16 %v2978_v50, %v2978_v50 }
 0x29b   : > { %v4778_v37 = vpop.f32.mrf.mxu0  ;;  %v3043_v34 = vpack.c.bf16 %v2979_v5, %v2979_v5  ;;  %v3044_v44 = vpack.c.bf16 %v2980_v49, %v2980_v49  ;;  %v3045_v56 = vpack.c.bf16 %v2981_v45, %v2981_v45  ;;  %v2663_v17 = vunpack.c.l.bf16 %v2483_v27 }
 0x29c   : > { %v2664_v61 = vunpack.c.l.bf16 %v2486_v8  ;;  %v2665_v54 = vunpack.c.l.bf16 %v2489_v36  ;;  %v3808_v47 = vrot.slane %v2662_v53, 9  ;;  %v1782_v6 = vadd.f32 %v1733_v52, %v1584_v35 }
 0x29d   : > { %v3171_v1 = vunpack.c.l.b16 %v3043_v34  ;;  %v3172_v3 = vunpack.c.l.b16 %v3044_v44  ;;  %v3809_v58 = vrot.slane %v2663_v17, 9  ;;  %v3170_v10 = vunpack.c.l.b16 %v3042_v24 }
 0x29e   : > { %v3810_v21 = vrot.slane %v2664_v61, 9  ;;  %v3811_v55 = vrot.slane %v2665_v54, 9  ;;  %v2982_v39 = vmax.f32 %v2662_v53, %v3808_v47  ;;  %v3173_v14 = vunpack.c.l.b16 %v3045_v56 }
 0x29f   : > { %v1736_v18 = vpop.f32.mrf.mxu2  ;;  %v3262_v28 = vrot.slane %v3171_v1, 7  ;;  %v3264_v41 = vrot.slane %v3172_v3, 6  ;;  %v2983_v31 = vmax.f32 %v2663_v17, %v3809_v58  ;;  %v1969_v43 = vadd.f32 %v1920_v25, %v1782_v6 }
 0x2a0   : > { %v1923_v26 = vpop.f32.mrf.mxu3  ;;  %v2984_v48 = vmax.f32 %v2664_v61, %v3810_v21  ;;  %v2985_v4 = vmax.f32 %v2665_v54, %v3811_v55  ;;  %v3046_v62 = vpack.c.bf16 %v2982_v39, %v2982_v39  ;;  %v1585_v0 = vadd.f32 %v1538_v60, %v4523_v59 }
 0x2a1   : > { %v1540_v23 = vpop.f32.mrf.mxu1  ;;  %v3263_v29 = vsel %vm2370_vm6, %v3262_v28, %v3170_v10  ;;  %v3047_v57 = vpack.c.bf16 %v2983_v31, %v2983_v31  ;;  %v2158_v52 = vadd.f32 %v4761_v22, %v1968_v11  ;;  %v3266_v32 = vrot.slane %v3173_v14, 5 }
 0x2a2   : > { %v3048_v16 = vpack.c.bf16 %v2984_v48, %v2984_v48  ;;  %v3049_v38 = vpack.c.bf16 %v2985_v4, %v2985_v4  ;;  %v3265_v19 = vsel %vm2374_vm7, %v3264_v41, %v3263_v29  ;;  %v3174_v20 = vunpack.c.l.b16 %v3046_v62 }
 0x2a3   : > { %v2115_v15 = vpop.f32.mrf.mxu0  ;;  %v1783_v30 = vadd.f32 %v1736_v18, %v1585_v0  ;;  %v3175_v33 = vunpack.c.l.b16 %v3047_v57  ;;  %v1586_v7 = vadd.f32 %v1540_v23, %v4528_v42  ;;  %v2159_v25 = vadd.f32 %v4767_v40, %v1969_v43 }
 0x2a4   : > { %v3176_v50 = vunpack.c.l.b16 %v3048_v16  ;;  %v3177_v2 = vunpack.c.l.b16 %v3049_v38  ;;  %v3268_v9 = vrot.slane %v3174_v20, 4  ;;  %v3267_v60 = vsel %vm2378_vm8, %v3266_v32, %v3265_v19 }
 0x2a5   : > { %v1970_v51 = vadd.f32 %v1923_v26, %v1783_v30  ;;  %v3270_v5 = vrot.slane %v3175_v33, 3  ;;  %v2194_v27 = vadd.f32 %v4753_v13, %v2158_v52  ;;  %v2195_v17 = vadd.f32 %v4753_v13, %v2159_v25 }
 0x2a6   : > { %v3272_v49 = vrot.slane %v3176_v50, 2  ;;  %v3269_v35 = vsel %vm3209_vm9, %v3268_v9, %v3267_v60  ;;  %v3274_v53 = vrot.slane %v3177_v2, 1 }
 0x2a7   : > { %v1738_v59 = vpop.f32.mrf.mxu2  ;;  %v2160_v8 = vadd.f32 %v4778_v37, %v1970_v51  ;;  %v3271_v42 = vsel %vm3212_vm10, %v3270_v5, %v3269_v35  ;;  %v2226_v47 = vmax.f32 %v2194_v27, 0.0  ;;  %v2227_v6 = vmax.f32 %v2195_v17, 0.0 }
 0x2a8   : > { %v1784_v22 = vadd.f32 %v1738_v59, %v1586_v7  ;;  %v1925_v45 = vpop.f32.mrf.mxu3  ;;  %v3273_v34 = vsel %vm3215_vm11, %v3272_v49, %v3271_v42 }
 0x2a9   : > { %v1543_v36 = vpop.f32.mrf.mxu1  ;;  %v2196_v44 = vadd.f32 %v4753_v13, %v2160_v8  ;;  %v3275_v56 = vsel %vm3218_vm12, %v3274_v53, %v3273_v34 }
 0x2aa   : > { %v1971_v40 = vadd.f32 %v1925_v45, %v1784_v22  ;;  %v3322_v54 = vpack.c.b16 %v3275_v56, %v3275_v56  ;;  %v1587_v28 = vadd.f32 %v1543_v36, %v4533_v46 }
 0x2ab   : > { %v4792_v24 = vpop.f32.mrf.mxu0  ;;  %v2228_v1 = vmax.f32 %v2196_v44, 0.0 }
 0x2ac   : > { %v2161_v61 = vadd.f32 %v2115_v15, %v1971_v40  ;;  %3338 = vst [vmem:[%s4629_s30 + $0x10] sm:$0xf] %v3322_v54 }
 0x2ad   : > { %v2312_v3 = vmax.f32 %v2226_v47, %v2228_v1 }
 0x2ae   : > { %v2197_v37 = vadd.f32 %v4753_v13, %v2161_v61 }
 0x2af   : > { %v1741_v11 = vpop.f32.mrf.mxu2  ;;  %v2328_v21 = vpack.c.bf16 %v2312_v3, %v2312_v3 }
 0x2b0   : > { %v2229_v18 = vmax.f32 %v2197_v37, 0.0  ;;  %v1928_v58 = vpop.f32.mrf.mxu3  ;;  %v1785_v0 = vadd.f32 %v1741_v11, %v1587_v28 }
 0x2b1   : > { %v1545_v55 = vpop.f32.mrf.mxu1  ;;  %v2360_v10 = vrot.slane %v2328_v21, 3 }
 0x2b2   : > { %v2313_v39 = vmax.f32 %v2227_v6, %v2229_v18  ;;  %v1972_v27 = vadd.f32 %v1928_v58, %v1785_v0  ;;  %v1588_v6 = vadd.f32 %v1545_v55, %v4538_v63 }
 0x2b3   : > { %v4800_v26 = vpop.f32.mrf.mxu0  ;;  %v2492_v41 = vsel %vm439_vm0, %v2328_v21, %v2360_v10  ;;  %v2493_v23 = vsel %vm2370_vm6, %v2328_v21, %v2360_v10  ;;  %v2496_v31 = vsel %vm2374_vm7, %v2328_v21, %v2360_v10  ;;  %v2499_v48 = vsel %vm2378_vm8, %v2328_v21, %v2360_v10 }
 0x2b4   : > { %v2329_v14 = vpack.c.bf16 %v2313_v39, %v2313_v39  ;;  %v2495_v4 = vrot.slane %v2493_v23, 1  ;;  %v2498_v62 = vrot.slane %v2496_v31, 2  ;;  %v2501_v15 = vrot.slane %v2499_v48, 3 }
 0x2b5   : > { %v2666_v29 = vunpack.c.l.bf16 %v2492_v41 }
 0x2b6   : > { %v2361_v43 = vrot.slane %v2329_v14, 3  ;;  %v2667_v16 = vunpack.c.l.bf16 %v2495_v4  ;;  %v2668_v38 = vunpack.c.l.bf16 %v2498_v62  ;;  %v2669_v52 = vunpack.c.l.bf16 %v2501_v15 }
 0x2b7   : > { %v1743_v57 = vpop.f32.mrf.mxu2  ;;  %v3812_v19 = vrot.slane %v2666_v29, 9 }
 0x2b8   : > { %v1930_v46 = vpop.f32.mrf.mxu3  ;;  %v2504_v32 = vsel %vm439_vm0, %v2329_v14, %v2361_v43  ;;  %v2505_v20 = vsel %vm2370_vm6, %v2329_v14, %v2361_v43  ;;  %v2508_v30 = vsel %vm2374_vm7, %v2329_v14, %v2361_v43  ;;  %v2511_v33 = vsel %vm2378_vm8, %v2329_v14, %v2361_v43 }
 0x2b9   : > { %v1548_v50 = vpop.f32.mrf.mxu1  ;;  %v3813_v2 = vrot.slane %v2667_v16, 9  ;;  %v3814_v7 = vrot.slane %v2668_v38, 9  ;;  %v3815_v9 = vrot.slane %v2669_v52, 9  ;;  %v2986_v25 = vmax.f32 %v2666_v29, %v3812_v19 }
 0x2ba   : > { %v2507_v59 = vrot.slane %v2505_v20, 1  ;;  %v2510_v60 = vrot.slane %v2508_v30, 2  ;;  %v2513_v5 = vrot.slane %v2511_v33, 3  ;;  %v2670_v49 = vunpack.c.l.bf16 %v2504_v32  ;;  %v4948_v30 = vld [vmem:[#allocation17_spill] sm:$0xff] }
 0x2bb   : > { %v4811_v51 = vpop.f32.mrf.mxu0  ;;  %v2987_v22 = vmax.f32 %v2667_v16, %v3813_v2  ;;  %v2988_v45 = vmax.f32 %v2668_v38, %v3814_v7  ;;  %v2989_v35 = vmax.f32 %v2669_v52, %v3815_v9  ;;  %v3050_v40 = vpack.c.bf16 %v2986_v25, %v2986_v25 }
 0x2bc   : > { %v2671_v8 = vunpack.c.l.bf16 %v2507_v59  ;;  %v2672_v36 = vunpack.c.l.bf16 %v2510_v60  ;;  %v2673_v42 = vunpack.c.l.bf16 %v2513_v5  ;;  %v3816_v53 = vrot.slane %v2670_v49, 9 }
 0x2bd   : > { %v3051_v34 = vpack.c.bf16 %v2987_v22, %v2987_v22  ;;  %v3052_v44 = vpack.c.bf16 %v2988_v45, %v2988_v45  ;;  %v3053_v56 = vpack.c.bf16 %v2989_v35, %v2989_v35  ;;  %v3178_v28 = vunpack.c.l.b16 %v3050_v40 }
 0x2be   : > { %v3817_v17 = vrot.slane %v2671_v8, 9  ;;  %v3818_v61 = vrot.slane %v2672_v36, 9  ;;  %v3819_v54 = vrot.slane %v2673_v42, 9  ;;  %v2990_v47 = vmax.f32 %v2670_v49, %v3816_v53 }
 0x2bf   : > { %v1746_v1 = vpop.f32.mrf.mxu2  ;;  %v3179_v37 = vunpack.c.l.b16 %v3051_v34  ;;  %v3180_v3 = vunpack.c.l.b16 %v3052_v44  ;;  %v3181_v11 = vunpack.c.l.b16 %v3053_v56  ;;  %v1786_v31 = vadd.f32 %v1743_v57, %v1588_v6 }
 0x2c0   : > { %v1933_v18 = vpop.f32.mrf.mxu3  ;;  %v2991_v58 = vmax.f32 %v2671_v8, %v3817_v17  ;;  %v2992_v21 = vmax.f32 %v2672_v36, %v3818_v61  ;;  %v2993_v39 = vmax.f32 %v2673_v42, %v3819_v54  ;;  %v3054_v10 = vpack.c.bf16 %v2990_v47, %v2990_v47 }
 0x2c1   : > { %v1550_v14 = vpop.f32.mrf.mxu1  ;;  %v3276_v41 = vrot.slane %v3179_v37, 7  ;;  %v3278_v23 = vrot.slane %v3180_v3, 6  ;;  %v3280_v0 = vrot.slane %v3181_v11, 5  ;;  %v1973_v16 = vadd.f32 %v1930_v46, %v1786_v31 }
 0x2c2   : > { %v3055_v48 = vpack.c.bf16 %v2991_v58, %v2991_v58  ;;  %v3056_v4 = vpack.c.bf16 %v2992_v21, %v2992_v21  ;;  %v3057_v62 = vpack.c.bf16 %v2993_v39, %v2993_v39  ;;  %v3182_v15 = vunpack.c.l.b16 %v3054_v10 }
 0x2c3   : > { %v2125_v29 = vpop.f32.mrf.mxu0  ;;  %v3277_v43 = vsel %vm2370_vm6, %v3276_v41, %v3178_v28  ;;  %v1589_v63 = vadd.f32 %v1548_v50, %v4543_v12  ;;  %v2162_v20 = vadd.f32 %v4792_v24, %v1972_v27  ;;  %v1590_v33 = vadd.f32 %v1550_v14, %v4948_v30 }
 0x2c4   : > { %v3279_v55 = vsel %vm2374_vm7, %v3278_v23, %v3277_v43  ;;  %v3183_v38 = vunpack.c.l.b16 %v3055_v48  ;;  %v3184_v52 = vunpack.c.l.b16 %v3056_v4  ;;  %v3185_v19 = vunpack.c.l.b16 %v3057_v62 }
 0x2c5   : > { %v3282_v32 = vrot.slane %v3182_v15, 4  ;;  %v1787_v57 = vadd.f32 %v1746_v1, %v1589_v63  ;;  %v3281_v2 = vsel %vm2378_vm8, %v3280_v0, %v3279_v55  ;;  %v2163_v12 = vadd.f32 %v4800_v26, %v1973_v16 }
 0x2c6   : > { %v3284_v7 = vrot.slane %v3183_v38, 3  ;;  %v3286_v9 = vrot.slane %v3184_v52, 2  ;;  %v3288_v49 = vrot.slane %v3185_v19, 1  ;;  %v2198_v45 = vadd.f32 %v4753_v13, %v2162_v20 }
 0x2c7   : > { %v1748_v25 = vpop.f32.mrf.mxu2  ;;  %v3283_v46 = vsel %vm3209_vm9, %v3282_v32, %v3281_v2  ;;  %v1974_v50 = vadd.f32 %v1933_v18, %v1787_v57  ;;  %v2199_v26 = vadd.f32 %v4753_v13, %v2163_v12  ;;  %v4949_v18 = vld [vmem:[#allocation7_spill] sm:$0xff] }
 0x2c8   : > { %v1788_v59 = vadd.f32 %v1748_v25, %v1590_v33  ;;  %v1935_v60 = vpop.f32.mrf.mxu3  ;;  %v3285_v5 = vsel %vm3212_vm10, %v3284_v7, %v3283_v46  ;;  %v2230_v34 = vmax.f32 %v2198_v45, 0.0 }
 0x2c9   : > { %v1553_v24 = vpop.f32.mrf.mxu1  ;;  %v3287_v22 = vsel %vm3215_vm11, %v3286_v9, %v3285_v5  ;;  %v2164_v35 = vadd.f32 %v4811_v51, %v1974_v50  ;;  %v2231_v61 = vmax.f32 %v2199_v26, 0.0 }
 0x2ca   : > { %v1975_v27 = vadd.f32 %v1935_v60, %v1788_v59  ;;  %v3289_v8 = vsel %vm3218_vm12, %v3288_v49, %v3287_v22  ;;  %v1591_v58 = vadd.f32 %v1553_v24, %v4949_v18 }
 0x2cb   : > { %v3323_v36 = vpack.c.b16 %v3289_v8, %v3289_v8  ;;  %v2200_v42 = vadd.f32 %v4753_v13, %v2164_v35  ;;  %v4829_v40 = vpop.f32.mrf.mxu0 }
 0x2cc   : > { %v2165_v53 = vadd.f32 %v2125_v29, %v1975_v27  ;;  %v4950_v29 = vld [vmem:[#allocation10_spill] sm:$0xff] }
 0x2cd   : > { %3339 = vst [vmem:[%s4629_s30 + $0x14] sm:$0xf] %v3323_v36  ;;  %v2232_v44 = vmax.f32 %v2200_v42, 0.0 }
 0x2ce   : > { %v2201_v56 = vadd.f32 %v4753_v13, %v2165_v53 }
 0x2cf   : > { %v1751_v17 = vpop.f32.mrf.mxu2  ;;  %v2314_v54 = vmax.f32 %v2230_v34, %v2232_v44 }
 0x2d0   : > { %v2233_v51 = vmax.f32 %v2201_v56, 0.0  ;;  %v1938_v47 = vpop.f32.mrf.mxu3  ;;  %v1789_v15 = vadd.f32 %v1751_v17, %v1591_v58 }
 0x2d1   : > { %v1555_v1 = vpop.f32.mrf.mxu1  ;;  %v2330_v37 = vpack.c.bf16 %v2314_v54, %v2314_v54 }
 0x2d2   : > { %v2315_v3 = vmax.f32 %v2231_v61, %v2233_v51  ;;  %v1592_v43 = vadd.f32 %v1555_v1, %v4950_v29  ;;  %v1976_v51 = vadd.f32 %v1938_v47, %v1789_v15  ;;  %v4952_v47 = vld [vmem:[#allocation6_spill] sm:$0xff] }
 0x2d3   : > { %v2362_v11 = vrot.slane %v2330_v37, 3  ;;  %v4838_v48 = vpop.f32.mrf.mxu0 }
 0x2d4   : > { %v2331_v6 = vpack.c.bf16 %v2315_v3, %v2315_v3 }
 0x2d5   : > { %v2516_v21 = vsel %vm439_vm0, %v2330_v37, %v2362_v11  ;;  %v2517_v39 = vsel %vm2370_vm6, %v2330_v37, %v2362_v11  ;;  %v2520_v10 = vsel %vm2374_vm7, %v2330_v37, %v2362_v11  ;;  %v2523_v14 = vsel %vm2378_vm8, %v2330_v37, %v2362_v11 }
 0x2d6   : > { %v2519_v28 = vrot.slane %v2517_v39, 1  ;;  %v2522_v41 = vrot.slane %v2520_v10, 2  ;;  %v2525_v23 = vrot.slane %v2523_v14, 3  ;;  %v2674_v31 = vunpack.c.l.bf16 %v2516_v21 }
 0x2d7   : > { %v1753_v4 = vpop.f32.mrf.mxu2  ;;  %v2363_v62 = vrot.slane %v2331_v6, 3 }
 0x2d8   : > { %v1940_v0 = vpop.f32.mrf.mxu3  ;;  %v2675_v16 = vunpack.c.l.bf16 %v2519_v28  ;;  %v2676_v63 = vunpack.c.l.bf16 %v2522_v41  ;;  %v2677_v55 = vunpack.c.l.bf16 %v2525_v23  ;;  %v3820_v38 = vrot.slane %v2674_v31, 9 }
 0x2d9   : > { %v1558_v52 = vpop.f32.mrf.mxu1  ;;  %v2528_v19 = vsel %vm439_vm0, %v2331_v6, %v2363_v62  ;;  %v2529_v32 = vsel %vm2370_vm6, %v2331_v6, %v2363_v62  ;;  %v2532_v20 = vsel %vm2374_vm7, %v2331_v6, %v2363_v62  ;;  %v2535_v57 = vsel %vm2378_vm8, %v2331_v6, %v2363_v62  ;;  %v4951_v62 = vld [vmem:[#allocation5_spill] sm:$0xff] }
 0x2da   : > { %v3821_v30 = vrot.slane %v2675_v16, 9  ;;  %v3822_v33 = vrot.slane %v2676_v63, 9  ;;  %v3823_v2 = vrot.slane %v2677_v55, 9  ;;  %v2994_v7 = vmax.f32 %v2674_v31, %v3820_v38 }
 0x2db   : > { %v2531_v9 = vrot.slane %v2529_v32, 1  ;;  %v2534_v25 = vrot.slane %v2532_v20, 2  ;;  %v2537_v46 = vrot.slane %v2535_v57, 3  ;;  %v2678_v12 = vunpack.c.l.bf16 %v2528_v19  ;;  %v2133_v1 = vpop.f32.mrf.mxu0 }
 0x2dc   : > { %v2995_v50 = vmax.f32 %v2675_v16, %v3821_v30  ;;  %v2996_v59 = vmax.f32 %v2676_v63, %v3822_v33  ;;  %v2997_v60 = vmax.f32 %v2677_v55, %v3823_v2  ;;  %v1790_v5 = vadd.f32 %v1753_v4, %v1592_v43 }
 0x2dd   : > { %v2679_v49 = vunpack.c.l.bf16 %v2531_v9  ;;  %v2680_v24 = vunpack.c.l.bf16 %v2534_v25  ;;  %v2681_v22 = vunpack.c.l.bf16 %v2537_v46  ;;  %v3824_v45 = vrot.slane %v2678_v12, 9 }
 0x2de   : > { %v3058_v35 = vpack.c.bf16 %v2994_v7, %v2994_v7  ;;  %v3059_v27 = vpack.c.bf16 %v2995_v50, %v2995_v50  ;;  %v3060_v8 = vpack.c.bf16 %v2996_v59, %v2996_v59  ;;  %v3061_v36 = vpack.c.bf16 %v2997_v60, %v2997_v60 }
 0x2df   : > { %v1756_v26 = vpop.f32.mrf.mxu2  ;;  %v3825_v42 = vrot.slane %v2679_v49, 9  ;;  %v3826_v53 = vrot.slane %v2680_v24, 9  ;;  %v3827_v34 = vrot.slane %v2681_v22, 9  ;;  %v2998_v44 = vmax.f32 %v2678_v12, %v3824_v45 }
 0x2e0   : > { %v1943_v56 = vpop.f32.mrf.mxu3  ;;  %v3187_v17 = vunpack.c.l.b16 %v3059_v27  ;;  %v3188_v61 = vunpack.c.l.b16 %v3060_v8  ;;  %v3189_v54 = vunpack.c.l.b16 %v3061_v36  ;;  %v3186_v58 = vunpack.c.l.b16 %v3058_v35 }
 0x2e1   : > { %v2999_v37 = vmax.f32 %v2679_v49, %v3825_v42  ;;  %v3000_v3 = vmax.f32 %v2680_v24, %v3826_v53  ;;  %v3001_v11 = vmax.f32 %v2681_v22, %v3827_v34  ;;  %v3062_v6 = vpack.c.bf16 %v2998_v44, %v2998_v44  ;;  %v1560_v18 = vpop.f32.mrf.mxu1 }
 0x2e2   : > { %v3290_v21 = vrot.slane %v3187_v17, 7  ;;  %v3292_v39 = vrot.slane %v3188_v61, 6  ;;  %v1977_v10 = vadd.f32 %v1940_v0, %v1790_v5  ;;  %v3294_v4 = vrot.slane %v3189_v54, 5 }
 0x2e3   : > { %v3063_v14 = vpack.c.bf16 %v2999_v37, %v2999_v37  ;;  %v3064_v28 = vpack.c.bf16 %v3000_v3, %v3000_v3  ;;  %v3065_v41 = vpack.c.bf16 %v3001_v11, %v3001_v11  ;;  %v3190_v23 = vunpack.c.l.b16 %v3062_v6  ;;  %v2135_v59 = vpop.f32.mrf.mxu0 }
 0x2e4   : > { %v3291_v31 = vsel %vm2370_vm6, %v3290_v21, %v3186_v58  ;;  %v1593_v29 = vadd.f32 %v1558_v52, %v4951_v62  ;;  %v1594_v15 = vadd.f32 %v1560_v18, %v4952_v47  ;;  %v2166_v19 = vadd.f32 %v4829_v40, %v1976_v51 }
 0x2e5   : > { %v3293_v43 = vsel %vm2374_vm7, %v3292_v39, %v3291_v31  ;;  %v3191_v16 = vunpack.c.l.b16 %v3063_v14  ;;  %v3192_v63 = vunpack.c.l.b16 %v3064_v28  ;;  %v3193_v55 = vunpack.c.l.b16 %v3065_v41 }
 0x2e6   : > { %v3296_v38 = vrot.slane %v3190_v23, 4  ;;  %v2167_v0 = vadd.f32 %v4838_v48, %v1977_v10  ;;  %v1791_v32 = vadd.f32 %v1756_v26, %v1593_v29  ;;  %v3295_v57 = vsel %vm2378_vm8, %v3294_v4, %v3293_v43 }
 0x2e7   : > { %v1758_v20 = vpop.f32.mrf.mxu2  ;;  %v3298_v30 = vrot.slane %v3191_v16, 3  ;;  %v3300_v33 = vrot.slane %v3192_v63, 2  ;;  %v3302_v46 = vrot.slane %v3193_v55, 1  ;;  %v2202_v48 = vadd.f32 %v4753_v13, %v2166_v19 }
 0x2e8   : > { %v1792_v2 = vadd.f32 %v1758_v20, %v1594_v15  ;;  %v3297_v52 = vsel %vm3209_vm9, %v3296_v38, %v3295_v57  ;;  %v1978_v7 = vadd.f32 %v1943_v56, %v1791_v32  ;;  %v1945_v9 = vpop.f32.mrf.mxu3  ;;  %v2203_v5 = vadd.f32 %v4753_v13, %v2167_v0 }
 0x2e9   : > { %v3299_v25 = vsel %vm3212_vm10, %v3298_v30, %v3297_v52  ;;  %v2234_v35 = vmax.f32 %v2202_v48, 0.0 }
 0x2ea   : > { %v1979_v12 = vadd.f32 %v1945_v9, %v1792_v2  ;;  %v3301_v40 = vsel %vm3215_vm11, %v3300_v33, %v3299_v25  ;;  %v2168_v50 = vadd.f32 %v2133_v1, %v1978_v7  ;;  %v2235_v8 = vmax.f32 %v2203_v5, 0.0 }
 0x2eb   : > { %v3303_v60 = vsel %vm3218_vm12, %v3302_v46, %v3301_v40 }
 0x2ec   : > { %v2169_v49 = vadd.f32 %v2135_v59, %v1979_v12  ;;  %v3324_v24 = vpack.c.b16 %v3303_v60, %v3303_v60  ;;  %v2204_v22 = vadd.f32 %v4753_v13, %v2168_v50 }
 0x2ee   : > { %v2205_v45 = vadd.f32 %v4753_v13, %v2169_v49  ;;  %3340 = vst [vmem:[%s4629_s30 + $0x18] sm:$0xf] %v3324_v24  ;;  %v2236_v27 = vmax.f32 %v2204_v22, 0.0 }
 0x2f0   : > { %v2237_v36 = vmax.f32 %v2205_v45, 0.0  ;;  %v2316_v26 = vmax.f32 %v2234_v35, %v2236_v27 }
 0x2f2   : > { %v2317_v42 = vmax.f32 %v2235_v8, %v2237_v36  ;;  %v2332_v53 = vpack.c.bf16 %v2316_v26, %v2316_v26 }
 0x2f4   : > { %v2333_v34 = vpack.c.bf16 %v2317_v42, %v2317_v42  ;;  %v2364_v44 = vrot.slane %v2332_v53, 3 }
 0x2f6   : > { %v2365_v56 = vrot.slane %v2333_v34, 3  ;;  %v2540_v17 = vsel %vm439_vm0, %v2332_v53, %v2364_v44  ;;  %v2541_v61 = vsel %vm2370_vm6, %v2332_v53, %v2364_v44  ;;  %v2544_v54 = vsel %vm2374_vm7, %v2332_v53, %v2364_v44 }
 0x2f7   : > { %v2547_v51 = vsel %vm2378_vm8, %v2332_v53, %v2364_v44  ;;  %v2543_v13 = vrot.slane %v2541_v61, 1  ;;  %v2546_v1 = vrot.slane %v2544_v54, 2  ;;  %v2682_v3 = vunpack.c.l.bf16 %v2540_v17 }
 0x2f8   : > { %v2549_v37 = vrot.slane %v2547_v51, 3  ;;  %v2552_v11 = vsel %vm439_vm0, %v2333_v34, %v2365_v56  ;;  %v2553_v6 = vsel %vm2370_vm6, %v2333_v34, %v2365_v56  ;;  %v2556_v18 = vsel %vm2374_vm7, %v2333_v34, %v2365_v56 }
 0x2f9   : > { %v2559_v58 = vsel %vm2378_vm8, %v2333_v34, %v2365_v56  ;;  %v2683_v21 = vunpack.c.l.bf16 %v2543_v13  ;;  %v2684_v39 = vunpack.c.l.bf16 %v2546_v1  ;;  %v3828_v14 = vrot.slane %v2682_v3, 9 }
 0x2fa   : > { %v2685_v10 = vunpack.c.l.bf16 %v2549_v37  ;;  %v2555_v28 = vrot.slane %v2553_v6, 1  ;;  %v2558_v41 = vrot.slane %v2556_v18, 2  ;;  %v2561_v23 = vrot.slane %v2559_v58, 3 }
 0x2fb   : > { %v2686_v31 = vunpack.c.l.bf16 %v2552_v11  ;;  %v3829_v4 = vrot.slane %v2683_v21, 9  ;;  %v3830_v62 = vrot.slane %v2684_v39, 9  ;;  %v3002_v47 = vmax.f32 %v2682_v3, %v3828_v14 }
 0x2fc   : > { %v3831_v29 = vrot.slane %v2685_v10, 9  ;;  %v2687_v15 = vunpack.c.l.bf16 %v2555_v28  ;;  %v2688_v43 = vunpack.c.l.bf16 %v2558_v41  ;;  %v2689_v16 = vunpack.c.l.bf16 %v2561_v23 }
 0x2fd   : > { %v3832_v63 = vrot.slane %v2686_v31, 9  ;;  %v3003_v55 = vmax.f32 %v2683_v21, %v3829_v4  ;;  %v3004_v38 = vmax.f32 %v2684_v39, %v3830_v62  ;;  %v3066_v30 = vpack.c.bf16 %v3002_v47, %v3002_v47 }
 0x2fe   : > { %v3005_v19 = vmax.f32 %v2685_v10, %v3831_v29  ;;  %v3833_v0 = vrot.slane %v2687_v15, 9  ;;  %v3834_v32 = vrot.slane %v2688_v43, 9  ;;  %v3835_v20 = vrot.slane %v2689_v16, 9 }
 0x2ff   : > { %v3006_v57 = vmax.f32 %v2686_v31, %v3832_v63  ;;  %v3067_v33 = vpack.c.bf16 %v3003_v55, %v3003_v55  ;;  %v3068_v2 = vpack.c.bf16 %v3004_v38, %v3004_v38  ;;  %v3194_v49 = vunpack.c.l.b16 %v3066_v30 }
 0x300   : > { %v3069_v52 = vpack.c.bf16 %v3005_v19, %v3005_v19  ;;  %v3007_v7 = vmax.f32 %v2687_v15, %v3833_v0  ;;  %v3008_v9 = vmax.f32 %v2688_v43, %v3834_v32  ;;  %v3009_v25 = vmax.f32 %v2689_v16, %v3835_v20 }
 0x301   : > { %v3070_v46 = vpack.c.bf16 %v3006_v57, %v3006_v57  ;;  %v3195_v12 = vunpack.c.l.b16 %v3067_v33  ;;  %v3196_v40 = vunpack.c.l.b16 %v3068_v2 }
 0x302   : > { %v3197_v48 = vunpack.c.l.b16 %v3069_v52  ;;  %v3071_v50 = vpack.c.bf16 %v3007_v7, %v3007_v7  ;;  %v3072_v59 = vpack.c.bf16 %v3008_v9, %v3008_v9  ;;  %v3073_v60 = vpack.c.bf16 %v3009_v25, %v3009_v25 }
 0x303   : > { %v3198_v5 = vunpack.c.l.b16 %v3070_v46  ;;  %v3304_v24 = vrot.slane %v3195_v12, 7  ;;  %v3306_v22 = vrot.slane %v3196_v40, 6 }
 0x304   : > { %v3199_v45 = vunpack.c.l.b16 %v3071_v50  ;;  %v3200_v35 = vunpack.c.l.b16 %v3072_v59  ;;  %v3308_v36 = vrot.slane %v3197_v48, 5  ;;  %v3201_v26 = vunpack.c.l.b16 %v3073_v60 }
 0x305   : > { %v3310_v27 = vrot.slane %v3198_v5, 4  ;;  %v3305_v8 = vsel %vm2370_vm6, %v3304_v24, %v3194_v49 }
 0x306   : > { %v3307_v42 = vsel %vm2374_vm7, %v3306_v22, %v3305_v8  ;;  %v3312_v53 = vrot.slane %v3199_v45, 3  ;;  %v3314_v34 = vrot.slane %v3200_v35, 2  ;;  %v3316_v61 = vrot.slane %v3201_v26, 1 }
 0x307   : > { %v3309_v44 = vsel %vm2378_vm8, %v3308_v36, %v3307_v42 }
 0x308   : > { %v3311_v56 = vsel %vm3209_vm9, %v3310_v27, %v3309_v44 }
 0x309   : > { %v3313_v17 = vsel %vm3212_vm10, %v3312_v53, %v3311_v56 }
 0x30a   : > { %v3315_v54 = vsel %vm3215_vm11, %v3314_v34, %v3313_v17 }
 0x30b   : > { %v3317_v51 = vsel %vm3218_vm12, %v3316_v61, %v3315_v54 }
 0x30c   : > { %v3325_v13 = vpack.c.b16 %v3317_v51, %v3317_v51 }
 0x30e   : > { %3341 = vst [vmem:[%s4629_s30 + $0x1c] sm:$0xf] %v3325_v13 }
 0x30f PF: > { %s14_s12 = sadd.s32 1, %s4029_s12  }
 0x310   : > { %p11_p7 = scmp.ge.s32.totalorder %s14_s12, 4  }
 0x312   :  { %13 = sbr.rel (!%p11_p7) target bundleno = 1 (0x1), region = 75 }
 0x317   :  { %3363 = vsyncpa [#allocation3], 1 }
 0x318   :  { %3365 = vsyncpa [#allocation3 + $0x1], 1 }

</bundles_post_ra>
